<compile_context>
chip_gen: v5e
topology: v5e:2x2
jax: 0.10.0
libtpu: 0.0.40
codegen_flags: <defaults>
</compile_context>

<pallas_src>
import functools

import jax
import jax.numpy as jnp
from jax import lax
from jax.experimental import pallas as pl
from jax.experimental.pallas import tpu as pltpu

NEG_SLOPE = 0.2   # nn.LeakyReLU(negative_slope=0.2)
LANE = 128

# slab A (bf16, (11*128, 128)): 128x128 weight blocks, row-block indices
A_EH_W0, A_EH_W1, A_EH_W2 = 0, 1, 2
A_EC_W0, A_EC_W1, A_EC_W2 = 3, 4, 5
A_PR_W0, A_PR_W1 = 6, 7
A_PCA = 8
A_D_W0, A_D_W1 = 9, 10
A_BLOCKS = 11

# slab C (f32, (16, 512)): bias rows (content in lanes 0:128 unless noted)
C_EH_B0, C_EH_B1, C_EH_B2 = 0, 1, 2
C_EC_B0, C_EC_B1, C_EC_B2 = 3, 4, 5
C_PR_B0, C_PR_B1 = 6, 7
C_D_B0, C_D_B1 = 8, 9       # d_b1 lane 127 holds 1.0 (b2 folding helper)
C_D_W2ROW = 10              # lane 127 holds d_b2
C_PCA_STDEV = 11
C_B_GATE = 12               # full 512 lanes: bih + bhh, gate-blockwise padded
C_ROWS = 16


def _leaky(x):
    return jnp.maximum(x, NEG_SLOPE * x)


# -----------------------------------------------------------------------------
# Fused forward kernel (single invocation): encoders -> LSTM recurrence ->
# batched pred MLP / PCA -> clamped cumulative sum -> mu / var / KL ->
# discriminator losses for both the G pass and the D pass (stacked batch).
# -----------------------------------------------------------------------------
def fused_forward_kernel(
    x0_ref, noises_ref, real_ref,          # activations (f32, lane-padded)
    slab_a_ref, slab_b_ref, slab_c_ref,    # packed weights / biases
    pred_xs_ref, stats_ref,                # outputs
    h_scratch,                             # VMEM (seq_len*2B, 128) f32
    *, seq_len, batch_g,
):
    b2 = 2 * batch_g                       # fused rows per step: [G rows; D rows]
    HP = LANE                              # padded hidden / comp / x / d_hidden dim

    def wa(k):                             # (128,128) bf16 weight block
        return slab_a_ref[k * LANE:(k + 1) * LANE, :]

    def bias(r):                           # (1,128) f32 bias row
        return slab_c_ref[r:r + 1, 0:LANE]

    def mm(x, w):                          # bf16 MXU matmul, f32 accumulation
        return jnp.dot(x.astype(slab_a_ref.dtype), w,
                       preferred_element_type=jnp.float32)

    x0 = x0_ref[...]                                               # (2B, 128)

    def mlp3(x, w0, b0, w1, b1, w2, b2_):
        h1 = _leaky(mm(x, w0) + b0)
        h2 = _leaky(mm(h1, w1) + b1)
        return mm(h2, w2) + b2_

    # --- encoders: initial LSTM state --------------------------------------
    h = mlp3(x0, wa(A_EH_W0), bias(C_EH_B0), wa(A_EH_W1), bias(C_EH_B1),
             wa(A_EH_W2), bias(C_EH_B2))
    c = mlp3(x0, wa(A_EC_W0), bias(C_EC_B0), wa(A_EC_W1), bias(C_EC_B1),
             wa(A_EC_W2), bias(C_EC_B2))

    # --- hoisted input->hidden projection for all steps + pre-added biases ---
    wih = slab_b_ref[0:LANE, :]                                    # (128,512) bf16
    whh = slab_b_ref[LANE:2 * LANE, :]
    b_gate = slab_c_ref[C_B_GATE:C_B_GATE + 1, :]                  # (1,512) f32
    gates_in = mm(noises_ref[...], wih) + b_gate                   # (T*2B, 512)

    # --- serial LSTM recurrence: unrolled, one small matmul per step ---------
    # each gate slice below is a full 128-lane block (h_dim padded to 128)
    for t in range(seq_len):
        g_t = gates_in[t * b2:(t + 1) * b2, :] + mm(h, whh)        # (2B, 512)
        i_g = jax.nn.sigmoid(g_t[:, 0:HP])
        f_g = jax.nn.sigmoid(g_t[:, HP:2 * HP])
        g_g = jnp.tanh(g_t[:, 2 * HP:3 * HP])
        o_g = jax.nn.sigmoid(g_t[:, 3 * HP:4 * HP])
        c = f_g * c + i_g * g_g
        h = o_g * jnp.tanh(c)
        h_scratch[t * b2:(t + 1) * b2, :] = h

    # --- batched pred MLP + PCA projection (one contiguous scratch read) -----
    hs = h_scratch[...]                                            # (T*2B, 128)
    p_hid = _leaky(mm(hs, wa(A_PR_W0)) + bias(C_PR_B0))
    p = mm(p_hid, wa(A_PR_W1)) + bias(C_PR_B1)                     # (T*2B, 128)
    # matmul(diag_embed(p), pca_comp).sum(dim=1) == p @ pca_comp
    delta = mm(p, wa(A_PCA))                                       # (T*2B, 128)

    # --- clamped cumulative integration (matmul-free) ------------------------
    pred_xs_ref[0] = x0
    cur = x0
    x1 = x0
    for t in range(seq_len):
        cur = jnp.clip(cur + delta[t * b2:(t + 1) * b2, :], -1.0, 1.0)
        pred_xs_ref[t + 1] = cur
        if t == 0:
            x1 = cur

    # --- pred_params mu / unbiased var over the G-pass rows only -------------
    rows = seq_len * b2
    rid = lax.broadcasted_iota(jnp.int32, (rows, 1), 0).astype(jnp.float32)
    # row is a G-pass row iff (rid mod 2B) < B ; float-mod (exact for small ints)
    mod = rid - jnp.floor(rid / float(b2)) * float(b2)
    g_row = (mod < float(batch_g)).astype(jnp.float32)             # (rows, 1)
    m = seq_len * batch_g
    mu = jnp.sum(p * g_row, axis=0, keepdims=True) / m             # (1, 128)
    diff = (p - mu) * g_row
    var = jnp.sum(diff * diff, axis=0, keepdims=True) / (m - 1)    # unbiased

    # KLCriterion(mu, var, 0, pca_stdev): var passed verbatim as logvar1 and
    # pca_stdev verbatim as logvar2, exactly as the PyTorch module does.
    logvar1 = var
    logvar2 = bias(C_PCA_STDEV)
    sigma1 = jnp.exp(0.5 * logvar1)
    sigma2 = jnp.exp(0.5 * logvar2)
    kld = (jnp.log(sigma2 / sigma1)
           + (jnp.exp(logvar1) + mu * mu) / (2.0 * jnp.exp(logvar2)) - 0.5)
    kl = jnp.sum(kld, keepdims=True)                               # (1, 1)

    # --- discriminator (shared); final layer = lane reduction, b2 pre-folded --
    d_w0 = wa(A_D_W0); d_b0 = bias(C_D_B0)
    d_w1 = wa(A_D_W1); d_b1 = bias(C_D_B1)       # lane 127 = 1.0
    w2row = bias(C_D_W2ROW)                      # lane 127 = d_b2

    def d_logit(x):
        h1 = _leaky(mm(x, d_w0) + d_b0)
        h2 = _leaky(mm(h1, d_w1) + d_b1)         # h2[:,127] == 1.0
        return jnp.sum(h2 * w2row, axis=1, keepdims=True)          # (rows, 1)

    # fake D input = pred_xs[1] - pred_xs[0] (D_len = 1), already resident
    fake_inp = x1 - x0                                             # (2B, 128)
    lf = d_logit(fake_inp)                                         # (2B, 1)
    fr = lax.broadcasted_iota(jnp.int32, (b2, 1), 0)
    g_mask = (fr < batch_g).astype(jnp.float32)                    # 1.0 on G rows
    tgt = g_mask                                                   # G target 1, D target 0
    sq = (lf - tgt) ** 2
    loss_fake_g = jnp.sum(sq * g_mask, axis=0, keepdims=True) / batch_g
    loss_fake_d = jnp.sum(sq * (1.0 - g_mask), axis=0, keepdims=True) / batch_g

    lr = d_logit(real_ref[...])                                    # (R, 1)
    loss_real = jnp.mean((lr - 1.0) ** 2, keepdims=True)           # (1, 1)

    # --- pack all stats/scalars into one lane-dense (8,128) store ------------
    lid = lax.broadcasted_iota(jnp.int32, (1, LANE), 1)
    scal_row = (jnp.where(lid == 0, kl, 0.0)
                + jnp.where(lid == 1, loss_fake_g, 0.0)
                + jnp.where(lid == 2, loss_fake_d, 0.0)
                + jnp.where(lid == 3, loss_real, 0.0))
    srow = lax.broadcasted_iota(jnp.int32, (8, LANE), 0)
    stats = jnp.where(srow == 0, jnp.broadcast_to(mu, (8, LANE)), 0.0)
    stats = jnp.where(srow == 1, jnp.broadcast_to(var, (8, LANE)), stats)
    stats = jnp.where(srow == 2, jnp.broadcast_to(scal_row, (8, LANE)), stats)
    stats_ref[...] = stats


# -----------------------------------------------------------------------------
# Module forward (loss computation only; no gradient / optimizer steps)
# -----------------------------------------------------------------------------
def kpseqgan_forward(real_x, x0, params, pca_comp, pca_stdev, key, G_len=8):
    B, x_dim = x0.shape
    h_dim = params['whh'].shape[0]
    n_dim = params['wih'].shape[0]
    n_comp = pca_comp.shape[0]
    d_hidden = params['d_w0'].shape[1]
    assert max(x_dim, h_dim, n_dim, n_comp) <= LANE and d_hidden < LANE

    def pad2(a, r, c):
        return jnp.pad(a, ((0, r - a.shape[0]), (0, c - a.shape[1])))

    p = params

    # --- slab A: eleven 128x128 weight blocks, bf16 --------------------------
    a_blocks = [
        pad2(p['eh_w0'], LANE, LANE), pad2(p['eh_w1'], LANE, LANE),
        pad2(p['eh_w2'], LANE, LANE),
        pad2(p['ec_w0'], LANE, LANE), pad2(p['ec_w1'], LANE, LANE),
        pad2(p['ec_w2'], LANE, LANE),
        pad2(p['pr_w0'], LANE, LANE), pad2(p['pr_w1'], LANE, LANE),
        pad2(pca_comp, LANE, LANE),
        pad2(p['d_w0'], LANE, LANE), pad2(p['d_w1'], LANE, LANE),
    ]
    assert len(a_blocks) == A_BLOCKS
    slab_a = jnp.concatenate(a_blocks, axis=0).astype(jnp.bfloat16)

    # --- slab B: LSTM weights, gate-blockwise padded to 4*128 columns, bf16 --
    def pad_gates(w, rows_to):
        r = w.shape[0]
        w4 = w.reshape(r, 4, h_dim)
        w4 = jnp.pad(w4, ((0, rows_to - r), (0, 0), (0, LANE - h_dim)))
        return w4.reshape(rows_to, 4 * LANE)

    slab_b = jnp.concatenate(
        [pad_gates(p['wih'], LANE), pad_gates(p['whh'], LANE)],
        axis=0).astype(jnp.bfloat16)

    # --- slab C: all biases (f32, 16x512) -------------------------------------
    b_gate = pad_gates(p['bih'] + p['bhh'], 1)                       # (1, 512)
    d_b1 = pad2(p['d_b1'], 1, LANE).at[0, LANE - 1].set(1.0)
    d_w2row = pad2(p['d_w2'].T, 1, LANE).at[0, LANE - 1].set(p['d_b2'][0, 0])
    c_rows = [
        pad2(p['eh_b0'], 1, LANE), pad2(p['eh_b1'], 1, LANE), pad2(p['eh_b2'], 1, LANE),
        pad2(p['ec_b0'], 1, LANE), pad2(p['ec_b1'], 1, LANE), pad2(p['ec_b2'], 1, LANE),
        pad2(p['pr_b0'], 1, LANE), pad2(p['pr_b1'], 1, LANE),
        pad2(p['d_b0'], 1, LANE), d_b1, d_w2row,
        pad2(pca_stdev, 1, LANE),
    ]
    c128 = jnp.pad(jnp.concatenate(c_rows, axis=0), ((0, 0), (0, 3 * LANE)))
    slab_c = jnp.concatenate(
        [c128, b_gate, jnp.zeros((C_ROWS - len(c_rows) - 1, 4 * LANE), jnp.float32)],
        axis=0)

    # --- activations: stack the two passes along the batch dim ----------------
    # rows [0:B] = G pass (fake target 1.0), rows [B:2B] = D pass (target 0.0)
    noises = jax.random.normal(key, (2, G_len, B, n_dim), jnp.float32)
    noises = jnp.transpose(noises, (1, 0, 2, 3)).reshape(G_len * 2 * B, n_dim)
    noises_p = jnp.pad(noises, ((0, 0), (0, LANE - n_dim)))

    x0_p = jnp.pad(jnp.concatenate([x0, x0], axis=0), ((0, 0), (0, LANE - x_dim)))
    real_inp = (real_x[1:] - real_x[:-1]).reshape(-1, x_dim)
    real_p = jnp.pad(real_inp, ((0, 0), (0, LANE - x_dim)))

    out_shape = (
        jax.ShapeDtypeStruct((G_len + 1, 2 * B, LANE), jnp.float32),  # pred_xs (both passes)
        jax.ShapeDtypeStruct((8, LANE), jnp.float32),                 # stats block
    )

    def full_spec(shape):
        nd = len(shape)
        return pl.BlockSpec(shape, lambda i, _nd=nd: (0,) * _nd)

    inputs = (x0_p, noises_p, real_p, slab_a, slab_b, slab_c)

    pred_xs, stats = pl.pallas_call(
        functools.partial(fused_forward_kernel, seq_len=G_len, batch_g=B),
        grid=(1,),
        out_shape=out_shape,
        in_specs=[full_spec(a.shape) for a in inputs],
        out_specs=(full_spec(out_shape[0].shape), full_spec(out_shape[1].shape)),
        scratch_shapes=[pltpu.VMEM((G_len * 2 * B, LANE), jnp.float32)],
        compiler_params=pltpu.CompilerParams(dimension_semantics=("arbitrary",)),
    )(*inputs)

    kl = stats[2, 0]
    loss_G = stats[2, 1]          # G pass: mean (logit_fake - 1)^2
    loss_D_fake = stats[2, 2]     # D pass: mean (logit_fake - 0)^2
    loss_D_real = stats[2, 3]     # mean (logit_real - 1)^2

    return {
        'loss_G': loss_G,
        'loss_D_real': loss_D_real,
        'loss_D_fake': loss_D_fake,
        'loss_vae': kl,
        # matches the PyTorch module verbatim: 1 - sqrt(mean), sqrt(mean)
        'logit_real': 1.0 - jnp.sqrt(loss_D_real),
        'logit_fake': jnp.sqrt(loss_D_fake),
        # extras (G-pass G_step outputs), sliced back to the unpadded dims
        'fake_x': pred_xs[:, :B, :x_dim],
        'pred_params_mu': stats[0, :n_comp],
        'pred_params_sigma': stats[1, :n_comp],
    }


# -----------------------------------------------------------------------------
# Deterministic parameter init (shapes follow the PyTorch __init__; Linear /
# LSTMCell weights stored pre-transposed to (in_features, out_features))
# -----------------------------------------------------------------------------
def init_params(key, x_dim, n_dim, h_dim, n_comp, d_hidden=50):
    keys = iter(jax.random.split(key, 40))

    def w(shape, scale=0.1):
        return scale * jax.random.normal(next(keys), shape, jnp.float32)

    def b(dim):
        return 0.01 * jax.random.normal(next(keys), (1, dim), jnp.float32)

    p = {}
    # ench / encc: MLP(x_dim, h_dim, h_dim, 1)
    for pre in ('eh', 'ec'):
        p[f'{pre}_w0'] = w((x_dim, h_dim)); p[f'{pre}_b0'] = b(h_dim)
        p[f'{pre}_w1'] = w((h_dim, h_dim)); p[f'{pre}_b1'] = b(h_dim)
        p[f'{pre}_w2'] = w((h_dim, h_dim)); p[f'{pre}_b2'] = b(h_dim)
    # frnn: LSTMCell(n_dim, h_dim); weights transposed to (in, 4*h), gates i,f,g,o
    p['wih'] = w((n_dim, 4 * h_dim)); p['whh'] = w((h_dim, 4 * h_dim))
    p['bih'] = b(4 * h_dim);          p['bhh'] = b(4 * h_dim)
    # pred: MLP(h_dim, n_comp, n_comp, 0)
    p['pr_w0'] = w((h_dim, n_comp)); p['pr_b0'] = b(n_comp)
    p['pr_w1'] = w((n_comp, n_comp)); p['pr_b1'] = b(n_comp)
    # D: MLP(x_dim, 50, 1, 1)
    p['d_w0'] = w((x_dim, d_hidden)); p['d_b0'] = b(d_hidden)
    p['d_w1'] = w((d_hidden, d_hidden)); p['d_b1'] = b(d_hidden)
    p['d_w2'] = w((d_hidden, 1)); p['d_b2'] = b(1)
    return p


if __name__ == "__main__":
    x_dim, n_dim, h_dim, n_comp = 100, 32, 32, 30
    B, G_len, T_real = 2, 8, 5

    key = jax.random.PRNGKey(0)
    kp, kpca, kstd, kx, kr, kn = jax.random.split(key, 6)

    params = init_params(kp, x_dim, n_dim, h_dim, n_comp)
    pca_comp = 0.05 * jax.random.normal(kpca, (n_comp, x_dim), jnp.float32)
    pca_stdev = 0.5 * jax.random.normal(kstd, (1, n_comp), jnp.float32)  # used as logvar2

    x0 = jnp.clip(jax.random.normal(kx, (B, x_dim), jnp.float32), -1.0, 1.0)
    real_x = jnp.clip(jax.random.normal(kr, (T_real, B, x_dim), jnp.float32), -1.0, 1.0)

    fwd = jax.jit(functools.partial(kpseqgan_forward, G_len=G_len))
    loss_dict = fwd(real_x, x0, params, pca_comp, pca_stdev, kn)
    loss_dict = jax.tree_util.tree_map(jax.block_until_ready, loss_dict)

    for k in ('loss_G', 'loss_D_real', 'loss_D_fake', 'loss_vae',
              'logit_real', 'logit_fake'):
        assert jnp.isfinite(loss_dict[k]).all(), k
    assert jnp.isfinite(loss_dict['fake_x']).all()
    assert jnp.isfinite(loss_dict['pred_params_mu']).all()
    print("KERNEL_OK")
</pallas_src>

<mosaic_0001>
module attributes {stable_mosaic.version = 11 : i64} {
  func.func @fused_forward_kernel(%arg0: i32, %arg1: memref<4x128xf32, #tpu.memory_space<vmem>>, %arg2: memref<32x128xf32, #tpu.memory_space<vmem>>, %arg3: memref<8x128xf32, #tpu.memory_space<vmem>>, %arg4: memref<1408x128xbf16, #tpu.memory_space<vmem>>, %arg5: memref<256x512xbf16, #tpu.memory_space<vmem>>, %arg6: memref<16x512xf32, #tpu.memory_space<vmem>>, %arg7: memref<9x4x128xf32, #tpu.memory_space<vmem>>, %arg8: memref<8x128xf32, #tpu.memory_space<vmem>>, %arg9: memref<32x128xf32, #tpu.memory_space<vmem>>) attributes {dimension_semantics = [#tpu.dimension_semantics<arbitrary>], iteration_bounds = array<i64: 1>, scalar_prefetch = 0 : i64, scratch_operands = 1 : i64, tpu.core_type = #tpu.core_type<tc>, window_params = [{pipeline_mode = #tpu.pipeline_mode<synchronous>, transform_indices = @transform_0, window_bounds = array<i64: 4, 128>}, {pipeline_mode = #tpu.pipeline_mode<synchronous>, transform_indices = @transform_1, window_bounds = array<i64: 32, 128>}, {pipeline_mode = #tpu.pipeline_mode<synchronous>, transform_indices = @transform_2, window_bounds = array<i64: 8, 128>}, {pipeline_mode = #tpu.pipeline_mode<synchronous>, transform_indices = @transform_3, window_bounds = array<i64: 1408, 128>}, {pipeline_mode = #tpu.pipeline_mode<synchronous>, transform_indices = @transform_4, window_bounds = array<i64: 256, 512>}, {pipeline_mode = #tpu.pipeline_mode<synchronous>, transform_indices = @transform_5, window_bounds = array<i64: 16, 512>}, {pipeline_mode = #tpu.pipeline_mode<synchronous>, transform_indices = @transform_6, window_bounds = array<i64: 9, 4, 128>}, {pipeline_mode = #tpu.pipeline_mode<synchronous>, transform_indices = @transform_7, window_bounds = array<i64: 8, 128>}]} {
    %c0 = arith.constant 0 : index
    %c0_0 = arith.constant 0 : index
    %0 = vector.load %arg1[%c0, %c0_0] : memref<4x128xf32, #tpu.memory_space<vmem>>, vector<4x128xf32>
    %c0_1 = arith.constant 0 : index
    %c0_2 = arith.constant 0 : index
    %1 = vector.load %arg4[%c0_1, %c0_2] : memref<1408x128xbf16, #tpu.memory_space<vmem>>, vector<128x128xbf16>
    %c0_3 = arith.constant 0 : index
    %c0_4 = arith.constant 0 : index
    %2 = vector.load %arg6[%c0_3, %c0_4] : memref<16x512xf32, #tpu.memory_space<vmem>>, vector<1x128xf32>
    %c128 = arith.constant 128 : index
    %c0_5 = arith.constant 0 : index
    %3 = vector.load %arg4[%c128, %c0_5] : memref<1408x128xbf16, #tpu.memory_space<vmem>>, vector<128x128xbf16>
    %c1 = arith.constant 1 : index
    %c0_6 = arith.constant 0 : index
    %4 = vector.load %arg6[%c1, %c0_6] : memref<16x512xf32, #tpu.memory_space<vmem>>, vector<1x128xf32>
    %c256 = arith.constant 256 : index
    %c0_7 = arith.constant 0 : index
    %5 = vector.load %arg4[%c256, %c0_7] : memref<1408x128xbf16, #tpu.memory_space<vmem>>, vector<128x128xbf16>
    %c2 = arith.constant 2 : index
    %c0_8 = arith.constant 0 : index
    %6 = vector.load %arg6[%c2, %c0_8] : memref<16x512xf32, #tpu.memory_space<vmem>>, vector<1x128xf32>
    %7 = arith.truncf %0 : vector<4x128xf32> to vector<4x128xbf16>
    %cst = arith.constant dense<0.000000e+00> : vector<4x128xf32>
    %8 = tpu.matmul %7, %1, %cst {dimension_numbers = #tpu.dot_dimension_numbers<[1], [0], [0], [1], [0, 0, 1, 1], [], []>} : vector<4x128xbf16>, vector<128x128xbf16>, vector<4x128xf32> -> vector<4x128xf32>
    %9 = vector.broadcast %2 : vector<1x128xf32> to vector<4x128xf32>
    %10 = arith.addf %8, %9 : vector<4x128xf32>
    %cst_9 = arith.constant 2.000000e-01 : f32
    %11 = vector.broadcast %cst_9 : f32 to vector<4x128xf32>
    %12 = arith.mulf %11, %10 : vector<4x128xf32>
    %13 = arith.maximumf %10, %12 : vector<4x128xf32>
    %14 = arith.truncf %13 : vector<4x128xf32> to vector<4x128xbf16>
    %cst_10 = arith.constant dense<0.000000e+00> : vector<4x128xf32>
    %15 = tpu.matmul %14, %3, %cst_10 {dimension_numbers = #tpu.dot_dimension_numbers<[1], [0], [0], [1], [0, 0, 1, 1], [], []>} : vector<4x128xbf16>, vector<128x128xbf16>, vector<4x128xf32> -> vector<4x128xf32>
    %16 = vector.broadcast %4 : vector<1x128xf32> to vector<4x128xf32>
    %17 = arith.addf %15, %16 : vector<4x128xf32>
    %cst_11 = arith.constant 2.000000e-01 : f32
    %18 = vector.broadcast %cst_11 : f32 to vector<4x128xf32>
    %19 = arith.mulf %18, %17 : vector<4x128xf32>
    %20 = arith.maximumf %17, %19 : vector<4x128xf32>
    %21 = arith.truncf %20 : vector<4x128xf32> to vector<4x128xbf16>
    %cst_12 = arith.constant dense<0.000000e+00> : vector<4x128xf32>
    %22 = tpu.matmul %21, %5, %cst_12 {dimension_numbers = #tpu.dot_dimension_numbers<[1], [0], [0], [1], [0, 0, 1, 1], [], []>} : vector<4x128xbf16>, vector<128x128xbf16>, vector<4x128xf32> -> vector<4x128xf32>
    %23 = vector.broadcast %6 : vector<1x128xf32> to vector<4x128xf32>
    %24 = arith.addf %22, %23 : vector<4x128xf32>
    %c384 = arith.constant 384 : index
    %c0_13 = arith.constant 0 : index
    %25 = vector.load %arg4[%c384, %c0_13] : memref<1408x128xbf16, #tpu.memory_space<vmem>>, vector<128x128xbf16>
    %c3 = arith.constant 3 : index
    %c0_14 = arith.constant 0 : index
    %26 = vector.load %arg6[%c3, %c0_14] : memref<16x512xf32, #tpu.memory_space<vmem>>, vector<1x128xf32>
    %c512 = arith.constant 512 : index
    %c0_15 = arith.constant 0 : index
    %27 = vector.load %arg4[%c512, %c0_15] : memref<1408x128xbf16, #tpu.memory_space<vmem>>, vector<128x128xbf16>
    %c4 = arith.constant 4 : index
    %c0_16 = arith.constant 0 : index
    %28 = vector.load %arg6[%c4, %c0_16] : memref<16x512xf32, #tpu.memory_space<vmem>>, vector<1x128xf32>
    %c640 = arith.constant 640 : index
    %c0_17 = arith.constant 0 : index
    %29 = vector.load %arg4[%c640, %c0_17] : memref<1408x128xbf16, #tpu.memory_space<vmem>>, vector<128x128xbf16>
    %c5 = arith.constant 5 : index
    %c0_18 = arith.constant 0 : index
    %30 = vector.load %arg6[%c5, %c0_18] : memref<16x512xf32, #tpu.memory_space<vmem>>, vector<1x128xf32>
    %31 = arith.truncf %0 : vector<4x128xf32> to vector<4x128xbf16>
    %cst_19 = arith.constant dense<0.000000e+00> : vector<4x128xf32>
    %32 = tpu.matmul %31, %25, %cst_19 {dimension_numbers = #tpu.dot_dimension_numbers<[1], [0], [0], [1], [0, 0, 1, 1], [], []>} : vector<4x128xbf16>, vector<128x128xbf16>, vector<4x128xf32> -> vector<4x128xf32>
    %33 = vector.broadcast %26 : vector<1x128xf32> to vector<4x128xf32>
    %34 = arith.addf %32, %33 : vector<4x128xf32>
    %cst_20 = arith.constant 2.000000e-01 : f32
    %35 = vector.broadcast %cst_20 : f32 to vector<4x128xf32>
    %36 = arith.mulf %35, %34 : vector<4x128xf32>
    %37 = arith.maximumf %34, %36 : vector<4x128xf32>
    %38 = arith.truncf %37 : vector<4x128xf32> to vector<4x128xbf16>
    %cst_21 = arith.constant dense<0.000000e+00> : vector<4x128xf32>
    %39 = tpu.matmul %38, %27, %cst_21 {dimension_numbers = #tpu.dot_dimension_numbers<[1], [0], [0], [1], [0, 0, 1, 1], [], []>} : vector<4x128xbf16>, vector<128x128xbf16>, vector<4x128xf32> -> vector<4x128xf32>
    %40 = vector.broadcast %28 : vector<1x128xf32> to vector<4x128xf32>
    %41 = arith.addf %39, %40 : vector<4x128xf32>
    %cst_22 = arith.constant 2.000000e-01 : f32
    %42 = vector.broadcast %cst_22 : f32 to vector<4x128xf32>
    %43 = arith.mulf %42, %41 : vector<4x128xf32>
    %44 = arith.maximumf %41, %43 : vector<4x128xf32>
    %45 = arith.truncf %44 : vector<4x128xf32> to vector<4x128xbf16>
    %cst_23 = arith.constant dense<0.000000e+00> : vector<4x128xf32>
    %46 = tpu.matmul %45, %29, %cst_23 {dimension_numbers = #tpu.dot_dimension_numbers<[1], [0], [0], [1], [0, 0, 1, 1], [], []>} : vector<4x128xbf16>, vector<128x128xbf16>, vector<4x128xf32> -> vector<4x128xf32>
    %47 = vector.broadcast %30 : vector<1x128xf32> to vector<4x128xf32>
    %48 = arith.addf %46, %47 : vector<4x128xf32>
    %c0_24 = arith.constant 0 : index
    %c0_25 = arith.constant 0 : index
    %49 = vector.load %arg5[%c0_24, %c0_25] : memref<256x512xbf16, #tpu.memory_space<vmem>>, vector<128x512xbf16>
    %c128_26 = arith.constant 128 : index
    %c0_27 = arith.constant 0 : index
    %50 = vector.load %arg5[%c128_26, %c0_27] : memref<256x512xbf16, #tpu.memory_space<vmem>>, vector<128x512xbf16>
    %c12 = arith.constant 12 : index
    %c0_28 = arith.constant 0 : index
    %51 = vector.load %arg6[%c12, %c0_28] : memref<16x512xf32, #tpu.memory_space<vmem>>, vector<1x512xf32>
    %c0_29 = arith.constant 0 : index
    %c0_30 = arith.constant 0 : index
    %52 = vector.load %arg2[%c0_29, %c0_30] : memref<32x128xf32, #tpu.memory_space<vmem>>, vector<32x128xf32>
    %53 = arith.truncf %52 : vector<32x128xf32> to vector<32x128xbf16>
    %cst_31 = arith.constant dense<0.000000e+00> : vector<32x512xf32>
    %54 = tpu.matmul %53, %49, %cst_31 {dimension_numbers = #tpu.dot_dimension_numbers<[1], [0], [0], [1], [0, 0, 1, 1], [], []>} : vector<32x128xbf16>, vector<128x512xbf16>, vector<32x512xf32> -> vector<32x512xf32>
    %55 = vector.broadcast %51 : vector<1x512xf32> to vector<32x512xf32>
    %56 = arith.addf %54, %55 : vector<32x512xf32>
    %57 = vector.extract_strided_slice %56 {offsets = [0, 0], sizes = [4, 512], strides = [1, 1]} : vector<32x512xf32> to vector<4x512xf32>
    %58 = arith.truncf %24 : vector<4x128xf32> to vector<4x128xbf16>
    %cst_32 = arith.constant dense<0.000000e+00> : vector<4x512xf32>
    %59 = tpu.matmul %58, %50, %cst_32 {dimension_numbers = #tpu.dot_dimension_numbers<[1], [0], [0], [1], [0, 0, 1, 1], [], []>} : vector<4x128xbf16>, vector<128x512xbf16>, vector<4x512xf32> -> vector<4x512xf32>
    %60 = arith.addf %57, %59 : vector<4x512xf32>
    %61 = vector.extract_strided_slice %60 {offsets = [0, 0], sizes = [4, 128], strides = [1, 1]} : vector<4x512xf32> to vector<4x128xf32>
    %62 = arith.negf %61 : vector<4x128xf32>
    %63 = math.exp %62 : vector<4x128xf32>
    %cst_33 = arith.constant 1.000000e+00 : f32
    %64 = vector.broadcast %cst_33 : f32 to vector<4x128xf32>
    %65 = arith.addf %64, %63 : vector<4x128xf32>
    %66 = arith.divf %64, %65 : vector<4x128xf32>
    %67 = vector.extract_strided_slice %60 {offsets = [0, 128], sizes = [4, 128], strides = [1, 1]} : vector<4x512xf32> to vector<4x128xf32>
    %68 = arith.negf %67 : vector<4x128xf32>
    %69 = math.exp %68 : vector<4x128xf32>
    %cst_34 = arith.constant 1.000000e+00 : f32
    %70 = vector.broadcast %cst_34 : f32 to vector<4x128xf32>
    %71 = arith.addf %70, %69 : vector<4x128xf32>
    %72 = arith.divf %70, %71 : vector<4x128xf32>
    %73 = vector.extract_strided_slice %60 {offsets = [0, 256], sizes = [4, 128], strides = [1, 1]} : vector<4x512xf32> to vector<4x128xf32>
    %74 = math.tanh %73 : vector<4x128xf32>
    %75 = vector.extract_strided_slice %60 {offsets = [0, 384], sizes = [4, 128], strides = [1, 1]} : vector<4x512xf32> to vector<4x128xf32>
    %76 = arith.negf %75 : vector<4x128xf32>
    %77 = math.exp %76 : vector<4x128xf32>
    %cst_35 = arith.constant 1.000000e+00 : f32
    %78 = vector.broadcast %cst_35 : f32 to vector<4x128xf32>
    %79 = arith.addf %78, %77 : vector<4x128xf32>
    %80 = arith.divf %78, %79 : vector<4x128xf32>
    %81 = arith.mulf %72, %48 : vector<4x128xf32>
    %82 = arith.mulf %66, %74 : vector<4x128xf32>
    %83 = arith.addf %81, %82 : vector<4x128xf32>
    %84 = math.tanh %83 : vector<4x128xf32>
    %85 = arith.mulf %80, %84 : vector<4x128xf32>
    %c0_36 = arith.constant 0 : index
    %c0_37 = arith.constant 0 : index
    %86 = vector.load %arg9[%c0_36, %c0_37] : memref<32x128xf32, #tpu.memory_space<vmem>>, vector<4x128xf32>
    tpu.vector_store %arg9[%c0_36, %c0_37], %85 {strides = array<i32>} : memref<32x128xf32, #tpu.memory_space<vmem>>, vector<4x128xf32>,
    %87 = vector.extract_strided_slice %56 {offsets = [4, 0], sizes = [4, 512], strides = [1, 1]} : vector<32x512xf32> to vector<4x512xf32>
    %88 = arith.truncf %85 : vector<4x128xf32> to vector<4x128xbf16>
    %cst_38 = arith.constant dense<0.000000e+00> : vector<4x512xf32>
    %89 = tpu.matmul %88, %50, %cst_38 {dimension_numbers = #tpu.dot_dimension_numbers<[1], [0], [0], [1], [0, 0, 1, 1], [], []>} : vector<4x128xbf16>, vector<128x512xbf16>, vector<4x512xf32> -> vector<4x512xf32>
    %90 = arith.addf %87, %89 : vector<4x512xf32>
    %91 = vector.extract_strided_slice %90 {offsets = [0, 0], sizes = [4, 128], strides = [1, 1]} : vector<4x512xf32> to vector<4x128xf32>
    %92 = arith.negf %91 : vector<4x128xf32>
    %93 = math.exp %92 : vector<4x128xf32>
    %cst_39 = arith.constant 1.000000e+00 : f32
    %94 = vector.broadcast %cst_39 : f32 to vector<4x128xf32>
    %95 = arith.addf %94, %93 : vector<4x128xf32>
    %96 = arith.divf %94, %95 : vector<4x128xf32>
    %97 = vector.extract_strided_slice %90 {offsets = [0, 128], sizes = [4, 128], strides = [1, 1]} : vector<4x512xf32> to vector<4x128xf32>
    %98 = arith.negf %97 : vector<4x128xf32>
    %99 = math.exp %98 : vector<4x128xf32>
    %cst_40 = arith.constant 1.000000e+00 : f32
    %100 = vector.broadcast %cst_40 : f32 to vector<4x128xf32>
    %101 = arith.addf %100, %99 : vector<4x128xf32>
    %102 = arith.divf %100, %101 : vector<4x128xf32>
    %103 = vector.extract_strided_slice %90 {offsets = [0, 256], sizes = [4, 128], strides = [1, 1]} : vector<4x512xf32> to vector<4x128xf32>
    %104 = math.tanh %103 : vector<4x128xf32>
    %105 = vector.extract_strided_slice %90 {offsets = [0, 384], sizes = [4, 128], strides = [1, 1]} : vector<4x512xf32> to vector<4x128xf32>
    %106 = arith.negf %105 : vector<4x128xf32>
    %107 = math.exp %106 : vector<4x128xf32>
    %cst_41 = arith.constant 1.000000e+00 : f32
    %108 = vector.broadcast %cst_41 : f32 to vector<4x128xf32>
    %109 = arith.addf %108, %107 : vector<4x128xf32>
    %110 = arith.divf %108, %109 : vector<4x128xf32>
    %111 = arith.mulf %102, %83 : vector<4x128xf32>
    %112 = arith.mulf %96, %104 : vector<4x128xf32>
    %113 = arith.addf %111, %112 : vector<4x128xf32>
    %114 = math.tanh %113 : vector<4x128xf32>
    %115 = arith.mulf %110, %114 : vector<4x128xf32>
    %c4_42 = arith.constant 4 : index
    %c0_43 = arith.constant 0 : index
    %116 = vector.load %arg9[%c4_42, %c0_43] : memref<32x128xf32, #tpu.memory_space<vmem>>, vector<4x128xf32>
    tpu.vector_store %arg9[%c4_42, %c0_43], %115 {strides = array<i32>} : memref<32x128xf32, #tpu.memory_space<vmem>>, vector<4x128xf32>,
    %117 = vector.extract_strided_slice %56 {offsets = [8, 0], sizes = [4, 512], strides = [1, 1]} : vector<32x512xf32> to vector<4x512xf32>
    %118 = arith.truncf %115 : vector<4x128xf32> to vector<4x128xbf16>
    %cst_44 = arith.constant dense<0.000000e+00> : vector<4x512xf32>
    %119 = tpu.matmul %118, %50, %cst_44 {dimension_numbers = #tpu.dot_dimension_numbers<[1], [0], [0], [1], [0, 0, 1, 1], [], []>} : vector<4x128xbf16>, vector<128x512xbf16>, vector<4x512xf32> -> vector<4x512xf32>
    %120 = arith.addf %117, %119 : vector<4x512xf32>
    %121 = vector.extract_strided_slice %120 {offsets = [0, 0], sizes = [4, 128], strides = [1, 1]} : vector<4x512xf32> to vector<4x128xf32>
    %122 = arith.negf %121 : vector<4x128xf32>
    %123 = math.exp %122 : vector<4x128xf32>
    %cst_45 = arith.constant 1.000000e+00 : f32
    %124 = vector.broadcast %cst_45 : f32 to vector<4x128xf32>
    %125 = arith.addf %124, %123 : vector<4x128xf32>
    %126 = arith.divf %124, %125 : vector<4x128xf32>
    %127 = vector.extract_strided_slice %120 {offsets = [0, 128], sizes = [4, 128], strides = [1, 1]} : vector<4x512xf32> to vector<4x128xf32>
    %128 = arith.negf %127 : vector<4x128xf32>
    %129 = math.exp %128 : vector<4x128xf32>
    %cst_46 = arith.constant 1.000000e+00 : f32
    %130 = vector.broadcast %cst_46 : f32 to vector<4x128xf32>
    %131 = arith.addf %130, %129 : vector<4x128xf32>
    %132 = arith.divf %130, %131 : vector<4x128xf32>
    %133 = vector.extract_strided_slice %120 {offsets = [0, 256], sizes = [4, 128], strides = [1, 1]} : vector<4x512xf32> to vector<4x128xf32>
    %134 = math.tanh %133 : vector<4x128xf32>
    %135 = vector.extract_strided_slice %120 {offsets = [0, 384], sizes = [4, 128], strides = [1, 1]} : vector<4x512xf32> to vector<4x128xf32>
    %136 = arith.negf %135 : vector<4x128xf32>
    %137 = math.exp %136 : vector<4x128xf32>
    %cst_47 = arith.constant 1.000000e+00 : f32
    %138 = vector.broadcast %cst_47 : f32 to vector<4x128xf32>
    %139 = arith.addf %138, %137 : vector<4x128xf32>
    %140 = arith.divf %138, %139 : vector<4x128xf32>
    %141 = arith.mulf %132, %113 : vector<4x128xf32>
    %142 = arith.mulf %126, %134 : vector<4x128xf32>
    %143 = arith.addf %141, %142 : vector<4x128xf32>
    %144 = math.tanh %143 : vector<4x128xf32>
    %145 = arith.mulf %140, %144 : vector<4x128xf32>
    %c8 = arith.constant 8 : index
    %c0_48 = arith.constant 0 : index
    %146 = vector.load %arg9[%c8, %c0_48] : memref<32x128xf32, #tpu.memory_space<vmem>>, vector<4x128xf32>
    tpu.vector_store %arg9[%c8, %c0_48], %145 {strides = array<i32>} : memref<32x128xf32, #tpu.memory_space<vmem>>, vector<4x128xf32>,
    %147 = vector.extract_strided_slice %56 {offsets = [12, 0], sizes = [4, 512], strides = [1, 1]} : vector<32x512xf32> to vector<4x512xf32>
    %148 = arith.truncf %145 : vector<4x128xf32> to vector<4x128xbf16>
    %cst_49 = arith.constant dense<0.000000e+00> : vector<4x512xf32>
    %149 = tpu.matmul %148, %50, %cst_49 {dimension_numbers = #tpu.dot_dimension_numbers<[1], [0], [0], [1], [0, 0, 1, 1], [], []>} : vector<4x128xbf16>, vector<128x512xbf16>, vector<4x512xf32> -> vector<4x512xf32>
    %150 = arith.addf %147, %149 : vector<4x512xf32>
    %151 = vector.extract_strided_slice %150 {offsets = [0, 0], sizes = [4, 128], strides = [1, 1]} : vector<4x512xf32> to vector<4x128xf32>
    %152 = arith.negf %151 : vector<4x128xf32>
    %153 = math.exp %152 : vector<4x128xf32>
    %cst_50 = arith.constant 1.000000e+00 : f32
    %154 = vector.broadcast %cst_50 : f32 to vector<4x128xf32>
    %155 = arith.addf %154, %153 : vector<4x128xf32>
    %156 = arith.divf %154, %155 : vector<4x128xf32>
    %157 = vector.extract_strided_slice %150 {offsets = [0, 128], sizes = [4, 128], strides = [1, 1]} : vector<4x512xf32> to vector<4x128xf32>
    %158 = arith.negf %157 : vector<4x128xf32>
    %159 = math.exp %158 : vector<4x128xf32>
    %cst_51 = arith.constant 1.000000e+00 : f32
    %160 = vector.broadcast %cst_51 : f32 to vector<4x128xf32>
    %161 = arith.addf %160, %159 : vector<4x128xf32>
    %162 = arith.divf %160, %161 : vector<4x128xf32>
    %163 = vector.extract_strided_slice %150 {offsets = [0, 256], sizes = [4, 128], strides = [1, 1]} : vector<4x512xf32> to vector<4x128xf32>
    %164 = math.tanh %163 : vector<4x128xf32>
    %165 = vector.extract_strided_slice %150 {offsets = [0, 384], sizes = [4, 128], strides = [1, 1]} : vector<4x512xf32> to vector<4x128xf32>
    %166 = arith.negf %165 : vector<4x128xf32>
    %167 = math.exp %166 : vector<4x128xf32>
    %cst_52 = arith.constant 1.000000e+00 : f32
    %168 = vector.broadcast %cst_52 : f32 to vector<4x128xf32>
    %169 = arith.addf %168, %167 : vector<4x128xf32>
    %170 = arith.divf %168, %169 : vector<4x128xf32>
    %171 = arith.mulf %162, %143 : vector<4x128xf32>
    %172 = arith.mulf %156, %164 : vector<4x128xf32>
    %173 = arith.addf %171, %172 : vector<4x128xf32>
    %174 = math.tanh %173 : vector<4x128xf32>
    %175 = arith.mulf %170, %174 : vector<4x128xf32>
    %c12_53 = arith.constant 12 : index
    %c0_54 = arith.constant 0 : index
    %176 = vector.load %arg9[%c12_53, %c0_54] : memref<32x128xf32, #tpu.memory_space<vmem>>, vector<4x128xf32>
    tpu.vector_store %arg9[%c12_53, %c0_54], %175 {strides = array<i32>} : memref<32x128xf32, #tpu.memory_space<vmem>>, vector<4x128xf32>,
    %177 = vector.extract_strided_slice %56 {offsets = [16, 0], sizes = [4, 512], strides = [1, 1]} : vector<32x512xf32> to vector<4x512xf32>
    %178 = arith.truncf %175 : vector<4x128xf32> to vector<4x128xbf16>
    %cst_55 = arith.constant dense<0.000000e+00> : vector<4x512xf32>
    %179 = tpu.matmul %178, %50, %cst_55 {dimension_numbers = #tpu.dot_dimension_numbers<[1], [0], [0], [1], [0, 0, 1, 1], [], []>} : vector<4x128xbf16>, vector<128x512xbf16>, vector<4x512xf32> -> vector<4x512xf32>
    %180 = arith.addf %177, %179 : vector<4x512xf32>
    %181 = vector.extract_strided_slice %180 {offsets = [0, 0], sizes = [4, 128], strides = [1, 1]} : vector<4x512xf32> to vector<4x128xf32>
    %182 = arith.negf %181 : vector<4x128xf32>
    %183 = math.exp %182 : vector<4x128xf32>
    %cst_56 = arith.constant 1.000000e+00 : f32
    %184 = vector.broadcast %cst_56 : f32 to vector<4x128xf32>
    %185 = arith.addf %184, %183 : vector<4x128xf32>
    %186 = arith.divf %184, %185 : vector<4x128xf32>
    %187 = vector.extract_strided_slice %180 {offsets = [0, 128], sizes = [4, 128], strides = [1, 1]} : vector<4x512xf32> to vector<4x128xf32>
    %188 = arith.negf %187 : vector<4x128xf32>
    %189 = math.exp %188 : vector<4x128xf32>
    %cst_57 = arith.constant 1.000000e+00 : f32
    %190 = vector.broadcast %cst_57 : f32 to vector<4x128xf32>
    %191 = arith.addf %190, %189 : vector<4x128xf32>
    %192 = arith.divf %190, %191 : vector<4x128xf32>
    %193 = vector.extract_strided_slice %180 {offsets = [0, 256], sizes = [4, 128], strides = [1, 1]} : vector<4x512xf32> to vector<4x128xf32>
    %194 = math.tanh %193 : vector<4x128xf32>
    %195 = vector.extract_strided_slice %180 {offsets = [0, 384], sizes = [4, 128], strides = [1, 1]} : vector<4x512xf32> to vector<4x128xf32>
    %196 = arith.negf %195 : vector<4x128xf32>
    %197 = math.exp %196 : vector<4x128xf32>
    %cst_58 = arith.constant 1.000000e+00 : f32
    %198 = vector.broadcast %cst_58 : f32 to vector<4x128xf32>
    %199 = arith.addf %198, %197 : vector<4x128xf32>
    %200 = arith.divf %198, %199 : vector<4x128xf32>
    %201 = arith.mulf %192, %173 : vector<4x128xf32>
    %202 = arith.mulf %186, %194 : vector<4x128xf32>
    %203 = arith.addf %201, %202 : vector<4x128xf32>
    %204 = math.tanh %203 : vector<4x128xf32>
    %205 = arith.mulf %200, %204 : vector<4x128xf32>
    %c16 = arith.constant 16 : index
    %c0_59 = arith.constant 0 : index
    %206 = vector.load %arg9[%c16, %c0_59] : memref<32x128xf32, #tpu.memory_space<vmem>>, vector<4x128xf32>
    tpu.vector_store %arg9[%c16, %c0_59], %205 {strides = array<i32>} : memref<32x128xf32, #tpu.memory_space<vmem>>, vector<4x128xf32>,
    %207 = vector.extract_strided_slice %56 {offsets = [20, 0], sizes = [4, 512], strides = [1, 1]} : vector<32x512xf32> to vector<4x512xf32>
    %208 = arith.truncf %205 : vector<4x128xf32> to vector<4x128xbf16>
    %cst_60 = arith.constant dense<0.000000e+00> : vector<4x512xf32>
    %209 = tpu.matmul %208, %50, %cst_60 {dimension_numbers = #tpu.dot_dimension_numbers<[1], [0], [0], [1], [0, 0, 1, 1], [], []>} : vector<4x128xbf16>, vector<128x512xbf16>, vector<4x512xf32> -> vector<4x512xf32>
    %210 = arith.addf %207, %209 : vector<4x512xf32>
    %211 = vector.extract_strided_slice %210 {offsets = [0, 0], sizes = [4, 128], strides = [1, 1]} : vector<4x512xf32> to vector<4x128xf32>
    %212 = arith.negf %211 : vector<4x128xf32>
    %213 = math.exp %212 : vector<4x128xf32>
    %cst_61 = arith.constant 1.000000e+00 : f32
    %214 = vector.broadcast %cst_61 : f32 to vector<4x128xf32>
    %215 = arith.addf %214, %213 : vector<4x128xf32>
    %216 = arith.divf %214, %215 : vector<4x128xf32>
    %217 = vector.extract_strided_slice %210 {offsets = [0, 128], sizes = [4, 128], strides = [1, 1]} : vector<4x512xf32> to vector<4x128xf32>
    %218 = arith.negf %217 : vector<4x128xf32>
    %219 = math.exp %218 : vector<4x128xf32>
    %cst_62 = arith.constant 1.000000e+00 : f32
    %220 = vector.broadcast %cst_62 : f32 to vector<4x128xf32>
    %221 = arith.addf %220, %219 : vector<4x128xf32>
    %222 = arith.divf %220, %221 : vector<4x128xf32>
    %223 = vector.extract_strided_slice %210 {offsets = [0, 256], sizes = [4, 128], strides = [1, 1]} : vector<4x512xf32> to vector<4x128xf32>
    %224 = math.tanh %223 : vector<4x128xf32>
    %225 = vector.extract_strided_slice %210 {offsets = [0, 384], sizes = [4, 128], strides = [1, 1]} : vector<4x512xf32> to vector<4x128xf32>
    %226 = arith.negf %225 : vector<4x128xf32>
    %227 = math.exp %226 : vector<4x128xf32>
    %cst_63 = arith.constant 1.000000e+00 : f32
    %228 = vector.broadcast %cst_63 : f32 to vector<4x128xf32>
    %229 = arith.addf %228, %227 : vector<4x128xf32>
    %230 = arith.divf %228, %229 : vector<4x128xf32>
    %231 = arith.mulf %222, %203 : vector<4x128xf32>
    %232 = arith.mulf %216, %224 : vector<4x128xf32>
    %233 = arith.addf %231, %232 : vector<4x128xf32>
    %234 = math.tanh %233 : vector<4x128xf32>
    %235 = arith.mulf %230, %234 : vector<4x128xf32>
    %c20 = arith.constant 20 : index
    %c0_64 = arith.constant 0 : index
    %236 = vector.load %arg9[%c20, %c0_64] : memref<32x128xf32, #tpu.memory_space<vmem>>, vector<4x128xf32>
    tpu.vector_store %arg9[%c20, %c0_64], %235 {strides = array<i32>} : memref<32x128xf32, #tpu.memory_space<vmem>>, vector<4x128xf32>,
    %237 = vector.extract_strided_slice %56 {offsets = [24, 0], sizes = [4, 512], strides = [1, 1]} : vector<32x512xf32> to vector<4x512xf32>
    %238 = arith.truncf %235 : vector<4x128xf32> to vector<4x128xbf16>
    %cst_65 = arith.constant dense<0.000000e+00> : vector<4x512xf32>
    %239 = tpu.matmul %238, %50, %cst_65 {dimension_numbers = #tpu.dot_dimension_numbers<[1], [0], [0], [1], [0, 0, 1, 1], [], []>} : vector<4x128xbf16>, vector<128x512xbf16>, vector<4x512xf32> -> vector<4x512xf32>
    %240 = arith.addf %237, %239 : vector<4x512xf32>
    %241 = vector.extract_strided_slice %240 {offsets = [0, 0], sizes = [4, 128], strides = [1, 1]} : vector<4x512xf32> to vector<4x128xf32>
    %242 = arith.negf %241 : vector<4x128xf32>
    %243 = math.exp %242 : vector<4x128xf32>
    %cst_66 = arith.constant 1.000000e+00 : f32
    %244 = vector.broadcast %cst_66 : f32 to vector<4x128xf32>
    %245 = arith.addf %244, %243 : vector<4x128xf32>
    %246 = arith.divf %244, %245 : vector<4x128xf32>
    %247 = vector.extract_strided_slice %240 {offsets = [0, 128], sizes = [4, 128], strides = [1, 1]} : vector<4x512xf32> to vector<4x128xf32>
    %248 = arith.negf %247 : vector<4x128xf32>
    %249 = math.exp %248 : vector<4x128xf32>
    %cst_67 = arith.constant 1.000000e+00 : f32
    %250 = vector.broadcast %cst_67 : f32 to vector<4x128xf32>
    %251 = arith.addf %250, %249 : vector<4x128xf32>
    %252 = arith.divf %250, %251 : vector<4x128xf32>
    %253 = vector.extract_strided_slice %240 {offsets = [0, 256], sizes = [4, 128], strides = [1, 1]} : vector<4x512xf32> to vector<4x128xf32>
    %254 = math.tanh %253 : vector<4x128xf32>
    %255 = vector.extract_strided_slice %240 {offsets = [0, 384], sizes = [4, 128], strides = [1, 1]} : vector<4x512xf32> to vector<4x128xf32>
    %256 = arith.negf %255 : vector<4x128xf32>
    %257 = math.exp %256 : vector<4x128xf32>
    %cst_68 = arith.constant 1.000000e+00 : f32
    %258 = vector.broadcast %cst_68 : f32 to vector<4x128xf32>
    %259 = arith.addf %258, %257 : vector<4x128xf32>
    %260 = arith.divf %258, %259 : vector<4x128xf32>
    %261 = arith.mulf %252, %233 : vector<4x128xf32>
    %262 = arith.mulf %246, %254 : vector<4x128xf32>
    %263 = arith.addf %261, %262 : vector<4x128xf32>
    %264 = math.tanh %263 : vector<4x128xf32>
    %265 = arith.mulf %260, %264 : vector<4x128xf32>
    %c24 = arith.constant 24 : index
    %c0_69 = arith.constant 0 : index
    %266 = vector.load %arg9[%c24, %c0_69] : memref<32x128xf32, #tpu.memory_space<vmem>>, vector<4x128xf32>
    tpu.vector_store %arg9[%c24, %c0_69], %265 {strides = array<i32>} : memref<32x128xf32, #tpu.memory_space<vmem>>, vector<4x128xf32>,
    %267 = vector.extract_strided_slice %56 {offsets = [28, 0], sizes = [4, 512], strides = [1, 1]} : vector<32x512xf32> to vector<4x512xf32>
    %268 = arith.truncf %265 : vector<4x128xf32> to vector<4x128xbf16>
    %cst_70 = arith.constant dense<0.000000e+00> : vector<4x512xf32>
    %269 = tpu.matmul %268, %50, %cst_70 {dimension_numbers = #tpu.dot_dimension_numbers<[1], [0], [0], [1], [0, 0, 1, 1], [], []>} : vector<4x128xbf16>, vector<128x512xbf16>, vector<4x512xf32> -> vector<4x512xf32>
    %270 = arith.addf %267, %269 : vector<4x512xf32>
    %271 = vector.extract_strided_slice %270 {offsets = [0, 0], sizes = [4, 128], strides = [1, 1]} : vector<4x512xf32> to vector<4x128xf32>
    %272 = arith.negf %271 : vector<4x128xf32>
    %273 = math.exp %272 : vector<4x128xf32>
    %cst_71 = arith.constant 1.000000e+00 : f32
    %274 = vector.broadcast %cst_71 : f32 to vector<4x128xf32>
    %275 = arith.addf %274, %273 : vector<4x128xf32>
    %276 = arith.divf %274, %275 : vector<4x128xf32>
    %277 = vector.extract_strided_slice %270 {offsets = [0, 128], sizes = [4, 128], strides = [1, 1]} : vector<4x512xf32> to vector<4x128xf32>
    %278 = arith.negf %277 : vector<4x128xf32>
    %279 = math.exp %278 : vector<4x128xf32>
    %cst_72 = arith.constant 1.000000e+00 : f32
    %280 = vector.broadcast %cst_72 : f32 to vector<4x128xf32>
    %281 = arith.addf %280, %279 : vector<4x128xf32>
    %282 = arith.divf %280, %281 : vector<4x128xf32>
    %283 = vector.extract_strided_slice %270 {offsets = [0, 256], sizes = [4, 128], strides = [1, 1]} : vector<4x512xf32> to vector<4x128xf32>
    %284 = math.tanh %283 : vector<4x128xf32>
    %285 = vector.extract_strided_slice %270 {offsets = [0, 384], sizes = [4, 128], strides = [1, 1]} : vector<4x512xf32> to vector<4x128xf32>
    %286 = arith.negf %285 : vector<4x128xf32>
    %287 = math.exp %286 : vector<4x128xf32>
    %cst_73 = arith.constant 1.000000e+00 : f32
    %288 = vector.broadcast %cst_73 : f32 to vector<4x128xf32>
    %289 = arith.addf %288, %287 : vector<4x128xf32>
    %290 = arith.divf %288, %289 : vector<4x128xf32>
    %291 = arith.mulf %282, %263 : vector<4x128xf32>
    %292 = arith.mulf %276, %284 : vector<4x128xf32>
    %293 = arith.addf %291, %292 : vector<4x128xf32>
    %294 = math.tanh %293 : vector<4x128xf32>
    %295 = arith.mulf %290, %294 : vector<4x128xf32>
    %c28 = arith.constant 28 : index
    %c0_74 = arith.constant 0 : index
    %296 = vector.load %arg9[%c28, %c0_74] : memref<32x128xf32, #tpu.memory_space<vmem>>, vector<4x128xf32>
    tpu.vector_store %arg9[%c28, %c0_74], %295 {strides = array<i32>} : memref<32x128xf32, #tpu.memory_space<vmem>>, vector<4x128xf32>,
    %c0_75 = arith.constant 0 : index
    %c0_76 = arith.constant 0 : index
    %297 = vector.load %arg9[%c0_75, %c0_76] : memref<32x128xf32, #tpu.memory_space<vmem>>, vector<32x128xf32>
    %c768 = arith.constant 768 : index
    %c0_77 = arith.constant 0 : index
    %298 = vector.load %arg4[%c768, %c0_77] : memref<1408x128xbf16, #tpu.memory_space<vmem>>, vector<128x128xbf16>
    %299 = arith.truncf %297 : vector<32x128xf32> to vector<32x128xbf16>
    %cst_78 = arith.constant dense<0.000000e+00> : vector<32x128xf32>
    %300 = tpu.matmul %299, %298, %cst_78 {dimension_numbers = #tpu.dot_dimension_numbers<[1], [0], [0], [1], [0, 0, 1, 1], [], []>} : vector<32x128xbf16>, vector<128x128xbf16>, vector<32x128xf32> -> vector<32x128xf32>
    %c6 = arith.constant 6 : index
    %c0_79 = arith.constant 0 : index
    %301 = vector.load %arg6[%c6, %c0_79] : memref<16x512xf32, #tpu.memory_space<vmem>>, vector<1x128xf32>
    %302 = vector.broadcast %301 : vector<1x128xf32> to vector<32x128xf32>
    %303 = arith.addf %300, %302 : vector<32x128xf32>
    %cst_80 = arith.constant 2.000000e-01 : f32
    %304 = vector.broadcast %cst_80 : f32 to vector<32x128xf32>
    %305 = arith.mulf %304, %303 : vector<32x128xf32>
    %306 = arith.maximumf %303, %305 : vector<32x128xf32>
    %c896 = arith.constant 896 : index
    %c0_81 = arith.constant 0 : index
    %307 = vector.load %arg4[%c896, %c0_81] : memref<1408x128xbf16, #tpu.memory_space<vmem>>, vector<128x128xbf16>
    %308 = arith.truncf %306 : vector<32x128xf32> to vector<32x128xbf16>
    %cst_82 = arith.constant dense<0.000000e+00> : vector<32x128xf32>
    %309 = tpu.matmul %308, %307, %cst_82 {dimension_numbers = #tpu.dot_dimension_numbers<[1], [0], [0], [1], [0, 0, 1, 1], [], []>} : vector<32x128xbf16>, vector<128x128xbf16>, vector<32x128xf32> -> vector<32x128xf32>
    %c7 = arith.constant 7 : index
    %c0_83 = arith.constant 0 : index
    %310 = vector.load %arg6[%c7, %c0_83] : memref<16x512xf32, #tpu.memory_space<vmem>>, vector<1x128xf32>
    %311 = vector.broadcast %310 : vector<1x128xf32> to vector<32x128xf32>
    %312 = arith.addf %309, %311 : vector<32x128xf32>
    %c1024 = arith.constant 1024 : index
    %c0_84 = arith.constant 0 : index
    %313 = vector.load %arg4[%c1024, %c0_84] : memref<1408x128xbf16, #tpu.memory_space<vmem>>, vector<128x128xbf16>
    %314 = arith.truncf %312 : vector<32x128xf32> to vector<32x128xbf16>
    %cst_85 = arith.constant dense<0.000000e+00> : vector<32x128xf32>
    %315 = tpu.matmul %314, %313, %cst_85 {dimension_numbers = #tpu.dot_dimension_numbers<[1], [0], [0], [1], [0, 0, 1, 1], [], []>} : vector<32x128xbf16>, vector<128x128xbf16>, vector<32x128xf32> -> vector<32x128xf32>
    %c0_86 = arith.constant 0 : index
    %c0_87 = arith.constant 0 : index
    %c0_88 = arith.constant 0 : index
    %316 = vector.load %arg7[%c0_86, %c0_87, %c0_88] : memref<9x4x128xf32, #tpu.memory_space<vmem>>, vector<1x4x128xf32>
    %317 = vector.shape_cast %316 : vector<1x4x128xf32> to vector<4x128xf32>
    %318 = vector.shape_cast %0 : vector<4x128xf32> to vector<1x4x128xf32>
    tpu.vector_store %arg7[%c0_86, %c0_87, %c0_88], %318 {strides = array<i32>} : memref<9x4x128xf32, #tpu.memory_space<vmem>>, vector<1x4x128xf32>,
    %319 = vector.extract_strided_slice %315 {offsets = [0, 0], sizes = [4, 128], strides = [1, 1]} : vector<32x128xf32> to vector<4x128xf32>
    %320 = arith.addf %0, %319 : vector<4x128xf32>
    %cst_89 = arith.constant -1.000000e+00 : f32
    %cst_90 = arith.constant 1.000000e+00 : f32
    %321 = vector.broadcast %cst_89 : f32 to vector<4x128xf32>
    %322 = arith.maximumf %321, %320 : vector<4x128xf32>
    %323 = vector.broadcast %cst_90 : f32 to vector<4x128xf32>
    %324 = arith.minimumf %323, %322 : vector<4x128xf32>
    %c1_91 = arith.constant 1 : index
    %c0_92 = arith.constant 0 : index
    %c0_93 = arith.constant 0 : index
    %325 = vector.load %arg7[%c1_91, %c0_92, %c0_93] : memref<9x4x128xf32, #tpu.memory_space<vmem>>, vector<1x4x128xf32>
    %326 = vector.shape_cast %325 : vector<1x4x128xf32> to vector<4x128xf32>
    %327 = vector.shape_cast %324 : vector<4x128xf32> to vector<1x4x128xf32>
    tpu.vector_store %arg7[%c1_91, %c0_92, %c0_93], %327 {strides = array<i32>} : memref<9x4x128xf32, #tpu.memory_space<vmem>>, vector<1x4x128xf32>,
    %328 = vector.extract_strided_slice %315 {offsets = [4, 0], sizes = [4, 128], strides = [1, 1]} : vector<32x128xf32> to vector<4x128xf32>
    %329 = arith.addf %324, %328 : vector<4x128xf32>
    %cst_94 = arith.constant -1.000000e+00 : f32
    %cst_95 = arith.constant 1.000000e+00 : f32
    %330 = vector.broadcast %cst_94 : f32 to vector<4x128xf32>
    %331 = arith.maximumf %330, %329 : vector<4x128xf32>
    %332 = vector.broadcast %cst_95 : f32 to vector<4x128xf32>
    %333 = arith.minimumf %332, %331 : vector<4x128xf32>
    %c2_96 = arith.constant 2 : index
    %c0_97 = arith.constant 0 : index
    %c0_98 = arith.constant 0 : index
    %334 = vector.load %arg7[%c2_96, %c0_97, %c0_98] : memref<9x4x128xf32, #tpu.memory_space<vmem>>, vector<1x4x128xf32>
    %335 = vector.shape_cast %334 : vector<1x4x128xf32> to vector<4x128xf32>
    %336 = vector.shape_cast %333 : vector<4x128xf32> to vector<1x4x128xf32>
    tpu.vector_store %arg7[%c2_96, %c0_97, %c0_98], %336 {strides = array<i32>} : memref<9x4x128xf32, #tpu.memory_space<vmem>>, vector<1x4x128xf32>,
    %337 = vector.extract_strided_slice %315 {offsets = [8, 0], sizes = [4, 128], strides = [1, 1]} : vector<32x128xf32> to vector<4x128xf32>
    %338 = arith.addf %333, %337 : vector<4x128xf32>
    %cst_99 = arith.constant -1.000000e+00 : f32
    %cst_100 = arith.constant 1.000000e+00 : f32
    %339 = vector.broadcast %cst_99 : f32 to vector<4x128xf32>
    %340 = arith.maximumf %339, %338 : vector<4x128xf32>
    %341 = vector.broadcast %cst_100 : f32 to vector<4x128xf32>
    %342 = arith.minimumf %341, %340 : vector<4x128xf32>
    %c3_101 = arith.constant 3 : index
    %c0_102 = arith.constant 0 : index
    %c0_103 = arith.constant 0 : index
    %343 = vector.load %arg7[%c3_101, %c0_102, %c0_103] : memref<9x4x128xf32, #tpu.memory_space<vmem>>, vector<1x4x128xf32>
    %344 = vector.shape_cast %343 : vector<1x4x128xf32> to vector<4x128xf32>
    %345 = vector.shape_cast %342 : vector<4x128xf32> to vector<1x4x128xf32>
    tpu.vector_store %arg7[%c3_101, %c0_102, %c0_103], %345 {strides = array<i32>} : memref<9x4x128xf32, #tpu.memory_space<vmem>>, vector<1x4x128xf32>,
    %346 = vector.extract_strided_slice %315 {offsets = [12, 0], sizes = [4, 128], strides = [1, 1]} : vector<32x128xf32> to vector<4x128xf32>
    %347 = arith.addf %342, %346 : vector<4x128xf32>
    %cst_104 = arith.constant -1.000000e+00 : f32
    %cst_105 = arith.constant 1.000000e+00 : f32
    %348 = vector.broadcast %cst_104 : f32 to vector<4x128xf32>
    %349 = arith.maximumf %348, %347 : vector<4x128xf32>
    %350 = vector.broadcast %cst_105 : f32 to vector<4x128xf32>
    %351 = arith.minimumf %350, %349 : vector<4x128xf32>
    %c4_106 = arith.constant 4 : index
    %c0_107 = arith.constant 0 : index
    %c0_108 = arith.constant 0 : index
    %352 = vector.load %arg7[%c4_106, %c0_107, %c0_108] : memref<9x4x128xf32, #tpu.memory_space<vmem>>, vector<1x4x128xf32>
    %353 = vector.shape_cast %352 : vector<1x4x128xf32> to vector<4x128xf32>
    %354 = vector.shape_cast %351 : vector<4x128xf32> to vector<1x4x128xf32>
    tpu.vector_store %arg7[%c4_106, %c0_107, %c0_108], %354 {strides = array<i32>} : memref<9x4x128xf32, #tpu.memory_space<vmem>>, vector<1x4x128xf32>,
    %355 = vector.extract_strided_slice %315 {offsets = [16, 0], sizes = [4, 128], strides = [1, 1]} : vector<32x128xf32> to vector<4x128xf32>
    %356 = arith.addf %351, %355 : vector<4x128xf32>
    %cst_109 = arith.constant -1.000000e+00 : f32
    %cst_110 = arith.constant 1.000000e+00 : f32
    %357 = vector.broadcast %cst_109 : f32 to vector<4x128xf32>
    %358 = arith.maximumf %357, %356 : vector<4x128xf32>
    %359 = vector.broadcast %cst_110 : f32 to vector<4x128xf32>
    %360 = arith.minimumf %359, %358 : vector<4x128xf32>
    %c5_111 = arith.constant 5 : index
    %c0_112 = arith.constant 0 : index
    %c0_113 = arith.constant 0 : index
    %361 = vector.load %arg7[%c5_111, %c0_112, %c0_113] : memref<9x4x128xf32, #tpu.memory_space<vmem>>, vector<1x4x128xf32>
    %362 = vector.shape_cast %361 : vector<1x4x128xf32> to vector<4x128xf32>
    %363 = vector.shape_cast %360 : vector<4x128xf32> to vector<1x4x128xf32>
    tpu.vector_store %arg7[%c5_111, %c0_112, %c0_113], %363 {strides = array<i32>} : memref<9x4x128xf32, #tpu.memory_space<vmem>>, vector<1x4x128xf32>,
    %364 = vector.extract_strided_slice %315 {offsets = [20, 0], sizes = [4, 128], strides = [1, 1]} : vector<32x128xf32> to vector<4x128xf32>
    %365 = arith.addf %360, %364 : vector<4x128xf32>
    %cst_114 = arith.constant -1.000000e+00 : f32
    %cst_115 = arith.constant 1.000000e+00 : f32
    %366 = vector.broadcast %cst_114 : f32 to vector<4x128xf32>
    %367 = arith.maximumf %366, %365 : vector<4x128xf32>
    %368 = vector.broadcast %cst_115 : f32 to vector<4x128xf32>
    %369 = arith.minimumf %368, %367 : vector<4x128xf32>
    %c6_116 = arith.constant 6 : index
    %c0_117 = arith.constant 0 : index
    %c0_118 = arith.constant 0 : index
    %370 = vector.load %arg7[%c6_116, %c0_117, %c0_118] : memref<9x4x128xf32, #tpu.memory_space<vmem>>, vector<1x4x128xf32>
    %371 = vector.shape_cast %370 : vector<1x4x128xf32> to vector<4x128xf32>
    %372 = vector.shape_cast %369 : vector<4x128xf32> to vector<1x4x128xf32>
    tpu.vector_store %arg7[%c6_116, %c0_117, %c0_118], %372 {strides = array<i32>} : memref<9x4x128xf32, #tpu.memory_space<vmem>>, vector<1x4x128xf32>,
    %373 = vector.extract_strided_slice %315 {offsets = [24, 0], sizes = [4, 128], strides = [1, 1]} : vector<32x128xf32> to vector<4x128xf32>
    %374 = arith.addf %369, %373 : vector<4x128xf32>
    %cst_119 = arith.constant -1.000000e+00 : f32
    %cst_120 = arith.constant 1.000000e+00 : f32
    %375 = vector.broadcast %cst_119 : f32 to vector<4x128xf32>
    %376 = arith.maximumf %375, %374 : vector<4x128xf32>
    %377 = vector.broadcast %cst_120 : f32 to vector<4x128xf32>
    %378 = arith.minimumf %377, %376 : vector<4x128xf32>
    %c7_121 = arith.constant 7 : index
    %c0_122 = arith.constant 0 : index
    %c0_123 = arith.constant 0 : index
    %379 = vector.load %arg7[%c7_121, %c0_122, %c0_123] : memref<9x4x128xf32, #tpu.memory_space<vmem>>, vector<1x4x128xf32>
    %380 = vector.shape_cast %379 : vector<1x4x128xf32> to vector<4x128xf32>
    %381 = vector.shape_cast %378 : vector<4x128xf32> to vector<1x4x128xf32>
    tpu.vector_store %arg7[%c7_121, %c0_122, %c0_123], %381 {strides = array<i32>} : memref<9x4x128xf32, #tpu.memory_space<vmem>>, vector<1x4x128xf32>,
    %382 = vector.extract_strided_slice %315 {offsets = [28, 0], sizes = [4, 128], strides = [1, 1]} : vector<32x128xf32> to vector<4x128xf32>
    %383 = arith.addf %378, %382 : vector<4x128xf32>
    %cst_124 = arith.constant -1.000000e+00 : f32
    %cst_125 = arith.constant 1.000000e+00 : f32
    %384 = vector.broadcast %cst_124 : f32 to vector<4x128xf32>
    %385 = arith.maximumf %384, %383 : vector<4x128xf32>
    %386 = vector.broadcast %cst_125 : f32 to vector<4x128xf32>
    %387 = arith.minimumf %386, %385 : vector<4x128xf32>
    %c8_126 = arith.constant 8 : index
    %c0_127 = arith.constant 0 : index
    %c0_128 = arith.constant 0 : index
    %388 = vector.load %arg7[%c8_126, %c0_127, %c0_128] : memref<9x4x128xf32, #tpu.memory_space<vmem>>, vector<1x4x128xf32>
    %389 = vector.shape_cast %388 : vector<1x4x128xf32> to vector<4x128xf32>
    %390 = vector.shape_cast %387 : vector<4x128xf32> to vector<1x4x128xf32>
    tpu.vector_store %arg7[%c8_126, %c0_127, %c0_128], %390 {strides = array<i32>} : memref<9x4x128xf32, #tpu.memory_space<vmem>>, vector<1x4x128xf32>,
    %391 = tpu.iota {dimensions = array<i32: 0>} : vector<32x1xi32>
    %392 = arith.sitofp %391 : vector<32x1xi32> to vector<32x1xf32>
    %cst_129 = arith.constant 4.000000e+00 : f32
    %393 = vector.broadcast %cst_129 : f32 to vector<32x1xf32>
    %394 = arith.divf %392, %393 : vector<32x1xf32>
    %395 = math.floor %394 : vector<32x1xf32>
    %cst_130 = arith.constant 4.000000e+00 : f32
    %396 = vector.broadcast %cst_130 : f32 to vector<32x1xf32>
    %397 = arith.mulf %395, %396 : vector<32x1xf32>
    %398 = arith.subf %392, %397 : vector<32x1xf32>
    %cst_131 = arith.constant 2.000000e+00 : f32
    %399 = vector.broadcast %cst_131 : f32 to vector<32x1xf32>
    %400 = arith.cmpf olt, %398, %399 : vector<32x1xf32>
    %401 = arith.extui %400 : vector<32x1xi1> to vector<32x1xi32>
    %402 = arith.sitofp %401 : vector<32x1xi32> to vector<32x1xf32>
    %403 = vector.broadcast %402 : vector<32x1xf32> to vector<32x128xf32>
    %404 = arith.mulf %312, %403 : vector<32x128xf32>
    %cst_132 = arith.constant dense<0.000000e+00> : vector<128xf32>
    %405 = vector.multi_reduction <add>, %404, %cst_132 [0] : vector<32x128xf32> to vector<128xf32>
    %406 = vector.shape_cast %405 : vector<128xf32> to vector<1x128xf32>
    %cst_133 = arith.constant 1.600000e+01 : f32
    %407 = vector.broadcast %cst_133 : f32 to vector<1x128xf32>
    %408 = arith.divf %406, %407 : vector<1x128xf32>
    %409 = vector.broadcast %408 : vector<1x128xf32> to vector<32x128xf32>
    %410 = arith.subf %312, %409 : vector<32x128xf32>
    %411 = vector.broadcast %402 : vector<32x1xf32> to vector<32x128xf32>
    %412 = arith.mulf %410, %411 : vector<32x128xf32>
    %413 = arith.mulf %412, %412 : vector<32x128xf32>
    %cst_134 = arith.constant dense<0.000000e+00> : vector<128xf32>
    %414 = vector.multi_reduction <add>, %413, %cst_134 [0] : vector<32x128xf32> to vector<128xf32>
    %415 = vector.shape_cast %414 : vector<128xf32> to vector<1x128xf32>
    %cst_135 = arith.constant 1.500000e+01 : f32
    %416 = vector.broadcast %cst_135 : f32 to vector<1x128xf32>
    %417 = arith.divf %415, %416 : vector<1x128xf32>
    %c11 = arith.constant 11 : index
    %c0_136 = arith.constant 0 : index
    %418 = vector.load %arg6[%c11, %c0_136] : memref<16x512xf32, #tpu.memory_space<vmem>>, vector<1x128xf32>
    %cst_137 = arith.constant 5.000000e-01 : f32
    %419 = vector.broadcast %cst_137 : f32 to vector<1x128xf32>
    %420 = arith.mulf %419, %417 : vector<1x128xf32>
    %421 = math.exp %420 : vector<1x128xf32>
    %cst_138 = arith.constant 5.000000e-01 : f32
    %422 = vector.broadcast %cst_138 : f32 to vector<1x128xf32>
    %423 = arith.mulf %422, %418 : vector<1x128xf32>
    %424 = math.exp %423 : vector<1x128xf32>
    %425 = arith.divf %424, %421 : vector<1x128xf32>
    %426 = math.log %425 : vector<1x128xf32>
    %427 = math.exp %417 : vector<1x128xf32>
    %428 = arith.mulf %408, %408 : vector<1x128xf32>
    %429 = arith.addf %427, %428 : vector<1x128xf32>
    %430 = math.exp %418 : vector<1x128xf32>
    %cst_139 = arith.constant 2.000000e+00 : f32
    %431 = vector.broadcast %cst_139 : f32 to vector<1x128xf32>
    %432 = arith.mulf %431, %430 : vector<1x128xf32>
    %433 = arith.divf %429, %432 : vector<1x128xf32>
    %434 = arith.addf %426, %433 : vector<1x128xf32>
    %cst_140 = arith.constant 5.000000e-01 : f32
    %435 = vector.broadcast %cst_140 : f32 to vector<1x128xf32>
    %436 = arith.subf %434, %435 : vector<1x128xf32>
    %437 = vector.shape_cast %436 : vector<1x128xf32> to vector<1x1x128xf32>
    %cst_141 = arith.constant dense<0.000000e+00> : vector<1xf32>
    %438 = vector.multi_reduction <add>, %437, %cst_141 [1, 2] : vector<1x1x128xf32> to vector<1xf32>
    %439 = vector.shape_cast %438 : vector<1xf32> to vector<1x1x1xf32>
    %440 = vector.extract %439[0, 0, 0] : f32 from vector<1x1x1xf32>
    %441 = vector.broadcast %440 : f32 to vector<1x1xf32>
    %c1152 = arith.constant 1152 : index
    %c0_142 = arith.constant 0 : index
    %442 = vector.load %arg4[%c1152, %c0_142] : memref<1408x128xbf16, #tpu.memory_space<vmem>>, vector<128x128xbf16>
    %c8_143 = arith.constant 8 : index
    %c0_144 = arith.constant 0 : index
    %443 = vector.load %arg6[%c8_143, %c0_144] : memref<16x512xf32, #tpu.memory_space<vmem>>, vector<1x128xf32>
    %c1280 = arith.constant 1280 : index
    %c0_145 = arith.constant 0 : index
    %444 = vector.load %arg4[%c1280, %c0_145] : memref<1408x128xbf16, #tpu.memory_space<vmem>>, vector<128x128xbf16>
    %c9 = arith.constant 9 : index
    %c0_146 = arith.constant 0 : index
    %445 = vector.load %arg6[%c9, %c0_146] : memref<16x512xf32, #tpu.memory_space<vmem>>, vector<1x128xf32>
    %c10 = arith.constant 10 : index
    %c0_147 = arith.constant 0 : index
    %446 = vector.load %arg6[%c10, %c0_147] : memref<16x512xf32, #tpu.memory_space<vmem>>, vector<1x128xf32>
    %447 = arith.subf %324, %0 : vector<4x128xf32>
    %448 = arith.truncf %447 : vector<4x128xf32> to vector<4x128xbf16>
    %cst_148 = arith.constant dense<0.000000e+00> : vector<4x128xf32>
    %449 = tpu.matmul %448, %442, %cst_148 {dimension_numbers = #tpu.dot_dimension_numbers<[1], [0], [0], [1], [0, 0, 1, 1], [], []>} : vector<4x128xbf16>, vector<128x128xbf16>, vector<4x128xf32> -> vector<4x128xf32>
    %450 = vector.broadcast %443 : vector<1x128xf32> to vector<4x128xf32>
    %451 = arith.addf %449, %450 : vector<4x128xf32>
    %cst_149 = arith.constant 2.000000e-01 : f32
    %452 = vector.broadcast %cst_149 : f32 to vector<4x128xf32>
    %453 = arith.mulf %452, %451 : vector<4x128xf32>
    %454 = arith.maximumf %451, %453 : vector<4x128xf32>
    %455 = arith.truncf %454 : vector<4x128xf32> to vector<4x128xbf16>
    %cst_150 = arith.constant dense<0.000000e+00> : vector<4x128xf32>
    %456 = tpu.matmul %455, %444, %cst_150 {dimension_numbers = #tpu.dot_dimension_numbers<[1], [0], [0], [1], [0, 0, 1, 1], [], []>} : vector<4x128xbf16>, vector<128x128xbf16>, vector<4x128xf32> -> vector<4x128xf32>
    %457 = vector.broadcast %445 : vector<1x128xf32> to vector<4x128xf32>
    %458 = arith.addf %456, %457 : vector<4x128xf32>
    %cst_151 = arith.constant 2.000000e-01 : f32
    %459 = vector.broadcast %cst_151 : f32 to vector<4x128xf32>
    %460 = arith.mulf %459, %458 : vector<4x128xf32>
    %461 = arith.maximumf %458, %460 : vector<4x128xf32>
    %462 = vector.broadcast %446 : vector<1x128xf32> to vector<4x128xf32>
    %463 = arith.mulf %461, %462 : vector<4x128xf32>
    %cst_152 = arith.constant dense<0.000000e+00> : vector<4xf32>
    %464 = vector.multi_reduction <add>, %463, %cst_152 [1] : vector<4x128xf32> to vector<4xf32>
    %465 = vector.shape_cast %464 : vector<4xf32> to vector<4x1xf32>
    %466 = tpu.iota {dimensions = array<i32: 0>} : vector<4x1xi32>
    %c2_i32 = arith.constant 2 : i32
    %467 = vector.broadcast %c2_i32 : i32 to vector<4x1xi32>
    %468 = arith.cmpi slt, %466, %467 : vector<4x1xi32>
    %469 = arith.extui %468 : vector<4x1xi1> to vector<4x1xi32>
    %470 = arith.sitofp %469 : vector<4x1xi32> to vector<4x1xf32>
    %471 = arith.subf %465, %470 : vector<4x1xf32>
    %472 = arith.mulf %471, %471 : vector<4x1xf32>
    %473 = arith.mulf %472, %470 : vector<4x1xf32>
    %cst_153 = arith.constant dense<0.000000e+00> : vector<1xf32>
    %474 = vector.multi_reduction <add>, %473, %cst_153 [0] : vector<4x1xf32> to vector<1xf32>
    %475 = vector.shape_cast %474 : vector<1xf32> to vector<1x1xf32>
    %cst_154 = arith.constant 2.000000e+00 : f32
    %476 = vector.broadcast %cst_154 : f32 to vector<1x1xf32>
    %477 = arith.divf %475, %476 : vector<1x1xf32>
    %cst_155 = arith.constant 1.000000e+00 : f32
    %478 = vector.broadcast %cst_155 : f32 to vector<4x1xf32>
    %479 = arith.subf %478, %470 : vector<4x1xf32>
    %480 = arith.mulf %472, %479 : vector<4x1xf32>
    %cst_156 = arith.constant dense<0.000000e+00> : vector<1xf32>
    %481 = vector.multi_reduction <add>, %480, %cst_156 [0] : vector<4x1xf32> to vector<1xf32>
    %482 = vector.shape_cast %481 : vector<1xf32> to vector<1x1xf32>
    %cst_157 = arith.constant 2.000000e+00 : f32
    %483 = vector.broadcast %cst_157 : f32 to vector<1x1xf32>
    %484 = arith.divf %482, %483 : vector<1x1xf32>
    %c0_158 = arith.constant 0 : index
    %c0_159 = arith.constant 0 : index
    %485 = vector.load %arg3[%c0_158, %c0_159] : memref<8x128xf32, #tpu.memory_space<vmem>>, vector<8x128xf32>
    %486 = arith.truncf %485 : vector<8x128xf32> to vector<8x128xbf16>
    %cst_160 = arith.constant dense<0.000000e+00> : vector<8x128xf32>
    %487 = tpu.matmul %486, %442, %cst_160 {dimension_numbers = #tpu.dot_dimension_numbers<[1], [0], [0], [1], [0, 0, 1, 1], [], []>} : vector<8x128xbf16>, vector<128x128xbf16>, vector<8x128xf32> -> vector<8x128xf32>
    %488 = vector.broadcast %443 : vector<1x128xf32> to vector<8x128xf32>
    %489 = arith.addf %487, %488 : vector<8x128xf32>
    %cst_161 = arith.constant 2.000000e-01 : f32
    %490 = vector.broadcast %cst_161 : f32 to vector<8x128xf32>
    %491 = arith.mulf %490, %489 : vector<8x128xf32>
    %492 = arith.maximumf %489, %491 : vector<8x128xf32>
    %493 = arith.truncf %492 : vector<8x128xf32> to vector<8x128xbf16>
    %cst_162 = arith.constant dense<0.000000e+00> : vector<8x128xf32>
    %494 = tpu.matmul %493, %444, %cst_162 {dimension_numbers = #tpu.dot_dimension_numbers<[1], [0], [0], [1], [0, 0, 1, 1], [], []>} : vector<8x128xbf16>, vector<128x128xbf16>, vector<8x128xf32> -> vector<8x128xf32>
    %495 = vector.broadcast %445 : vector<1x128xf32> to vector<8x128xf32>
    %496 = arith.addf %494, %495 : vector<8x128xf32>
    %cst_163 = arith.constant 2.000000e-01 : f32
    %497 = vector.broadcast %cst_163 : f32 to vector<8x128xf32>
    %498 = arith.mulf %497, %496 : vector<8x128xf32>
    %499 = arith.maximumf %496, %498 : vector<8x128xf32>
    %500 = vector.broadcast %446 : vector<1x128xf32> to vector<8x128xf32>
    %501 = arith.mulf %499, %500 : vector<8x128xf32>
    %cst_164 = arith.constant dense<0.000000e+00> : vector<8xf32>
    %502 = vector.multi_reduction <add>, %501, %cst_164 [1] : vector<8x128xf32> to vector<8xf32>
    %503 = vector.shape_cast %502 : vector<8xf32> to vector<8x1xf32>
    %cst_165 = arith.constant 1.000000e+00 : f32
    %504 = vector.broadcast %cst_165 : f32 to vector<8x1xf32>
    %505 = arith.subf %503, %504 : vector<8x1xf32>
    %506 = arith.mulf %505, %505 : vector<8x1xf32>
    %507 = vector.shape_cast %506 : vector<8x1xf32> to vector<1x8x1xf32>
    %cst_166 = arith.constant dense<0.000000e+00> : vector<1xf32>
    %508 = vector.multi_reduction <add>, %507, %cst_166 [1, 2] : vector<1x8x1xf32> to vector<1xf32>
    %509 = vector.shape_cast %508 : vector<1xf32> to vector<1x1x1xf32>
    %510 = vector.extract %509[0, 0, 0] : f32 from vector<1x1x1xf32>
    %511 = vector.broadcast %510 : f32 to vector<1x1xf32>
    %cst_167 = arith.constant 8.000000e+00 : f32
    %512 = vector.broadcast %cst_167 : f32 to vector<1x1xf32>
    %513 = arith.divf %511, %512 : vector<1x1xf32>
    %514 = tpu.iota {dimensions = array<i32: 1>} : vector<1x128xi32>
    %c0_i32 = arith.constant 0 : i32
    %515 = vector.broadcast %c0_i32 : i32 to vector<1x128xi32>
    %516 = arith.cmpi eq, %514, %515 : vector<1x128xi32>
    %cst_168 = arith.constant 0.000000e+00 : f32
    %517 = vector.shape_cast %441 : vector<1x1xf32> to vector<1x1xf32>
    %518 = vector.broadcast %517 : vector<1x1xf32> to vector<1x128xf32>
    %519 = vector.broadcast %cst_168 : f32 to vector<1x128xf32>
    %520 = arith.select %516, %518, %519 : vector<1x128xi1>, vector<1x128xf32>
    %c1_i32 = arith.constant 1 : i32
    %521 = vector.broadcast %c1_i32 : i32 to vector<1x128xi32>
    %522 = arith.cmpi eq, %514, %521 : vector<1x128xi32>
    %cst_169 = arith.constant 0.000000e+00 : f32
    %523 = vector.shape_cast %477 : vector<1x1xf32> to vector<1x1xf32>
    %524 = vector.broadcast %523 : vector<1x1xf32> to vector<1x128xf32>
    %525 = vector.broadcast %cst_169 : f32 to vector<1x128xf32>
    %526 = arith.select %522, %524, %525 : vector<1x128xi1>, vector<1x128xf32>
    %527 = arith.addf %520, %526 : vector<1x128xf32>
    %c2_i32_170 = arith.constant 2 : i32
    %528 = vector.broadcast %c2_i32_170 : i32 to vector<1x128xi32>
    %529 = arith.cmpi eq, %514, %528 : vector<1x128xi32>
    %cst_171 = arith.constant 0.000000e+00 : f32
    %530 = vector.shape_cast %484 : vector<1x1xf32> to vector<1x1xf32>
    %531 = vector.broadcast %530 : vector<1x1xf32> to vector<1x128xf32>
    %532 = vector.broadcast %cst_171 : f32 to vector<1x128xf32>
    %533 = arith.select %529, %531, %532 : vector<1x128xi1>, vector<1x128xf32>
    %534 = arith.addf %527, %533 : vector<1x128xf32>
    %c3_i32 = arith.constant 3 : i32
    %535 = vector.broadcast %c3_i32 : i32 to vector<1x128xi32>
    %536 = arith.cmpi eq, %514, %535 : vector<1x128xi32>
    %cst_172 = arith.constant 0.000000e+00 : f32
    %537 = vector.shape_cast %513 : vector<1x1xf32> to vector<1x1xf32>
    %538 = vector.broadcast %537 : vector<1x1xf32> to vector<1x128xf32>
    %539 = vector.broadcast %cst_172 : f32 to vector<1x128xf32>
    %540 = arith.select %536, %538, %539 : vector<1x128xi1>, vector<1x128xf32>
    %541 = arith.addf %534, %540 : vector<1x128xf32>
    %542 = tpu.iota {dimensions = array<i32: 0>} : vector<8x128xi32>
    %c0_i32_173 = arith.constant 0 : i32
    %543 = vector.broadcast %c0_i32_173 : i32 to vector<8x128xi32>
    %544 = arith.cmpi eq, %542, %543 : vector<8x128xi32>
    %545 = vector.shape_cast %408 : vector<1x128xf32> to vector<1x128xf32>
    %546 = vector.broadcast %545 : vector<1x128xf32> to vector<8x128xf32>
    %cst_174 = arith.constant 0.000000e+00 : f32
    %547 = vector.broadcast %cst_174 : f32 to vector<8x128xf32>
    %548 = arith.select %544, %546, %547 : vector<8x128xi1>, vector<8x128xf32>
    %c1_i32_175 = arith.constant 1 : i32
    %549 = vector.broadcast %c1_i32_175 : i32 to vector<8x128xi32>
    %550 = arith.cmpi eq, %542, %549 : vector<8x128xi32>
    %551 = vector.shape_cast %417 : vector<1x128xf32> to vector<1x128xf32>
    %552 = vector.broadcast %551 : vector<1x128xf32> to vector<8x128xf32>
    %553 = arith.select %550, %552, %548 : vector<8x128xi1>, vector<8x128xf32>
    %c2_i32_176 = arith.constant 2 : i32
    %554 = vector.broadcast %c2_i32_176 : i32 to vector<8x128xi32>
    %555 = arith.cmpi eq, %542, %554 : vector<8x128xi32>
    %556 = vector.shape_cast %541 : vector<1x128xf32> to vector<1x128xf32>
    %557 = vector.broadcast %556 : vector<1x128xf32> to vector<8x128xf32>
    %558 = arith.select %555, %557, %553 : vector<8x128xi1>, vector<8x128xf32>
    %c0_177 = arith.constant 0 : index
    %c0_178 = arith.constant 0 : index
    %559 = vector.load %arg8[%c0_177, %c0_178] : memref<8x128xf32, #tpu.memory_space<vmem>>, vector<8x128xf32>
    tpu.vector_store %arg8[%c0_177, %c0_178], %558 {strides = array<i32>} : memref<8x128xf32, #tpu.memory_space<vmem>>, vector<8x128xf32>,
    return
  }
  func.func @transform_0(%arg0: i32) -> (i32, i32) {
    %c0_i32 = arith.constant 0 : i32
    %c0_i32_0 = arith.constant 0 : i32
    %c0_i32_1 = arith.constant 0 : i32
    return %c0_i32, %c0_i32_0 : i32, i32
  }
  func.func @transform_1(%arg0: i32) -> (i32, i32) {
    %c0_i32 = arith.constant 0 : i32
    %c0_i32_0 = arith.constant 0 : i32
    %c0_i32_1 = arith.constant 0 : i32
    return %c0_i32, %c0_i32_0 : i32, i32
  }
  func.func @transform_2(%arg0: i32) -> (i32, i32) {
    %c0_i32 = arith.constant 0 : i32
    %c0_i32_0 = arith.constant 0 : i32
    %c0_i32_1 = arith.constant 0 : i32
    return %c0_i32, %c0_i32_0 : i32, i32
  }
  func.func @transform_3(%arg0: i32) -> (i32, i32) {
    %c0_i32 = arith.constant 0 : i32
    %c0_i32_0 = arith.constant 0 : i32
    %c0_i32_1 = arith.constant 0 : i32
    return %c0_i32, %c0_i32_0 : i32, i32
  }
  func.func @transform_4(%arg0: i32) -> (i32, i32) {
    %c0_i32 = arith.constant 0 : i32
    %c0_i32_0 = arith.constant 0 : i32
    %c0_i32_1 = arith.constant 0 : i32
    return %c0_i32, %c0_i32_0 : i32, i32
  }
  func.func @transform_5(%arg0: i32) -> (i32, i32) {
    %c0_i32 = arith.constant 0 : i32
    %c0_i32_0 = arith.constant 0 : i32
    %c0_i32_1 = arith.constant 0 : i32
    return %c0_i32, %c0_i32_0 : i32, i32
  }
  func.func @transform_6(%arg0: i32) -> (i32, i32, i32) {
    %c0_i32 = arith.constant 0 : i32
    %c0_i32_0 = arith.constant 0 : i32
    %c0_i32_1 = arith.constant 0 : i32
    %c0_i32_2 = arith.constant 0 : i32
    return %c0_i32, %c0_i32_0, %c0_i32_1 : i32, i32, i32
  }
  func.func @transform_7(%arg0: i32) -> (i32, i32) {
    %c0_i32 = arith.constant 0 : i32
    %c0_i32_0 = arith.constant 0 : i32
    %c0_i32_1 = arith.constant 0 : i32
    return %c0_i32, %c0_i32_0 : i32, i32
  }
}

</mosaic_0001>

<bundles_post_ra>
// kernel: kpseqgan_forward.1
= control target key start
LH: loop header
LB: loop body
LE: loop exit
PB: predicated region body
PF: predicated region fallthrough
CT: control target
= control target key end

     0   :  { %s5105_s3 = inlined_call_operand.vmem [shape: bf16[1408,128], index: 3, kind: input, shape index: {}]   ;;  %s5106_s0 = inlined_call_operand.vmem [shape: f32[4,128], index: 0, kind: input, shape index: {}]   ;;  %s5107_s6 = inlined_call_operand.vmem [shape: f32[9,4,128], index: 6, kind: output, shape index: {0}]   ;;  %s5108_s5 = inlined_call_operand.vmem [shape: f32[16,512], index: 5, kind: input, shape index: {}]   ;;  %s5109_s4 = inlined_call_operand.vmem [shape: bf16[256,512], index: 4, kind: input, shape index: {}]   ;;  %s5110_s1 = inlined_call_operand.vmem [shape: f32[32,128], index: 1, kind: input, shape index: {}]   ;;  %s5111_s2 = inlined_call_operand.vmem [shape: f32[8,128], index: 2, kind: input, shape index: {}]   ;;  %s5112_s7 = inlined_call_operand.vmem [shape: f32[8,128], index: 7, kind: output, shape index: {1}]  }
   0x1   :  { %v3455_v0 = vld [vmem:[%s5105_s3 + $0x38] sm:$0xff]  ;;  %v3454_v1 = vld [vmem:[%s5105_s3 + $0x30] sm:$0xff]  ;;  %v3817_v2 = vld [vmem:[%s5106_s0] sm:$0xf] }
   0x2   :  { %126 = vmatpush.bf16.msra.mxu0 %v3455_v0  ;;  %5127 = vst [vmem:[#allocation3_spill] sm:$0xff] %v3817_v2  ;;  %v3479_v3 = vld [vmem:[%s5105_s3 + $0xf8] sm:$0xff]  ;;  %v3478_v4 = vld [vmem:[%s5105_s3 + $0xf0] sm:$0xff]  ;;  %v3453_v6 = vld [vmem:[%s5105_s3 + $0x28] sm:$0xff]  ;;  %v77_v22 = vpack.c.bf16 %v3817_v2, %v3817_v2 }
   0x3   :  { %2299 = vst [vmem:[%s5107_s6] sm:$0xf] %v3817_v2  ;;  %366 = vmatpush.bf16.msra.mxu3 %v3479_v3  ;;  %v3463_v5 = vld [vmem:[%s5105_s3 + $0x78] sm:$0xff]  ;;  %v3462_v7 = vld [vmem:[%s5105_s3 + $0x70] sm:$0xff]  ;;  %v3477_v8 = vld [vmem:[%s5105_s3 + $0xe8] sm:$0xff] }
   0x4   :  { %190 = vmatpush.bf16.msra.mxu1 %v3463_v5  ;;  %v3452_v9 = vld [vmem:[%s5105_s3 + $0x20] sm:$0xff]  ;;  %v3461_v10 = vld [vmem:[%s5105_s3 + $0x68] sm:$0xff]  ;;  %v3451_v12 = vld [vmem:[%s5105_s3 + $0x18] sm:$0xff] }
   0x5   :  { %v3476_v11 = vld [vmem:[%s5105_s3 + $0xe0] sm:$0xff]  ;;  %v3475_v14 = vld [vmem:[%s5105_s3 + $0xd8] sm:$0xff]  ;;  %v3450_v15 = vld [vmem:[%s5105_s3 + $0x10] sm:$0xff] }
   0x6   :  { %127 = vmatpush.bf16.msra.mxu0 %v3454_v1  ;;  %v3460_v13 = vld [vmem:[%s5105_s3 + $0x60] sm:$0xff]  ;;  %v3459_v16 = vld [vmem:[%s5105_s3 + $0x58] sm:$0xff]  ;;  %v3474_v17 = vld [vmem:[%s5105_s3 + $0xd0] sm:$0xff] }
   0x7   :  { %367 = vmatpush.bf16.msra.mxu3 %v3478_v4  ;;  %v3449_v18 = vld [vmem:[%s5105_s3 + $0x8] sm:$0xff]  ;;  %v3458_v19 = vld [vmem:[%s5105_s3 + $0x50] sm:$0xff]  ;;  %v3448_v21 = vld [vmem:[%s5105_s3] sm:$0xff] }
   0x8   :  { %191 = vmatpush.bf16.msra.mxu1 %v3462_v7  ;;  %v3473_v20 = vld [vmem:[%s5105_s3 + $0xc8] sm:$0xff]  ;;  %v3472_v23 = vld [vmem:[%s5105_s3 + $0xc0] sm:$0xff]  ;;  %v3487_v26 = vld [vmem:[%s5105_s3 + $0x138] sm:$0xff] }
   0x9   :  { %v3457_v24 = vld [vmem:[%s5105_s3 + $0x48] sm:$0xff]  ;;  %v3456_v25 = vld [vmem:[%s5105_s3 + $0x40] sm:$0xff]  ;;  %v3486_v27 = vld [vmem:[%s5105_s3 + $0x130] sm:$0xff] }
   0xa   :  { %128 = vmatpush.bf16.msra.mxu0 %v3453_v6  ;;  %v3485_v28 = vld [vmem:[%s5105_s3 + $0x128] sm:$0xff]  ;;  %v3471_v29 = vld [vmem:[%s5105_s3 + $0xb8] sm:$0xff]  ;;  %v3484_v30 = vld [vmem:[%s5105_s3 + $0x120] sm:$0xff] }
   0xb   :  { %368 = vmatpush.bf16.msra.mxu3 %v3477_v8  ;;  %254 = vmatpush.bf16.msra.mxu2 %v3471_v29  ;;  %v3470_v31 = vld [vmem:[%s5105_s3 + $0xb0] sm:$0xff]  ;;  %v3483_v32 = vld [vmem:[%s5105_s3 + $0x118] sm:$0xff]  ;;  %v3469_v33 = vld [vmem:[%s5105_s3 + $0xa8] sm:$0xff] }
   0xc   :  { %192 = vmatpush.bf16.msra.mxu1 %v3461_v10  ;;  %v3482_v34 = vld [vmem:[%s5105_s3 + $0x110] sm:$0xff]  ;;  %v3468_v35 = vld [vmem:[%s5105_s3 + $0xa0] sm:$0xff]  ;;  %v3481_v37 = vld [vmem:[%s5105_s3 + $0x108] sm:$0xff] }
   0xd   :  { %v42_v36 = vld [vmem:[%s5108_s5] ss:$0 sm:$0xff]  ;;  %v3467_v39 = vld [vmem:[%s5105_s3 + $0x98] sm:$0xff]  ;;  %v3466_v43 = vld [vmem:[%s5105_s3 + $0x90] sm:$0xff] }
   0xe   :  { %129 = vmatpush.bf16.msra.mxu0 %v3452_v9  ;;  %v3480_v42 = vld [vmem:[%s5105_s3 + $0x100] sm:$0xff]  ;;  %v3465_v54 = vld [vmem:[%s5105_s3 + $0x88] sm:$0xff]  ;;  %v3495_v56 = vld [vmem:[%s5105_s3 + $0x178] sm:$0xff] }
   0xf   :  { %369 = vmatpush.bf16.msra.mxu3 %v3476_v11  ;;  %255 = vmatpush.bf16.msra.mxu2 %v3470_v31  ;;  %v283_v46 = vld [vmem:[%s5108_s5 + $0x3] ss:$0 sm:$0xff]  ;;  %v3494_v57 = vld [vmem:[%s5105_s3 + $0x170] sm:$0xff]  ;;  %v3524_v60 = vld [vmem:[%s5109_s4 + $0xe4] sm:$0xf] }
  0x10   :  { %193 = vmatpush.bf16.msra.mxu1 %v3460_v13  ;;  %v3464_v55 = vld [vmem:[%s5105_s3 + $0x80] sm:$0xff]  ;;  %v3526_v59 = vld [vmem:[%s5109_s4 + $0xec] sm:$0xf0]  ;;  %v3101_v62 = vld [vmem:[%s5109_s4 + $0xf0] sm:$0xf0] }
  0x11   :  { %v3099_v58 = vld [vmem:[%s5109_s4 + $0xe0] sm:$0xf]  ;;  %v3104_v0 = vor.u32 %v3524_v60, %v3101_v62  ;;  %v3522_v1 = vld [vmem:[%s5109_s4 + $0xcc] sm:$0xf0]  ;;  %v3520_v3 = vld [vmem:[%s5109_s4 + $0xc4] sm:$0xf] }
  0x12   :  { %130 = vmatpush.bf16.msra.mxu0 %v3451_v12  ;;  %v3100_v61 = vor.u32 %v3526_v59, %v3099_v58  ;;  %v3083_v63 = vld [vmem:[%s5109_s4 + $0xc0] sm:$0xf]  ;;  %v3085_v4 = vld [vmem:[%s5109_s4 + $0xd0] sm:$0xf0]  ;;  %v3493_v5 = vld [vmem:[%s5105_s3 + $0x168] sm:$0xff] }
  0x13   :  { %370 = vmatpush.bf16.msra.mxu3 %v3475_v14  ;;  %256 = vmatpush.bf16.msra.mxu2 %v3469_v33  ;;  %v3084_v6 = vor.u32 %v3522_v1, %v3083_v63  ;;  %v3088_v7 = vor.u32 %v3520_v3, %v3085_v4  ;;  %v3067_v8 = vld [vmem:[%s5109_s4 + $0xa0] sm:$0xf]  ;;  %v3518_v9 = vld [vmem:[%s5109_s4 + $0xac] sm:$0xf0]  ;;  %v3107_v10 = vld [vmem:[%s5109_s4 + $0xe8] sm:$0xf] }
  0x14   :  { %194 = vmatpush.bf16.msra.mxu1 %v3459_v16  ;;  %v3516_v11 = vld [vmem:[%s5109_s4 + $0xa4] sm:$0xf]  ;;  %v3069_v12 = vld [vmem:[%s5109_s4 + $0xb0] sm:$0xf0]  ;;  %v3527_v13 = vld [vmem:[%s5109_s4 + $0xf4] sm:$0xf0] }
  0x15   :  { %v3108_v14 = vor.u32 %v3527_v13, %v3107_v10  ;;  %v3091_v16 = vld [vmem:[%s5109_s4 + $0xc8] sm:$0xf]  ;;  %v3510_v31 = vld [vmem:[%s5109_s4 + $0x6c] sm:$0xf0]  ;;  %v3037_v33 = vld [vmem:[%s5109_s4 + $0x70] sm:$0xf0] }
  0x16   :  { %131 = vmatpush.bf16.msra.mxu0 %v3450_v15  ;;  %v3068_v15 = vor.u32 %v3518_v9, %v3067_v8  ;;  %v3109_v59 = vld [vmem:[%s5109_s4 + $0xf8] sm:$0xf0]  ;;  %v3027_v60 = vld [vmem:[%s5109_s4 + $0x48] sm:$0xf]  ;;  %v3488_v62 = vld [vmem:[%s5105_s3 + $0x140] sm:$0xff] }
  0x17   :  { %371 = vmatpush.bf16.msra.mxu3 %v3474_v17  ;;  %257 = vmatpush.bf16.msra.mxu2 %v3468_v35  ;;  %v3523_v17 = vld [vmem:[%s5109_s4 + $0xd4] sm:$0xf0]  ;;  %v3059_v35 = vld [vmem:[%s5109_s4 + $0x88] sm:$0xf]  ;;  %v2987_v3 = vld [vmem:[%s5109_s4] sm:$0xf] }
  0x18   :  { %195 = vmatpush.bf16.msra.mxu1 %v3458_v19  ;;  %v3072_v19 = vor.u32 %v3516_v11, %v3069_v12  ;;  %v3498_v4 = vld [vmem:[%s5109_s4 + $0xc] sm:$0xf0]  ;;  %v2989_v8 = vld [vmem:[%s5109_s4 + $0x10] sm:$0xf0]  ;;  %v3093_v11 = vld [vmem:[%s5109_s4 + $0xd8] sm:$0xf0] }
  0x19   :  { %v3011_v12 = vld [vmem:[%s5109_s4 + $0x28] sm:$0xf]  ;;  %v3503_v13 = vld [vmem:[%s5109_s4 + $0x34] sm:$0xf0] }
  0x1a   :  { %132 = vmatpush.bf16.msra.mxu0 %v3449_v18  ;;  %v3492_v18 = vld [vmem:[%s5105_s3 + $0x160] sm:$0xff] }
  0x1b   :  { %372 = vmatpush.bf16.msra.mxu3 %v3473_v20  ;;  %258 = vmatpush.bf16.msra.mxu2 %v3467_v39  ;;  %v3051_v20 = vld [vmem:[%s5109_s4 + $0x80] sm:$0xf] }
  0x1c   :  { %196 = vmatpush.bf16.msra.mxu1 %v3457_v24  ;;  %v3092_v24 = vor.u32 %v3523_v17, %v3091_v16  ;;  %v573_v16 = vld [vmem:[%s5110_s1] sm:$0xff]  ;;  %v574_v17 = vld [vmem:[%s5110_s1 + $0x8] sm:$0xff] }
  0x1e   :  { %133 = vmatpush.bf16.msra.mxu0 %v3448_v21  ;;  %v3514_v21 = vld [vmem:[%s5109_s4 + $0x8c] sm:$0xf0] }
  0x1f   :  { %373 = vmatpush.bf16.msra.mxu3 %v3472_v23  ;;  %259 = vmatpush.bf16.msra.mxu2 %v3466_v43  ;;  %v3053_v23 = vld [vmem:[%s5109_s4 + $0x90] sm:$0xf0] }
  0x20   :  { %197 = vmatpush.bf16.msra.mxu1 %v3456_v25  ;;  %v3075_v25 = vld [vmem:[%s5109_s4 + $0xa8] sm:$0xf]  ;;  %v3021_v43 = vld [vmem:[%s5109_s4 + $0x50] sm:$0xf0] }
  0x21   :  { %134 = vmatmul.bf16.vlgmr.msra.gmra.mxu0 %v77_v22 }
  0x22   :  { %374 = vmatmul.bf16.vlgmr.msra.gmra.mxu3 %v77_v22  ;;  %430 = vmatpush.bf16.msrb.mxu0 %v3487_v26  ;;  %v3512_v22 = vld [vmem:[%s5109_s4 + $0x84] sm:$0xf]  ;;  %v3519_v26 = vld [vmem:[%s5109_s4 + $0xb4] sm:$0xf0] }
  0x23   :  { %260 = vmatpush.bf16.msra.mxu2 %v3465_v54  ;;  %767 = vmatpush.bf16.msrb.mxu3 %v3104_v0  ;;  %v3056_v29 = vor.u32 %v3512_v22, %v3053_v23  ;;  %v3525_v54 = vld [vmem:[%s5109_s4 + $0xec] sm:$0xf]  ;;  %v3227_v22 = vld [vmem:[%s5109_s4 + $0x1e0] sm:$0xf]  ;;  %v3558_v23 = vld [vmem:[%s5109_s4 + $0x1ec] sm:$0xf0] }
  0x24   :  { %494 = vmatpush.bf16.msrb.mxu1 %v3495_v56  ;;  %v3005_v56 = vld [vmem:[%s5109_s4 + $0x30] sm:$0xf0] }
  0x26   :  { %431 = vmatpush.bf16.msrb.mxu0 %v3486_v27  ;;  %v3052_v27 = vor.u32 %v3514_v21, %v3051_v20  ;;  %v3077_v20 = vld [vmem:[%s5109_s4 + $0xb8] sm:$0xf0] }
  0x27   :  { %261 = vmatpush.bf16.msra.mxu2 %v3464_v55  ;;  %768 = vmatpush.bf16.msrb.mxu3 %v3088_v7  ;;  %v3500_v55 = vld [vmem:[%s5109_s4 + $0x24] sm:$0xf] }
  0x28   :  { %495 = vmatpush.bf16.msrb.mxu1 %v3494_v57  ;;  %v3008_v1 = vor.u32 %v3500_v55, %v3005_v56  ;;  %v3496_v7 = vld [vmem:[%s5109_s4 + $0x4] sm:$0xf]  ;;  %v3197_v56 = vld [vmem:[%s5109_s4 + $0x1b0] sm:$0xf0] }
  0x29   :  { %v2992_v21 = vor.u32 %v3496_v7, %v2989_v8  ;;  %v3548_v55 = vld [vmem:[%s5109_s4 + $0x1a4] sm:$0xf]  ;;  %v3181_v8 = vld [vmem:[%s5109_s4 + $0x190] sm:$0xf0] }
  0x2a   :  { %432 = vmatpush.bf16.msrb.mxu0 %v3485_v28  ;;  %v3491_v28 = vld [vmem:[%s5105_s3 + $0x158] sm:$0xff]  ;;  %v3544_v7 = vld [vmem:[%s5109_s4 + $0x184] sm:$0xf] }
  0x2b   :  { %748 = vmatpush.bf16.msrb.mxu2 %v3100_v61  ;;  %769 = vmatpush.bf16.msrb.mxu3 %v3072_v19  ;;  %v3507_v61 = vld [vmem:[%s5109_s4 + $0x54] sm:$0xf0]  ;;  %v3517_v19 = vld [vmem:[%s5109_s4 + $0xac] sm:$0xf] }
  0x2c   :  { %496 = vmatpush.bf16.msrb.mxu1 %v3493_v5  ;;  %v3112_v5 = vor.u32 %v3525_v54, %v3109_v59  ;;  %v3028_v9 = vor.u32 %v3507_v61, %v3027_v60  ;;  %v3555_v54 = vld [vmem:[%s5109_s4 + $0x1d4] sm:$0xf0]  ;;  %v3179_v60 = vld [vmem:[%s5109_s4 + $0x180] sm:$0xf]  ;;  %v3546_v61 = vld [vmem:[%s5109_s4 + $0x18c] sm:$0xf0] }
  0x2e   :  { %433 = vmatpush.bf16.msrb.mxu0 %v3484_v30  ;;  %v3035_v30 = vld [vmem:[%s5109_s4 + $0x60] sm:$0xf] }
  0x2f   :  { %749 = vmatpush.bf16.msrb.mxu2 %v3084_v6  ;;  %770 = vmatpush.bf16.msrb.mxu3 %v3056_v29  ;;  %v3521_v6 = vld [vmem:[%s5109_s4 + $0xcc] sm:$0xf]  ;;  %v3499_v29 = vld [vmem:[%s5109_s4 + $0x14] sm:$0xf0] }
  0x30   :  { %497 = vmatpush.bf16.msrb.mxu1 %v3492_v18 }
  0x32   :  { %434 = vmatpush.bf16.msrb.mxu0 %v3483_v32  ;;  %v3508_v32 = vld [vmem:[%s5109_s4 + $0x64] sm:$0xf] }
  0x33   :  { %750 = vmatpush.bf16.msrb.mxu2 %v3068_v15  ;;  %v3040_v39 = vor.u32 %v3508_v32, %v3037_v33  ;;  %v2988_v15 = vor.u32 %v3498_v4, %v2987_v3  ;;  %v4231_v3 = vor.u32 %v3548_v55, %v3197_v56  ;;  %v3203_v4 = vld [vmem:[%s5109_s4 + $0x1a8] sm:$0xf]  ;;  %v3532_v55 = vld [vmem:[%s5109_s4 + $0x124] sm:$0xf]  ;;  %v3133_v56 = vld [vmem:[%s5109_s4 + $0x130] sm:$0xf0] }
  0x34   :  { %498 = vmatpush.bf16.msrb.mxu1 %v3491_v28  ;;  %v2995_v28 = vld [vmem:[%s5109_s4 + $0x8] sm:$0xf] }
  0x35   :  { %771 = vmatpush.bf16.msrb.mxu3 %v3040_v39  ;;  %v3554_v39 = vld [vmem:[%s5109_s4 + $0x1cc] sm:$0xf0] }
  0x36   :  { %435 = vmatpush.bf16.msrb.mxu0 %v3482_v34  ;;  %v3076_v34 = vor.u32 %v3519_v26, %v3075_v25  ;;  %v3096_v26 = vor.u32 %v3521_v6, %v3093_v11  ;;  %v4241_v6 = vor.u32 %v3546_v61, %v3179_v60  ;;  %v3029_v11 = vld [vmem:[%s5109_s4 + $0x58] sm:$0xf0]  ;;  %v3553_v60 = vld [vmem:[%s5109_s4 + $0x1cc] sm:$0xf] }
  0x37   :  { %751 = vmatpush.bf16.msrb.mxu2 %v3052_v27  ;;  %v3012_v27 = vor.u32 %v3503_v13, %v3011_v12  ;;  %v575_v13 = vld [vmem:[%s5110_s1 + $0x10] sm:$0xff]  ;;  %v3221_v61 = vld [vmem:[%s5109_s4 + $0x1d8] sm:$0xf0] }
  0x3a   :  { %436 = vmatpush.bf16.msrb.mxu0 %v3481_v37  ;;  %v3036_v37 = vor.u32 %v3510_v31, %v3035_v30  ;;  %v4152_v30 = vor.u32 %v3558_v23, %v3227_v22  ;;  %v3229_v31 = vld [vmem:[%s5109_s4 + $0x1f0] sm:$0xf0]  ;;  %v3540_v22 = vld [vmem:[%s5109_s4 + $0x164] sm:$0xf] }
  0x3b   :  { %v3165_v23 = vld [vmem:[%s5109_s4 + $0x170] sm:$0xf0] }
  0x3c   :  { %752 = vmatpush.bf16.msrb.mxu2 %v3036_v37 }
  0x3e   :  { %437 = vmatpush.bf16.msrb.mxu0 %v3480_v42  ;;  %v3504_v42 = vld [vmem:[%s5109_s4 + $0x44] sm:$0xf] }
  0x42   :  { %786 = vmatpush.bf16.msra.mxu0 %v3108_v14  ;;  %v300_v14 = vld [vmem:[%s5108_s5 + $0x4] ss:$0 sm:$0xff] }
  0x46   :  { %787 = vmatpush.bf16.msra.mxu0 %v3092_v24  ;;  %v3556_v24 = vld [vmem:[%s5109_s4 + $0x1e4] sm:$0xf] }
  0x47   :  { %v4157_v33 = vor.u32 %v3556_v24, %v3229_v31  ;;  %v3501_v24 = vld [vmem:[%s5109_s4 + $0x2c] sm:$0xf]  ;;  %v3543_v31 = vld [vmem:[%s5109_s4 + $0x174] sm:$0xf0] }
  0x4a   :  { %788 = vmatpush.bf16.msra.mxu0 %v3076_v34  ;;  %v3235_v34 = vld [vmem:[%s5109_s4 + $0x1e8] sm:$0xf] }
  0x9e   :  { %v135_v38 = vpop.f32.mrf.mxu0 }
  0x9f   :  { %v136_v40 = vadd.f32 %v135_v38, %v42_v36  ;;  %v3515_v36 = vld [vmem:[%s5109_s4 + $0x94] sm:$0xf0]  ;;  %v3490_v38 = vld [vmem:[%s5105_s3 + $0x150] sm:$0xff] }
  0xa0   :  { %499 = vmatpush.bf16.msrb.mxu1 %v3490_v38  ;;  %v4168_v38 = vpack.c.bf16 %v574_v17, %v573_v16  ;;  %v3547_v16 = vld [vmem:[%s5109_s4 + $0x194] sm:$0xf0] }
  0xa1   :  { %v139_v41 = vmul.f32 0.2, %v136_v40  ;;  %v576_v17 = vld [vmem:[%s5110_s1 + $0x18] sm:$0xff] }
  0xa3   :  { %v140_v44 = vmax.f32 %v136_v40, %v139_v41  ;;  %v3019_v40 = vld [vmem:[%s5109_s4 + $0x40] sm:$0xf]  ;;  %v3506_v41 = vld [vmem:[%s5109_s4 + $0x4c] sm:$0xf0] }
  0xa5   :  { %v141_v45 = vpack.c.bf16 %v140_v44, %v140_v44  ;;  %v375_v48 = vpop.f32.mrf.mxu3  ;;  %v3060_v44 = vor.u32 %v3515_v36, %v3059_v35  ;;  %v3559_v35 = vld [vmem:[%s5109_s4 + $0x1f4] sm:$0xf0]  ;;  %v3211_v36 = vld [vmem:[%s5109_s4 + $0x1c0] sm:$0xf] }
  0xa6   :  { %v137_v47 = vpop.f32.mrf.mxu0  ;;  %v376_v49 = vadd.f32 %v375_v48, %v283_v46  ;;  %v3511_v46 = vld [vmem:[%s5109_s4 + $0x74] sm:$0xf0]  ;;  %v3020_v48 = vor.u32 %v3506_v41, %v3019_v40  ;;  %v3552_v40 = vld [vmem:[%s5109_s4 + $0x1c4] sm:$0xf]  ;;  %v3213_v41 = vld [vmem:[%s5109_s4 + $0x1d0] sm:$0xf0] }
  0xa7   :  { %198 = vmatmul.bf16.vlgmr.msra.gmra.mxu1 %v141_v45  ;;  %v3043_v45 = vld [vmem:[%s5109_s4 + $0x68] sm:$0xf]  ;;  %v59_v47 = vld [vmem:[%s5108_s5 + $0x1] ss:$0 sm:$0xff]  ;;  %789 = vmatpush.bf16.msra.mxu0 %v3060_v44  ;;  %v3080_v44 = vor.u32 %v3517_v19, %v3077_v20  ;;  %v3542_v19 = vld [vmem:[%s5109_s4 + $0x16c] sm:$0xf0] }
  0xa8   :  { %v379_v50 = vmul.f32 0.2, %v376_v49  ;;  %v3044_v57 = vor.u32 %v3511_v46, %v3043_v45  ;;  %753 = vmatpush.bf16.msrb.mxu2 %v3020_v48  ;;  %v3513_v45 = vld [vmem:[%s5109_s4 + $0x8c] sm:$0xf]  ;;  %v3061_v46 = vld [vmem:[%s5109_s4 + $0x98] sm:$0xf0]  ;;  %v4189_v48 = vor.u32 %v3559_v35, %v3235_v34  ;;  %v4317_v35 = vor.u32 %v3540_v22, %v3165_v23 }
  0xa9   :  { %v3064_v59 = vor.u32 %v3513_v45, %v3061_v46  ;;  %v3497_v34 = vld [vmem:[%s5109_s4 + $0xc] sm:$0xf]  ;;  %v3131_v45 = vld [vmem:[%s5109_s4 + $0x120] sm:$0xf]  ;;  %v3534_v46 = vld [vmem:[%s5109_s4 + $0x12c] sm:$0xf0] }
  0xaa   :  { %v380_v51 = vmax.f32 %v376_v49, %v379_v50  ;;  %v3489_v49 = vld [vmem:[%s5105_s3 + $0x148] sm:$0xff]  ;;  %v3024_v50 = vor.u32 %v3504_v42, %v3021_v43  ;;  %v4180_v42 = vor.u32 %v3554_v39, %v3211_v36  ;;  %v2997_v39 = vld [vmem:[%s5109_s4 + $0x18] sm:$0xf0] }
  0xab   :  { %500 = vmatpush.bf16.msrb.mxu1 %v3489_v49  ;;  %790 = vmatpush.bf16.msra.mxu0 %v3044_v57  ;;  %v4191_v49 = vor.u32 %v3552_v40, %v3213_v41  ;;  %v3536_v40 = vld [vmem:[%s5109_s4 + $0x144] sm:$0xf]  ;;  %v3149_v41 = vld [vmem:[%s5109_s4 + $0x150] sm:$0xf0]  ;;  %v3141_v22 = vld [vmem:[%s5109_s4 + $0x138] sm:$0xf0] }
  0xac   :  { %v381_v52 = vpack.c.bf16 %v380_v51, %v380_v51  ;;  %v3003_v51 = vld [vmem:[%s5109_s4 + $0x20] sm:$0xf]  ;;  %772 = vmatpush.bf16.msrb.mxu3 %v3024_v50  ;;  %v3219_v50 = vld [vmem:[%s5109_s4 + $0x1c8] sm:$0xf] }
  0xad   :  { %v377_v53 = vpop.f32.mrf.mxu3 }
  0xae   :  { %438 = vmatmul.bf16.vlgmr.msrb.gmra.mxu0 %v381_v52  ;;  %v3502_v52 = vld [vmem:[%s5109_s4 + $0x2c] sm:$0xf0] }
  0xaf   :  { %v3004_v63 = vor.u32 %v3502_v52, %v3003_v51  ;;  %501 = vmatpush.bf16.msrb.mxu1 %v3488_v62  ;;  %791 = vmatpush.bf16.msra.mxu0 %v3028_v9  ;;  %v3195_v51 = vld [vmem:[%s5109_s4 + $0x1a0] sm:$0xf]  ;;  %v3550_v52 = vld [vmem:[%s5109_s4 + $0x1ac] sm:$0xf0]  ;;  %v3509_v62 = vld [vmem:[%s5109_s4 + $0x6c] sm:$0xf] }
  0xb0   :  { %773 = vmatpush.bf16.msrb.mxu3 %v3008_v1  ;;  %v4213_v57 = vor.u32 %v3550_v52, %v3195_v51  ;;  %v4229_v1 = vor.u32 %v3555_v54, %v3219_v50  ;;  %v3155_v50 = vld [vmem:[%s5109_s4 + $0x148] sm:$0xf]  ;;  %v3539_v51 = vld [vmem:[%s5109_s4 + $0x154] sm:$0xf0]  ;;  %v4354_v52 = vor.u32 %v3536_v40, %v3149_v41  ;;  %v4356_v54 = vor.u32 %v3534_v46, %v3131_v45  ;;  %v3125_v40 = vld [vmem:[%s5109_s4 + $0x118] sm:$0xf0] }
  0xb1   :  { %754 = vmatpush.bf16.msrb.mxu2 %v3004_v63  ;;  %v3045_v63 = vld [vmem:[%s5109_s4 + $0x78] sm:$0xf0] }
  0xb2   :  { %v3048_v9 = vor.u32 %v3509_v62, %v3045_v63  ;;  %v4377_v62 = vor.u32 %v3532_v55, %v3133_v56  ;;  %v3139_v63 = vld [vmem:[%s5109_s4 + $0x128] sm:$0xf] }
  0xb3   :  { %805 = vmatpush.bf16.msra.mxu1 %v3112_v5  ;;  %792 = vmatpush.bf16.msra.mxu0 %v3012_v27  ;;  %v3551_v5 = vld [vmem:[%s5109_s4 + $0x1b4] sm:$0xf0]  ;;  %v3147_v27 = vld [vmem:[%s5109_s4 + $0x140] sm:$0xf] }
  0xb4   :  { %774 = vmatpush.bf16.msrb.mxu3 %v2992_v21  ;;  %v4257_v12 = vor.u32 %v3551_v5, %v3203_v4  ;;  %v4387_v4 = vor.u32 %v3553_v60, %v3221_v61  ;;  %v3549_v5 = vld [vmem:[%s5109_s4 + $0x1ac] sm:$0xf] }
  0xb5   :  { %755 = vmatpush.bf16.msrb.mxu2 %v2988_v15  ;;  %v3187_v15 = vld [vmem:[%s5109_s4 + $0x188] sm:$0xf] }
  0xb7   :  { %806 = vmatpush.bf16.msra.mxu1 %v3096_v26  ;;  %775 = vmatmul.bf16.vlgmr.msrb.gmra.mxu3 %v4168_v38  ;;  %v4296_v26 = vor.u32 %v3547_v16, %v3187_v15  ;;  %v3173_v15 = vld [vmem:[%s5109_s4 + $0x178] sm:$0xf0] }
  0xb8   :  { %998 = vmatpush.bf16.msra.mxu3 %v4157_v33 }
  0xbb   :  { %807 = vmatpush.bf16.msra.mxu1 %v3080_v44 }
  0xbc   :  { %999 = vmatpush.bf16.msra.mxu3 %v4191_v49 }
  0xbf   :  { %808 = vmatpush.bf16.msra.mxu1 %v3064_v59  ;;  %v4367_v59 = vor.u32 %v3539_v51, %v3155_v50 }
  0xc0   :  { %1000 = vmatpush.bf16.msra.mxu3 %v4231_v3 }
  0xc3   :  { %809 = vmatpush.bf16.msra.mxu1 %v3048_v9 }
 0x124   :  { %v199_v53 = vpop.f32.mrf.mxu1 }
 0x125   :  { %v200_v58 = vadd.f32 %v199_v53, %v59_v47  ;;  %v2996_v47 = vor.u32 %v3499_v29, %v2995_v28  ;;  %v4301_v28 = vpack.c.bf16 %v576_v17, %v575_v13  ;;  %v3171_v29 = vld [vmem:[%s5109_s4 + $0x168] sm:$0xf]  ;;  %v3541_v13 = vld [vmem:[%s5109_s4 + $0x16c] sm:$0xf] }
 0x126   :  { %v4334_v44 = vor.u32 %v3543_v31, %v3171_v29  ;;  %v4421_v16 = vor.u32 %v3541_v13, %v3173_v15  ;;  %v3537_v17 = vld [vmem:[%s5109_s4 + $0x14c] sm:$0xf]  ;;  %v3123_v31 = vld [vmem:[%s5109_s4 + $0x108] sm:$0xf] }
 0x127   :  { %v203_v0 = vmul.f32 0.2, %v200_v58  ;;  %793 = vmatpush.bf16.msra.mxu0 %v2996_v47  ;;  %v3237_v47 = vld [vmem:[%s5109_s4 + $0x1f8] sm:$0xf0]  ;;  %780 = vmatmul.bf16.gmra.mxu3 %v4301_v28 }
 0x129   :  { %v204_v10 = vmax.f32 %v200_v58, %v203_v0 }
 0x12a   :  { %794 = vmatmul.bf16.vlgmr.msra.gmra.mxu0 %v4168_v38 }
 0x12b   :  { %v205_v18 = vpack.c.bf16 %v204_v10, %v204_v10  ;;  %v439_v32 = vpop.f32.mrf.mxu0  ;;  %1011 = vmatpush.bf16.msrb.mxu0 %v4189_v48  ;;  %v3505_v10 = vld [vmem:[%s5109_s4 + $0x4c] sm:$0xf] }
 0x12c   :  { %v201_v25 = vpop.f32.mrf.mxu1  ;;  %v440_v37 = vadd.f32 %v439_v32, %v300_v14  ;;  %v4262_v14 = vor.u32 %v3544_v7, %v3181_v8  ;;  %v3032_v20 = vor.u32 %v3505_v10, %v3029_v11  ;;  %v3538_v32 = vld [vmem:[%s5109_s4 + $0x14c] sm:$0xf0]  ;;  %v3205_v7 = vld [vmem:[%s5109_s4 + $0x1b8] sm:$0xf0]  ;;  %v3545_v10 = vld [vmem:[%s5109_s4 + $0x18c] sm:$0xf] }
 0x12d   :  { %262 = vmatmul.bf16.vlgmr.msra.gmra.mxu2 %v205_v18  ;;  %v3163_v18 = vld [vmem:[%s5109_s4 + $0x160] sm:$0xf]  ;;  %v3013_v25 = vld [vmem:[%s5109_s4 + $0x38] sm:$0xf0]  ;;  %v4319_v36 = vor.u32 %v3538_v32, %v3147_v27  ;;  %v4402_v9 = vor.u32 %v3549_v5, %v3205_v7  ;;  %v3528_v27 = vld [vmem:[%s5109_s4 + $0x104] sm:$0xf] }
 0x12e   :  { %985 = vmatpush.bf16.msra.mxu2 %v4152_v30  ;;  %v443_v43 = vmul.f32 0.2, %v440_v37  ;;  %v4280_v21 = vor.u32 %v3542_v19, %v3163_v18  ;;  %1001 = vmatpush.bf16.msra.mxu3 %v4262_v14  ;;  %v3189_v11 = vld [vmem:[%s5109_s4 + $0x198] sm:$0xf0]  ;;  %v3531_v32 = vld [vmem:[%s5109_s4 + $0x114] sm:$0xf0] }
 0x12f   :  { %1012 = vmatpush.bf16.msrb.mxu0 %v4229_v1  ;;  %810 = vmatpush.bf16.msra.mxu1 %v3032_v20  ;;  %v3157_v18 = vld [vmem:[%s5109_s4 + $0x158] sm:$0xf0]  ;;  %v3533_v20 = vld [vmem:[%s5109_s4 + $0x12c] sm:$0xf] }
 0x130   :  { %v444_v53 = vmax.f32 %v440_v37, %v443_v43  ;;  %v3016_v37 = vor.u32 %v3501_v24, %v3013_v25  ;;  %v3557_v43 = vld [vmem:[%s5109_s4 + $0x1ec] sm:$0xf]  ;;  %v4430_v19 = vor.u32 %v3537_v17, %v3157_v18  ;;  %v4440_v23 = vor.u32 %v3533_v20, %v3141_v22  ;;  %v3115_v24 = vld [vmem:[%s5109_s4 + $0x100] sm:$0xf]  ;;  %v3530_v25 = vld [vmem:[%s5109_s4 + $0x10c] sm:$0xf0] }
 0x131   :  { %v4452_v29 = vor.u32 %v3530_v25, %v3115_v24 }
 0x132   :  { %986 = vmatpush.bf16.msra.mxu2 %v4180_v42  ;;  %v445_v58 = vpack.c.bf16 %v444_v53, %v444_v53  ;;  %1002 = vmatpush.bf16.msra.mxu3 %v4317_v35  ;;  %v3000_v53 = vor.u32 %v3497_v34, %v2997_v39  ;;  %v3529_v39 = vld [vmem:[%s5109_s4 + $0x10c] sm:$0xf] }
 0x133   :  { %v441_v0 = vpop.f32.mrf.mxu0  ;;  %1013 = vmatpush.bf16.msrb.mxu0 %v4257_v12  ;;  %811 = vmatpush.bf16.msra.mxu1 %v3016_v37  ;;  %v4465_v37 = vor.u32 %v3531_v32, %v3123_v31  ;;  %v4474_v41 = vor.u32 %v3529_v39, %v3125_v40 }
 0x134   :  { %502 = vmatmul.bf16.vlgmr.msrb.gmra.mxu1 %v445_v58  ;;  %v4364_v58 = vor.u32 %v3557_v43, %v3237_v47  ;;  %v3535_v0 = vld [vmem:[%s5109_s4 + $0x134] sm:$0xf0]  ;;  %v76_v43 = vld [vmem:[%s5108_s5 + $0x2] ss:$0 sm:$0xff] }
 0x135   :  { %v4396_v8 = vor.u32 %v3535_v0, %v3139_v63  ;;  %v2984_v0 = vld [vmem:[%s5108_s5 + $0x24] ss:$8 sm:$0xf] }
 0x136   :  { %987 = vmatpush.bf16.msra.mxu2 %v4213_v57  ;;  %1003 = vmatpush.bf16.msra.mxu3 %v4354_v52  ;;  %v4539_v5 = vperm.slane %v2984_v0, 2  ;;  %v4543_v7 = vperm.slane %v2984_v0, 1  ;;  %v4563_v20 = vperm.slane %v2984_v0, 3  ;;  %v4565_v22 = vperm.slane %v2984_v0, 0 }
 0x137   :  { %1014 = vmatpush.bf16.msrb.mxu0 %v4296_v26  ;;  %812 = vmatpush.bf16.msra.mxu1 %v3000_v53 }
 0x138   :  { %5130 = vst [vmem:[#allocation6_spill] sm:$0xff] %v4539_v5 }
 0x139   :  { %5131 = vst [vmem:[#allocation7_spill] sm:$0xff] %v4543_v7 }
 0x13a   :  { %988 = vmatpush.bf16.msra.mxu2 %v4241_v6  ;;  %799 = vmatmul.bf16.gmra.mxu0 %v4301_v28  ;;  %v4518_v53 = vpop.f32.mrf.mxu3  ;;  %5135 = vst [vmem:[#allocation11_spill] sm:$0xff] %v4563_v20 }
 0x13b   :  { %1015 = vmatpush.bf16.msrb.mxu0 %v4334_v44  ;;  %1024 = vmatpush.bf16.msrb.mxu1 %v4364_v58  ;;  %5136 = vst [vmem:[#allocation12_spill] sm:$0xff] %v4565_v22 }
 0x13c   :  { %1004 = vmatpush.bf16.msra.mxu3 %v4377_v62 }
 0x13d   :  { %756 = vmatmul.bf16.vlgmr.msrb.gmra.mxu2 %v4168_v38 }
 0x13e   :  { %989 = vmatpush.bf16.msra.mxu2 %v4280_v21 }
 0x13f   :  { %1016 = vmatpush.bf16.msrb.mxu0 %v4367_v59  ;;  %1025 = vmatpush.bf16.msrb.mxu1 %v4387_v4 }
 0x142   :  { %990 = vmatpush.bf16.msra.mxu2 %v4319_v36  ;;  %v4530_v61 = vpop.f32.mrf.mxu3 }
 0x143   :  { %1017 = vmatpush.bf16.msrb.mxu0 %v4396_v8  ;;  %1026 = vmatpush.bf16.msrb.mxu1 %v4402_v9  ;;  %5129 = vst [vmem:[#allocation5_spill] sm:$0xff] %v4530_v61 }
 0x144   :  { %813 = vmatmul.bf16.vlgmr.msra.gmra.mxu1 %v4168_v38  ;;  %v4412_v38 = vor.u32 %v3545_v10, %v3189_v11 }
 0x146   :  { %991 = vmatpush.bf16.msra.mxu2 %v4356_v54 }
 0x147   :  { %1027 = vmatpush.bf16.msrb.mxu1 %v4412_v38  ;;  %1018 = vmatpush.bf16.msrb.mxu0 %v4465_v37 }
 0x14a   :  { %992 = vmatpush.bf16.msra.mxu2 %v4452_v29 }
 0x14b   :  { %1028 = vmatpush.bf16.msrb.mxu1 %v4421_v16  ;;  %1132 = vmatpush.bf16.msra.mxu0 %v4189_v48 }
 0x14d   :  { %761 = vmatmul.bf16.gmra.mxu2 %v4301_v28 }
 0x14e   :  { %1106 = vmatpush.bf16.msrb.mxu2 %v4152_v30 }
 0x14f   :  { %1029 = vmatpush.bf16.msrb.mxu1 %v4430_v19  ;;  %1133 = vmatpush.bf16.msra.mxu0 %v4229_v1 }
 0x152   :  { %1107 = vmatpush.bf16.msrb.mxu2 %v4180_v42 }
 0x153   :  { %1030 = vmatpush.bf16.msrb.mxu1 %v4440_v23  ;;  %1134 = vmatpush.bf16.msra.mxu0 %v4257_v12 }
 0x154   :  { %818 = vmatmul.bf16.gmra.mxu1 %v4301_v28  ;;  %v3117_v28 = vld [vmem:[%s5109_s4 + $0x110] sm:$0xf0] }
 0x155   :  { %v4463_v34 = vor.u32 %v3528_v27, %v3117_v28 }
 0x156   :  { %1108 = vmatpush.bf16.msrb.mxu2 %v4213_v57 }
 0x157   :  { %1005 = vmatpush.bf16.msra.mxu3 %v4463_v34  ;;  %1031 = vmatpush.bf16.msrb.mxu1 %v4474_v41 }
 0x158   :  { %1135 = vmatpush.bf16.msra.mxu0 %v4296_v26 }
 0x15a   :  { %1109 = vmatpush.bf16.msrb.mxu2 %v4241_v6 }
 0x15b   :  { %1119 = vmatpush.bf16.msrb.mxu3 %v4157_v33  ;;  %1145 = vmatpush.bf16.msra.mxu1 %v4364_v58 }
 0x15c   :  { %1136 = vmatpush.bf16.msra.mxu0 %v4334_v44 }
 0x15e   :  { %1110 = vmatpush.bf16.msrb.mxu2 %v4280_v21 }
 0x15f   :  { %1120 = vmatpush.bf16.msrb.mxu3 %v4191_v49  ;;  %1146 = vmatpush.bf16.msra.mxu1 %v4387_v4 }
 0x160   :  { %1137 = vmatpush.bf16.msra.mxu0 %v4367_v59 }
 0x162   :  { %1111 = vmatpush.bf16.msrb.mxu2 %v4319_v36 }
 0x163   :  { %1121 = vmatpush.bf16.msrb.mxu3 %v4231_v3  ;;  %1147 = vmatpush.bf16.msra.mxu1 %v4402_v9 }
 0x164   :  { %1138 = vmatpush.bf16.msra.mxu0 %v4396_v8 }
 0x166   :  { %1112 = vmatpush.bf16.msrb.mxu2 %v4356_v54 }
 0x167   :  { %1122 = vmatpush.bf16.msrb.mxu3 %v4262_v14  ;;  %1148 = vmatpush.bf16.msra.mxu1 %v4412_v38 }
 0x168   :  { %1139 = vmatpush.bf16.msra.mxu0 %v4465_v37 }
 0x16a   :  { %1113 = vmatpush.bf16.msrb.mxu2 %v4452_v29 }
 0x16b   :  { %1123 = vmatpush.bf16.msrb.mxu3 %v4317_v35  ;;  %1149 = vmatpush.bf16.msra.mxu1 %v4421_v16 }
 0x16f   :  { %1124 = vmatpush.bf16.msrb.mxu3 %v4354_v52  ;;  %1150 = vmatpush.bf16.msra.mxu1 %v4430_v19 }
 0x173   :  { %1125 = vmatpush.bf16.msrb.mxu3 %v4377_v62  ;;  %1151 = vmatpush.bf16.msra.mxu1 %v4440_v23 }
 0x177   :  { %1126 = vmatpush.bf16.msrb.mxu3 %v4463_v34  ;;  %1152 = vmatpush.bf16.msra.mxu1 %v4474_v41 }
 0x1a7   :  { %v4516_v51 = vpop.f32.mrf.mxu0 }
 0x1aa   :  { %v781_v11 = vpop.f32.mrf.mxu3 }
 0x1ab   :  { %v4551_v15 = vadd.f32 %v781_v11, %v4543_v7  ;;  %v4601_v11 = vadd.f32 %v4518_v53, %v4543_v7 }
 0x1ad   :  { %5133 = vst [vmem:[#allocation9_spill] sm:$0xff] %v4551_v15 }
 0x1af   :  { %v4526_v60 = vpop.f32.mrf.mxu0 }
 0x1b0   :  { %v263_v45 = vpop.f32.mrf.mxu2  ;;  %5128 = vst [vmem:[#allocation4_spill] sm:$0xff] %v4526_v60 }
 0x1b1   :  { %v264_v46 = vadd.f32 %v263_v45, %v76_v43  ;;  %v4514_v50 = vpop.f32.mrf.mxu1 }
 0x1b2   :  { %v4590_v45 = vpop.f32.mrf.mxu3 }
 0x1b3   :  { %v824_v47 = vpack.c.bf16 %v264_v46, %v264_v46  ;;  %5143 = vst [vmem:[#allocation19_spill] sm:$0xff] %v4590_v45 }
 0x1b5   :  { %993 = vmatmul.bf16.vlgmr.msra.gmra.mxu2 %v824_v47  ;;  %1006 = vmatmul.bf16.vlgmr.msra.gmra.mxu3 %v824_v47 }
 0x1b6   :  { %1019 = vmatmul.bf16.vlgmr.msrb.gmra.mxu0 %v824_v47  ;;  %1032 = vmatmul.bf16.vlgmr.msrb.gmra.mxu1 %v824_v47 }
 0x1b7   :  { %1245 = vmatpush.bf16.msra.mxu2 %v4152_v30  ;;  %1258 = vmatpush.bf16.msra.mxu3 %v4157_v33  ;;  %v800_v10 = vpop.f32.mrf.mxu0 }
 0x1b8   :  { %v265_v55 = vpop.f32.mrf.mxu2  ;;  %1271 = vmatpush.bf16.msrb.mxu0 %v4189_v48  ;;  %1284 = vmatpush.bf16.msrb.mxu1 %v4364_v58  ;;  %v4548_v13 = vadd.f32 %v800_v10, %v4539_v5 }
 0x1b9   :  { %v505_v56 = vpop.f32.mrf.mxu1 }
 0x1ba   :  { %5132 = vst [vmem:[#allocation8_spill] sm:$0xff] %v4548_v13 }
 0x1bb   :  { %1246 = vmatpush.bf16.msra.mxu2 %v4180_v42  ;;  %1259 = vmatpush.bf16.msra.mxu3 %v4191_v49 }
 0x1bc   :  { %1272 = vmatpush.bf16.msrb.mxu0 %v4229_v1  ;;  %1285 = vmatpush.bf16.msrb.mxu1 %v4387_v4 }
 0x1bf   :  { %1247 = vmatpush.bf16.msra.mxu2 %v4213_v57  ;;  %1260 = vmatpush.bf16.msra.mxu3 %v4231_v3  ;;  %v4584_v39 = vpop.f32.mrf.mxu0 }
 0x1c0   :  { %v757_v63 = vpop.f32.mrf.mxu2  ;;  %1273 = vmatpush.bf16.msrb.mxu0 %v4257_v12  ;;  %1286 = vmatpush.bf16.msrb.mxu1 %v4402_v9  ;;  %5140 = vst [vmem:[#allocation16_spill] sm:$0xff] %v4584_v39 }
 0x1c1   :  { %v814_v17 = vpop.f32.mrf.mxu1  ;;  %v4597_v10 = vadd.f32 %v757_v63, %v4565_v22 }
 0x1c2   :  { %v4593_v46 = vadd.f32 %v814_v17, %v4563_v20 }
 0x1c3   :  { %1248 = vmatpush.bf16.msra.mxu2 %v4241_v6  ;;  %1261 = vmatpush.bf16.msra.mxu3 %v4262_v14 }
 0x1c4   :  { %1274 = vmatpush.bf16.msrb.mxu0 %v4296_v26  ;;  %1287 = vmatpush.bf16.msrb.mxu1 %v4412_v38 }
 0x1c7   :  { %1249 = vmatpush.bf16.msra.mxu2 %v4280_v21  ;;  %1262 = vmatpush.bf16.msra.mxu3 %v4317_v35 }
 0x1c8   :  { %v4555_v18 = vpop.f32.mrf.mxu2  ;;  %1275 = vmatpush.bf16.msrb.mxu0 %v4334_v44  ;;  %1288 = vmatpush.bf16.msrb.mxu1 %v4421_v16 }
 0x1c9   :  { %5134 = vst [vmem:[#allocation10_spill] sm:$0xff] %v4555_v18  ;;  %v816_v24 = vpop.f32.mrf.mxu1 }
 0x1ca   :  { %v4572_v27 = vadd.f32 %v816_v24, %v4563_v20 }
 0x1cb   :  { %1250 = vmatpush.bf16.msra.mxu2 %v4319_v36  ;;  %1263 = vmatpush.bf16.msra.mxu3 %v4354_v52 }
 0x1cc   :  { %1276 = vmatpush.bf16.msrb.mxu0 %v4367_v59  ;;  %1289 = vmatpush.bf16.msrb.mxu1 %v4430_v19  ;;  %5137 = vst [vmem:[#allocation13_spill] sm:$0xff] %v4572_v27 }
 0x1cf   :  { %1251 = vmatpush.bf16.msra.mxu2 %v4356_v54  ;;  %1264 = vmatpush.bf16.msra.mxu3 %v4377_v62 }
 0x1d0   :  { %v762_v25 = vpop.f32.mrf.mxu2  ;;  %1277 = vmatpush.bf16.msrb.mxu0 %v4396_v8  ;;  %1290 = vmatpush.bf16.msrb.mxu1 %v4440_v23 }
 0x1d1   :  { %v4575_v28 = vadd.f32 %v762_v25, %v4565_v22  ;;  %v819_v31 = vpop.f32.mrf.mxu1 }
 0x1d2   :  { %v4582_v32 = vadd.f32 %v819_v31, %v4563_v20 }
 0x1d3   :  { %5138 = vst [vmem:[#allocation14_spill] sm:$0xff] %v4575_v28  ;;  %1252 = vmatpush.bf16.msra.mxu2 %v4452_v29  ;;  %1265 = vmatpush.bf16.msra.mxu3 %v4463_v34 }
 0x1d4   :  { %1278 = vmatpush.bf16.msrb.mxu0 %v4465_v37  ;;  %1291 = vmatpush.bf16.msrb.mxu1 %v4474_v41  ;;  %5139 = vst [vmem:[#allocation15_spill] sm:$0xff] %v4582_v32  ;;  %v317_v32 = vld [vmem:[%s5108_s5 + $0x5] ss:$0 sm:$0xff] }
 0x1d8   :  { %v4588_v43 = vpop.f32.mrf.mxu2 }
 0x1d9   :  { %v4586_v40 = vpop.f32.mrf.mxu1  ;;  %5142 = vst [vmem:[#allocation18_spill] sm:$0xff] %v4588_v43 }
 0x1da   :  { %5141 = vst [vmem:[#allocation17_spill] sm:$0xff] %v4586_v40 }
 0x233   :  { %v1020_v47 = vpop.f32.mrf.mxu0  ;;  %v1033_v55 = vpop.f32.mrf.mxu1 }
 0x234   :  { %v1040_v56 = vadd.f32 %v1033_v55, %v4593_v46 }
 0x236   :  { %v3243_v0 = vmul.f32 -1.442695, %v1040_v56 }
 0x238   :  { %3610 = vpow2.f32 %v3243_v0  ;;  %v994_v24 = vpop.f32.mrf.mxu2  ;;  %v1007_v25 = vpop.f32.mrf.mxu3 }
 0x239   :  { %v1037_v31 = vadd.f32 %v994_v24, %v4597_v10  ;;  %v1038_v17 = vadd.f32 %v1007_v25, %v4601_v11  ;;  %v4607_v24 = vadd.f32 %v4516_v51, %v4539_v5 }
 0x23b   :  { %v3241_v2 = vmul.f32 -1.442695, %v1037_v31  ;;  %v3242_v39 = vmul.f32 -1.442695, %v1038_v17  ;;  %v1022_v45 = vpop.f32.mrf.mxu0  ;;  %v1035_v43 = vpop.f32.mrf.mxu1 }
 0x23d   :  { %3612 = vpow2.f32 %v3241_v2  ;;  %v1039_v2 = vadd.f32 %v1020_v47, %v4607_v24 }
 0x23e   :  { %v3611_v55 = vpop.eup %3610  ;;  %3614 = vpow2.f32 %v3242_v39 }
 0x23f   :  { %v1083_v40 = vadd.f32 1.0, %v3611_v55 }
 0x240   :  { %v996_v63 = vpop.f32.mrf.mxu2  ;;  %v1009_v56 = vpop.f32.mrf.mxu3 }
 0x241   :  { %3616 = vrcp.f32 %v1083_v40  ;;  %vm1089_vm9 = vweird.f32 %v1083_v40 }
 0x243   :  { %v3613_v20 = vpop.eup %3612 }
 0x244   :  { %v3615_v53 = vpop.eup %3614  ;;  %v1044_v13 = vadd.f32 1.0, %v3613_v20 }
 0x245   :  { %v1063_v0 = vadd.f32 1.0, %v3615_v53 }
 0x246   :  { %3618 = vrcp.f32 %v1044_v13  ;;  %v1056_v63 = vand.u32 2147483648, %v1044_v13  ;;  %v1054_v53 = vand.u32 2147483647, %v1044_v13  ;;  %vm1050_vm2 = vweird.f32 %v1044_v13 }
 0x247   :  { %3620 = vrcp.f32 %v1063_v0  ;;  %v3617_v25 = vpop.eup %3616  ;;  %v1075_v15 = vand.u32 2147483648, %v1063_v0  ;;  %v1073_v51 = vand.u32 2147483647, %v1063_v0  ;;  %vm1069_vm4 = vweird.f32 %v1063_v0 }
 0x248   :  { %v1085_v17 = vmul.f32 %v3617_v25, %v1083_v40  ;;  %3622 = vtanh.f32 %v1039_v2  ;;  %v1057_v5 = vor.u32 1.1754944e-38, %v1056_v63  ;;  %vm1055_vm5 = vcmp.eq.f32.partialorder %v1054_v53, 8.507059e+37 }
 0x249   :  { %vm1074_vm7 = vcmp.eq.f32.partialorder %v1073_v51, 8.507059e+37  ;;  %vm1090_vm8 = vweird.f32 %v3617_v25 }
 0x24a   :  { %v1086_v47 = vsub.f32 1.0, %v1085_v17  ;;  %vm1091_vm10 = vmor %vm1089_vm9, %vm1090_vm8 }
 0x24c   :  { %v3619_v45 = vpop.eup %3618  ;;  %v1087_v18 = vmul.f32 %v3617_v25, %v1086_v47 }
 0x24d   :  { %v3621_v43 = vpop.eup %3620  ;;  %v1046_v39 = vmul.f32 %v3619_v45, %v1044_v13  ;;  %vm1051_vm0 = vweird.f32 %v3619_v45 }
 0x24e   :  { %v1065_v31 = vmul.f32 %v3621_v43, %v1063_v0  ;;  %vm1070_vm1 = vweird.f32 %v3621_v43  ;;  %vm1052_vm3 = vmor %vm1050_vm2, %vm1051_vm0  ;;  %v1088_v13 = vadd.f32 %v3617_v25, %v1087_v18 }
 0x24f   :  { %v1047_v55 = vsub.f32 1.0, %v1046_v39  ;;  %vm1071_vm6 = vmor %vm1069_vm4, %vm1070_vm1 }
 0x250   :  { %v1066_v20 = vsub.f32 1.0, %v1065_v31  ;;  %v1076_v31 = vor.u32 1.1754944e-38, %v1075_v15  ;;  %v1092_v15 = vsel %vm1091_vm10, %v3617_v25, %v1088_v13 }
 0x251   :  { %v1048_v56 = vmul.f32 %v3619_v45, %v1047_v55  ;;  %v3623_v55 = vpop.eup %3622 }
 0x252   :  { %v1067_v28 = vmul.f32 %v3621_v43, %v1066_v20  ;;  %v504_v20 = vadd.f32 %v4514_v50, %v317_v32 }
 0x253   :  { %v1049_v60 = vadd.f32 %v3619_v45, %v1048_v56 }
 0x254   :  { %v1068_v39 = vadd.f32 %v3621_v43, %v1067_v28  ;;  %v1095_v28 = vand.u32 2147483648, %v1083_v40 }
 0x255   :  { %v1053_v2 = vsel %vm1052_vm3, %v3619_v45, %v1049_v60  ;;  %v1093_v60 = vand.u32 2147483647, %v1083_v40 }
 0x256   :  { %v1058_v61 = vsel %vm1055_vm5, %v1057_v5, %v1053_v2  ;;  %v1072_v7 = vsel %vm1071_vm6, %v3621_v43, %v1068_v39  ;;  %v1096_v0 = vor.u32 1.1754944e-38, %v1095_v28 }
 0x257   :  { %v1100_v22 = vmul.f32 %v3623_v55, %v1058_v61  ;;  %v1077_v27 = vsel %vm1074_vm7, %v1076_v31, %v1072_v7  ;;  %vm1094_vm11 = vcmp.eq.f32.partialorder %v1093_v60, 8.507059e+37 }
 0x258   :  { %v1099_v17 = vmul.f32 %v1077_v27, %v504_v20  ;;  %v1097_v5 = vsel %vm1094_vm11, %v1096_v0, %v1092_v15 }
 0x25a   :  { %v4614_v56 = vadd.f32 %v1100_v22, %v1099_v17 }
 0x25c   :  { %3624 = vtanh.f32 %v4614_v56 }
 0x262   :  { %v3625_v50 = vpop.eup %3624 }
 0x263   :  { %v1103_v32 = vmul.f32 %v3625_v50, %v1097_v5 }
 0x265   :  { %1104 = vst [vmem:[#allocation2 + $0x10] sm:$0xf] %v1103_v32  ;;  %v1105_v61 = vpack.c.bf16 %v1103_v32, %v1103_v32 }
 0x267   :  { %1114 = vmatmul.bf16.vlgmr.msrb.gmra.mxu2 %v1105_v61  ;;  %1127 = vmatmul.bf16.vlgmr.msrb.gmra.mxu3 %v1105_v61 }
 0x268   :  { %1140 = vmatmul.bf16.vlgmr.msra.gmra.mxu0 %v1105_v61  ;;  %1153 = vmatmul.bf16.vlgmr.msra.gmra.mxu1 %v1105_v61 }
 0x269   :  { %1369 = vmatpush.bf16.msrb.mxu2 %v4152_v30  ;;  %1382 = vmatpush.bf16.msrb.mxu3 %v4157_v33 }
 0x26a   :  { %1395 = vmatpush.bf16.msra.mxu0 %v4189_v48  ;;  %1408 = vmatpush.bf16.msra.mxu1 %v4364_v58 }
 0x26d   :  { %1370 = vmatpush.bf16.msrb.mxu2 %v4180_v42  ;;  %1383 = vmatpush.bf16.msrb.mxu3 %v4191_v49 }
 0x26e   :  { %1396 = vmatpush.bf16.msra.mxu0 %v4229_v1  ;;  %1409 = vmatpush.bf16.msra.mxu1 %v4387_v4 }
 0x271   :  { %1371 = vmatpush.bf16.msrb.mxu2 %v4213_v57  ;;  %1384 = vmatpush.bf16.msrb.mxu3 %v4231_v3 }
 0x272   :  { %1397 = vmatpush.bf16.msra.mxu0 %v4257_v12  ;;  %1410 = vmatpush.bf16.msra.mxu1 %v4402_v9 }
 0x275   :  { %1372 = vmatpush.bf16.msrb.mxu2 %v4241_v6  ;;  %1385 = vmatpush.bf16.msrb.mxu3 %v4262_v14 }
 0x276   :  { %1398 = vmatpush.bf16.msra.mxu0 %v4296_v26  ;;  %1411 = vmatpush.bf16.msra.mxu1 %v4412_v38 }
 0x279   :  { %1373 = vmatpush.bf16.msrb.mxu2 %v4280_v21  ;;  %1386 = vmatpush.bf16.msrb.mxu3 %v4317_v35 }
 0x27a   :  { %1399 = vmatpush.bf16.msra.mxu0 %v4334_v44  ;;  %1412 = vmatpush.bf16.msra.mxu1 %v4421_v16 }
 0x27d   :  { %1374 = vmatpush.bf16.msrb.mxu2 %v4319_v36  ;;  %1387 = vmatpush.bf16.msrb.mxu3 %v4354_v52 }
 0x27e   :  { %1400 = vmatpush.bf16.msra.mxu0 %v4367_v59  ;;  %1413 = vmatpush.bf16.msra.mxu1 %v4430_v19 }
 0x281   :  { %1375 = vmatpush.bf16.msrb.mxu2 %v4356_v54  ;;  %1388 = vmatpush.bf16.msrb.mxu3 %v4377_v62 }
 0x282   :  { %1401 = vmatpush.bf16.msra.mxu0 %v4396_v8  ;;  %1414 = vmatpush.bf16.msra.mxu1 %v4440_v23 }
 0x285   :  { %1376 = vmatpush.bf16.msrb.mxu2 %v4452_v29  ;;  %1389 = vmatpush.bf16.msrb.mxu3 %v4463_v34 }
 0x286   :  { %1402 = vmatpush.bf16.msra.mxu0 %v4465_v37  ;;  %1415 = vmatpush.bf16.msra.mxu1 %v4474_v41 }
 0x2e5   :  { %v1141_v7 = vpop.f32.mrf.mxu0  ;;  %v1154_v18 = vpop.f32.mrf.mxu1 }
 0x2e6   :  { %v1165_v22 = vrot.slane %v1154_v18, 4 }
 0x2e8   :  { %v1173_v27 = vadd.f32 %v1165_v22, %v4593_v46 }
 0x2ea   :  { %v3246_v40 = vmul.f32 -1.442695, %v1173_v27  ;;  %v1115_v25 = vpop.f32.mrf.mxu2  ;;  %v1128_v45 = vpop.f32.mrf.mxu3 }
 0x2eb   :  { %v1162_v43 = vrot.slane %v1115_v25, 4  ;;  %v1163_v63 = vrot.slane %v1128_v45, 4 }
 0x2ec   :  { %3626 = vpow2.f32 %v3246_v40 }
 0x2ed   :  { %v1170_v53 = vadd.f32 %v1162_v43, %v4597_v10  ;;  %v1171_v51 = vadd.f32 %v1163_v63, %v4601_v11  ;;  %v1143_v47 = vpop.f32.mrf.mxu0  ;;  %v1156_v39 = vpop.f32.mrf.mxu1  ;;  %v1164_v10 = vrot.slane %v1141_v7, 4 }
 0x2ef   :  { %v3244_v2 = vmul.f32 -1.442695, %v1170_v53  ;;  %v3245_v31 = vmul.f32 -1.442695, %v1171_v51  ;;  %v1172_v50 = vadd.f32 %v1164_v10, %v4607_v24 }
 0x2f1   :  { %3628 = vpow2.f32 %v3244_v2 }
 0x2f2   :  { %v3627_v55 = vpop.eup %3626  ;;  %3630 = vpow2.f32 %v3245_v31  ;;  %v1117_v20 = vpop.f32.mrf.mxu2 }
 0x2f3   :  { %v1130_v17 = vpop.f32.mrf.mxu3  ;;  %v1216_v46 = vadd.f32 1.0, %v3627_v55  ;;  %v1233_v55 = vrot.slane %v4614_v56, 4 }
 0x2f5   :  { %3632 = vrcp.f32 %v1216_v46  ;;  %vm1222_vm5 = vweird.f32 %v1216_v46 }
 0x2f7   :  { %v3629_v13 = vpop.eup %3628 }
 0x2f8   :  { %v3631_v28 = vpop.eup %3630  ;;  %v1177_v60 = vadd.f32 1.0, %v3629_v13 }
 0x2f9   :  { %v1196_v15 = vadd.f32 1.0, %v3631_v28 }
 0x2fa   :  { %3634 = vrcp.f32 %v1177_v60  ;;  %v1189_v27 = vand.u32 2147483648, %v1177_v60  ;;  %v1187_v45 = vand.u32 2147483647, %v1177_v60  ;;  %vm1183_vm14 = vweird.f32 %v1177_v60 }
 0x2fb   :  { %3636 = vrcp.f32 %v1196_v15  ;;  %v3633_v0 = vpop.eup %3632  ;;  %v1208_v43 = vand.u32 2147483648, %v1196_v15  ;;  %v1206_v53 = vand.u32 2147483647, %v1196_v15  ;;  %vm1202_vm0 = vweird.f32 %v1196_v15 }
 0x2fc   :  { %v1218_v18 = vmul.f32 %v3633_v0, %v1216_v46  ;;  %3638 = vtanh.f32 %v1172_v50  ;;  %v1190_v24 = vor.u32 1.1754944e-38, %v1189_v27  ;;  %vm1188_vm1 = vcmp.eq.f32.partialorder %v1187_v45, 8.507059e+37 }
 0x2fd   :  { %v1209_v2 = vor.u32 1.1754944e-38, %v1208_v43  ;;  %vm1207_vm3 = vcmp.eq.f32.partialorder %v1206_v53, 8.507059e+37  ;;  %vm1223_vm4 = vweird.f32 %v3633_v0  ;;  %v5146_v53 = vld [vmem:[#allocation10_spill] sm:$0xff] }
 0x2fe   :  { %v1219_v7 = vsub.f32 1.0, %v1218_v18  ;;  %vm1224_vm6 = vmor %vm1222_vm5, %vm1223_vm4 }
 0x300   :  { %v3635_v11 = vpop.eup %3634  ;;  %v1220_v28 = vmul.f32 %v3633_v0, %v1219_v7 }
 0x301   :  { %v3637_v5 = vpop.eup %3636  ;;  %v1179_v32 = vmul.f32 %v3635_v11, %v1177_v60  ;;  %vm1184_vm12 = vweird.f32 %v3635_v11 }
 0x302   :  { %v1198_v61 = vmul.f32 %v3637_v5, %v1196_v15  ;;  %vm1203_vm13 = vweird.f32 %v3637_v5  ;;  %vm1185_vm15 = vmor %vm1183_vm14, %vm1184_vm12  ;;  %v3639_v31 = vpop.eup %3638  ;;  %v1221_v60 = vadd.f32 %v3633_v0, %v1220_v28  ;;  %v1226_v15 = vand.u32 2147483647, %v1216_v46 }
 0x303   :  { %v1180_v22 = vsub.f32 1.0, %v1179_v32  ;;  %vm1204_vm2 = vmor %vm1202_vm0, %vm1203_vm13 }
 0x304   :  { %v1199_v40 = vsub.f32 1.0, %v1198_v61  ;;  %v1228_v61 = vand.u32 2147483648, %v1216_v46  ;;  %vm1227_vm7 = vcmp.eq.f32.partialorder %v1226_v15, 8.507059e+37 }
 0x305   :  { %v1181_v25 = vmul.f32 %v3635_v11, %v1180_v22 }
 0x306   :  { %v1200_v63 = vmul.f32 %v3637_v5, %v1199_v40  ;;  %v1229_v18 = vor.u32 1.1754944e-38, %v1228_v61 }
 0x307   :  { %v1182_v51 = vadd.f32 %v3635_v11, %v1181_v25  ;;  %v5144_v25 = vld [vmem:[#allocation13_spill] sm:$0xff] }
 0x308   :  { %v1201_v47 = vadd.f32 %v3637_v5, %v1200_v63  ;;  %v5145_v63 = vld [vmem:[#allocation12_spill] sm:$0xff] }
 0x309   :  { %v1186_v39 = vsel %vm1185_vm15, %v3635_v11, %v1182_v51  ;;  %v1225_v11 = vsel %vm1224_vm6, %v3633_v0, %v1221_v60  ;;  %v4692_v7 = vadd.f32 %v5146_v53, %v5145_v63  ;;  %v5147_v51 = vld [vmem:[#allocation7_spill] sm:$0xff] }
 0x30a   :  { %v1191_v20 = vsel %vm1188_vm1, %v1190_v24, %v1186_v39  ;;  %v1205_v17 = vsel %vm1204_vm2, %v3637_v5, %v1201_v47  ;;  %v1230_v5 = vsel %vm1227_vm7, %v1229_v18, %v1225_v11  ;;  %v5148_v24 = vld [vmem:[#allocation5_spill] sm:$0xff] }
 0x30b   :  { %v1210_v13 = vsel %vm1207_vm3, %v1209_v2, %v1205_v17  ;;  %v1236_v10 = vmul.f32 %v3639_v31, %v1191_v20  ;;  %v4696_v47 = vadd.f32 %v5148_v24, %v5147_v51 }
 0x30c   :  { %v1235_v50 = vmul.f32 %v1233_v55, %v1210_v13 }
 0x30e   :  { %v4654_v32 = vadd.f32 %v1236_v10, %v1235_v50 }
 0x310   :  { %3640 = vtanh.f32 %v4654_v32 }
 0x316   :  { %v3641_v56 = vpop.eup %3640 }
 0x317   :  { %v1239_v22 = vmul.f32 %v3641_v56, %v1230_v5  ;;  %v5149_v5 = vld [vmem:[#allocation6_spill] sm:$0xff] }
 0x319   :  { %1240 = vst [vmem:[#allocation2 + $0x10] sm:$0xf0] %v1239_v22  ;;  %v1241_v27 = vpack.c.bf16 %v1239_v22, %v1239_v22  ;;  %v5150_v22 = vld [vmem:[#allocation4_spill] sm:$0xff] }
 0x31b   :  { %v1243_v40 = vrot.slane %v1241_v27, 2  ;;  %v4702_v27 = vadd.f32 %v5150_v22, %v5149_v5 }
 0x31d   :  { %1253 = vmatmul.bf16.vlgmr.msra.gmra.mxu2 %v1243_v40  ;;  %1266 = vmatmul.bf16.vlgmr.msra.gmra.mxu3 %v1243_v40 }
 0x31e   :  { %1279 = vmatmul.bf16.vlgmr.msrb.gmra.mxu0 %v1243_v40  ;;  %1292 = vmatmul.bf16.vlgmr.msrb.gmra.mxu1 %v1243_v40 }
 0x31f   :  { %1508 = vmatpush.bf16.msra.mxu2 %v4152_v30  ;;  %1521 = vmatpush.bf16.msra.mxu3 %v4157_v33 }
 0x320   :  { %1534 = vmatpush.bf16.msrb.mxu0 %v4189_v48  ;;  %1547 = vmatpush.bf16.msrb.mxu1 %v4364_v58 }
 0x323   :  { %1509 = vmatpush.bf16.msra.mxu2 %v4180_v42  ;;  %1522 = vmatpush.bf16.msra.mxu3 %v4191_v49 }
 0x324   :  { %1535 = vmatpush.bf16.msrb.mxu0 %v4229_v1  ;;  %1548 = vmatpush.bf16.msrb.mxu1 %v4387_v4 }
 0x327   :  { %1510 = vmatpush.bf16.msra.mxu2 %v4213_v57  ;;  %1523 = vmatpush.bf16.msra.mxu3 %v4231_v3 }
 0x328   :  { %1536 = vmatpush.bf16.msrb.mxu0 %v4257_v12  ;;  %1549 = vmatpush.bf16.msrb.mxu1 %v4402_v9 }
 0x32b   :  { %1511 = vmatpush.bf16.msra.mxu2 %v4241_v6  ;;  %1524 = vmatpush.bf16.msra.mxu3 %v4262_v14 }
 0x32c   :  { %1537 = vmatpush.bf16.msrb.mxu0 %v4296_v26  ;;  %1550 = vmatpush.bf16.msrb.mxu1 %v4412_v38 }
 0x32f   :  { %1512 = vmatpush.bf16.msra.mxu2 %v4280_v21  ;;  %1525 = vmatpush.bf16.msra.mxu3 %v4317_v35 }
 0x330   :  { %1538 = vmatpush.bf16.msrb.mxu0 %v4334_v44  ;;  %1551 = vmatpush.bf16.msrb.mxu1 %v4421_v16 }
 0x333   :  { %1513 = vmatpush.bf16.msra.mxu2 %v4319_v36  ;;  %1526 = vmatpush.bf16.msra.mxu3 %v4354_v52 }
 0x334   :  { %1539 = vmatpush.bf16.msrb.mxu0 %v4367_v59  ;;  %1552 = vmatpush.bf16.msrb.mxu1 %v4430_v19 }
 0x337   :  { %1514 = vmatpush.bf16.msra.mxu2 %v4356_v54  ;;  %1527 = vmatpush.bf16.msra.mxu3 %v4377_v62 }
 0x338   :  { %1540 = vmatpush.bf16.msrb.mxu0 %v4396_v8  ;;  %1553 = vmatpush.bf16.msrb.mxu1 %v4440_v23 }
 0x33b   :  { %1515 = vmatpush.bf16.msra.mxu2 %v4452_v29  ;;  %1528 = vmatpush.bf16.msra.mxu3 %v4463_v34 }
 0x33c   :  { %1541 = vmatpush.bf16.msrb.mxu0 %v4465_v37  ;;  %1554 = vmatpush.bf16.msrb.mxu1 %v4474_v41 }
 0x39b   :  { %v1280_v46 = vpop.f32.mrf.mxu0  ;;  %v1293_v0 = vpop.f32.mrf.mxu1 }
 0x39c   :  { %v1300_v45 = vadd.f32 %v1293_v0, %v5144_v25 }
 0x39e   :  { %v3249_v43 = vmul.f32 -1.442695, %v1300_v45  ;;  %v1299_v45 = vadd.f32 %v1280_v46, %v4702_v27 }
 0x3a0   :  { %3642 = vpow2.f32 %v3249_v43  ;;  %v1254_v39 = vpop.f32.mrf.mxu2  ;;  %v1267_v2 = vpop.f32.mrf.mxu3 }
 0x3a1   :  { %v1297_v31 = vadd.f32 %v1254_v39, %v4692_v7  ;;  %v1298_v55 = vadd.f32 %v1267_v2, %v4696_v47 }
 0x3a3   :  { %v3247_v20 = vmul.f32 -1.442695, %v1297_v31  ;;  %v3248_v17 = vmul.f32 -1.442695, %v1298_v55  ;;  %v1282_v13 = vpop.f32.mrf.mxu0  ;;  %v1295_v28 = vpop.f32.mrf.mxu1 }
 0x3a5   :  { %3644 = vpow2.f32 %v3247_v20 }
 0x3a6   :  { %v3643_v10 = vpop.eup %3642  ;;  %3646 = vpow2.f32 %v3248_v17 }
 0x3a7   :  { %v1343_v61 = vadd.f32 1.0, %v3643_v10 }
 0x3a8   :  { %v1256_v50 = vpop.f32.mrf.mxu2  ;;  %v1269_v60 = vpop.f32.mrf.mxu3 }
 0x3a9   :  { %3648 = vrcp.f32 %v1343_v61  ;;  %vm1349_vm1 = vweird.f32 %v1343_v61 }
 0x3ab   :  { %v3645_v15 = vpop.eup %3644 }
 0x3ac   :  { %v3647_v11 = vpop.eup %3646  ;;  %v1304_v18 = vadd.f32 1.0, %v3645_v15 }
 0x3ad   :  { %v1323_v56 = vadd.f32 1.0, %v3647_v11 }
 0x3ae   :  { %3650 = vrcp.f32 %v1304_v18  ;;  %v1316_v31 = vand.u32 2147483648, %v1304_v18  ;;  %v1314_v17 = vand.u32 2147483647, %v1304_v18  ;;  %vm1310_vm10 = vweird.f32 %v1304_v18 }
 0x3af   :  { %3652 = vrcp.f32 %v1323_v56  ;;  %v3649_v40 = vpop.eup %3648  ;;  %v1335_v13 = vand.u32 2147483648, %v1323_v56  ;;  %v1333_v10 = vand.u32 2147483647, %v1323_v56  ;;  %vm1329_vm12 = vweird.f32 %v1323_v56 }
 0x3b0   :  { %v1345_v39 = vmul.f32 %v3649_v40, %v1343_v61  ;;  %3654 = vtanh.f32 %v1299_v45  ;;  %v1317_v46 = vor.u32 1.1754944e-38, %v1316_v31  ;;  %vm1315_vm13 = vcmp.eq.f32.partialorder %v1314_v17, 8.507059e+37 }
 0x3b1   :  { %v1336_v22 = vor.u32 1.1754944e-38, %v1335_v13  ;;  %vm1334_vm15 = vcmp.eq.f32.partialorder %v1333_v10, 8.507059e+37  ;;  %vm1350_vm0 = vweird.f32 %v3649_v40  ;;  %v1355_v31 = vand.u32 2147483648, %v1343_v61 }
 0x3b2   :  { %v1346_v50 = vsub.f32 1.0, %v1345_v39  ;;  %vm1351_vm2 = vmor %vm1349_vm1, %vm1350_vm0 }
 0x3b3   :  { %v1356_v17 = vor.u32 1.1754944e-38, %v1355_v31 }
 0x3b4   :  { %v3651_v0 = vpop.eup %3650 }
 0x3b5   :  { %v3653_v43 = vpop.eup %3652  ;;  %v1306_v53 = vmul.f32 %v3651_v0, %v1304_v18  ;;  %vm1311_vm8 = vweird.f32 %v3651_v0 }
 0x3b6   :  { %v1325_v24 = vmul.f32 %v3653_v43, %v1323_v56  ;;  %vm1330_vm9 = vweird.f32 %v3653_v43  ;;  %vm1312_vm11 = vmor %vm1310_vm10, %vm1311_vm8  ;;  %v3655_v45 = vpop.eup %3654  ;;  %v1353_v56 = vand.u32 2147483647, %v1343_v61 }
 0x3b7   :  { %v1307_v2 = vsub.f32 1.0, %v1306_v53  ;;  %vm1331_vm14 = vmor %vm1329_vm12, %vm1330_vm9  ;;  %v1360_v53 = vrot.slane %v4654_v32, 4 }
 0x3b8   :  { %v1326_v55 = vsub.f32 1.0, %v1325_v24  ;;  %vm1354_vm3 = vcmp.eq.f32.partialorder %v1353_v56, 8.507059e+37 }
 0x3b9   :  { %v1308_v20 = vmul.f32 %v3651_v0, %v1307_v2 }
 0x3ba   :  { %v1327_v28 = vmul.f32 %v3653_v43, %v1326_v55  ;;  %v1347_v55 = vmul.f32 %v3649_v40, %v1346_v50 }
 0x3bb   :  { %v1309_v60 = vadd.f32 %v3651_v0, %v1308_v20 }
 0x3bc   :  { %v1328_v15 = vadd.f32 %v3653_v43, %v1327_v28  ;;  %v1348_v18 = vadd.f32 %v3649_v40, %v1347_v55 }
 0x3bd   :  { %v1313_v11 = vsel %vm1312_vm11, %v3651_v0, %v1309_v60 }
 0x3be   :  { %v1318_v24 = vsel %vm1315_vm13, %v1317_v46, %v1313_v11  ;;  %v1332_v2 = vsel %vm1331_vm14, %v3653_v43, %v1328_v15  ;;  %v1352_v0 = vsel %vm1351_vm2, %v3649_v40, %v1348_v18 }
 0x3bf   :  { %v1363_v5 = vmul.f32 %v3655_v45, %v1318_v24  ;;  %v1337_v51 = vsel %vm1334_vm15, %v1336_v22, %v1332_v2  ;;  %v1357_v43 = vsel %vm1354_vm3, %v1356_v17, %v1352_v0 }
 0x3c0   :  { %v1362_v39 = vmul.f32 %v1360_v53, %v1337_v51 }
 0x3c2   :  { %v4706_v20 = vadd.f32 %v1363_v5, %v1362_v39 }
 0x3c4   :  { %3656 = vtanh.f32 %v4706_v20 }
 0x3ca   :  { %v3657_v32 = vpop.eup %3656 }
 0x3cb   :  { %v1366_v13 = vmul.f32 %v3657_v32, %v1357_v43 }
 0x3cd   :  { %1367 = vst [vmem:[#allocation2] sm:$0xf] %v1366_v13  ;;  %v1368_v28 = vpack.c.bf16 %v1366_v13, %v1366_v13 }
 0x3cf   :  { %1377 = vmatmul.bf16.vlgmr.msrb.gmra.mxu2 %v1368_v28  ;;  %1390 = vmatmul.bf16.vlgmr.msrb.gmra.mxu3 %v1368_v28 }
 0x3d0   :  { %1403 = vmatmul.bf16.vlgmr.msra.gmra.mxu0 %v1368_v28  ;;  %1416 = vmatmul.bf16.vlgmr.msra.gmra.mxu1 %v1368_v28 }
 0x3d1   :  { %1632 = vmatpush.bf16.msrb.mxu2 %v4152_v30  ;;  %1645 = vmatpush.bf16.msrb.mxu3 %v4157_v33 }
 0x3d2   :  { %1658 = vmatpush.bf16.msra.mxu0 %v4189_v48  ;;  %1671 = vmatpush.bf16.msra.mxu1 %v4364_v58 }
 0x3d5   :  { %1633 = vmatpush.bf16.msrb.mxu2 %v4180_v42  ;;  %1646 = vmatpush.bf16.msrb.mxu3 %v4191_v49 }
 0x3d6   :  { %1659 = vmatpush.bf16.msra.mxu0 %v4229_v1  ;;  %1672 = vmatpush.bf16.msra.mxu1 %v4387_v4 }
 0x3d9   :  { %1634 = vmatpush.bf16.msrb.mxu2 %v4213_v57  ;;  %1647 = vmatpush.bf16.msrb.mxu3 %v4231_v3 }
 0x3da   :  { %1660 = vmatpush.bf16.msra.mxu0 %v4257_v12  ;;  %1673 = vmatpush.bf16.msra.mxu1 %v4402_v9 }
 0x3dd   :  { %1635 = vmatpush.bf16.msrb.mxu2 %v4241_v6  ;;  %1648 = vmatpush.bf16.msrb.mxu3 %v4262_v14 }
 0x3de   :  { %1661 = vmatpush.bf16.msra.mxu0 %v4296_v26  ;;  %1674 = vmatpush.bf16.msra.mxu1 %v4412_v38 }
 0x3e1   :  { %1636 = vmatpush.bf16.msrb.mxu2 %v4280_v21  ;;  %1649 = vmatpush.bf16.msrb.mxu3 %v4317_v35 }
 0x3e2   :  { %1662 = vmatpush.bf16.msra.mxu0 %v4334_v44  ;;  %1675 = vmatpush.bf16.msra.mxu1 %v4421_v16 }
 0x3e5   :  { %1637 = vmatpush.bf16.msrb.mxu2 %v4319_v36  ;;  %1650 = vmatpush.bf16.msrb.mxu3 %v4354_v52 }
 0x3e6   :  { %1663 = vmatpush.bf16.msra.mxu0 %v4367_v59  ;;  %1676 = vmatpush.bf16.msra.mxu1 %v4430_v19 }
 0x3e9   :  { %1638 = vmatpush.bf16.msrb.mxu2 %v4356_v54  ;;  %1651 = vmatpush.bf16.msrb.mxu3 %v4377_v62 }
 0x3ea   :  { %1664 = vmatpush.bf16.msra.mxu0 %v4396_v8  ;;  %1677 = vmatpush.bf16.msra.mxu1 %v4440_v23 }
 0x3ed   :  { %1639 = vmatpush.bf16.msrb.mxu2 %v4452_v29  ;;  %1652 = vmatpush.bf16.msrb.mxu3 %v4463_v34 }
 0x3ee   :  { %1665 = vmatpush.bf16.msra.mxu0 %v4465_v37  ;;  %1678 = vmatpush.bf16.msra.mxu1 %v4474_v41 }
 0x44d   :  { %v1404_v51 = vpop.f32.mrf.mxu0  ;;  %v1417_v61 = vpop.f32.mrf.mxu1 }
 0x44e   :  { %v1428_v5 = vrot.slane %v1417_v61, 4 }
 0x450   :  { %v1436_v40 = vadd.f32 %v1428_v5, %v5144_v25 }
 0x452   :  { %v3252_v10 = vmul.f32 -1.442695, %v1436_v40  ;;  %v1378_v50 = vpop.f32.mrf.mxu2  ;;  %v1391_v60 = vpop.f32.mrf.mxu3 }
 0x453   :  { %v1425_v46 = vrot.slane %v1378_v50, 4  ;;  %v1426_v15 = vrot.slane %v1391_v60, 4 }
 0x454   :  { %3658 = vpow2.f32 %v3252_v10 }
 0x455   :  { %v1433_v11 = vadd.f32 %v1425_v46, %v4692_v7  ;;  %v1434_v22 = vadd.f32 %v1426_v15, %v4696_v47  ;;  %v1406_v45 = vpop.f32.mrf.mxu0  ;;  %v1419_v53 = vpop.f32.mrf.mxu1  ;;  %v1427_v7 = vrot.slane %v1404_v51, 4 }
 0x457   :  { %v3250_v24 = vmul.f32 -1.442695, %v1433_v11  ;;  %v3251_v2 = vmul.f32 -1.442695, %v1434_v22  ;;  %v1435_v43 = vadd.f32 %v1427_v7, %v4702_v27 }
 0x459   :  { %3660 = vpow2.f32 %v3250_v24 }
 0x45a   :  { %v3659_v55 = vpop.eup %3658  ;;  %3662 = vpow2.f32 %v3251_v2  ;;  %v1380_v39 = vpop.f32.mrf.mxu2 }
 0x45b   :  { %v1393_v18 = vpop.f32.mrf.mxu3  ;;  %v1479_v25 = vadd.f32 1.0, %v3659_v55  ;;  %v1496_v39 = vrot.slane %v4706_v20, 4 }
 0x45d   :  { %3664 = vrcp.f32 %v1479_v25  ;;  %vm1485_vm13 = vweird.f32 %v1479_v25 }
 0x45f   :  { %v3661_v31 = vpop.eup %3660 }
 0x460   :  { %v3663_v56 = vpop.eup %3662  ;;  %v1440_v0 = vadd.f32 1.0, %v3661_v31 }
 0x461   :  { %v1459_v17 = vadd.f32 1.0, %v3663_v56 }
 0x462   :  { %3666 = vrcp.f32 %v1440_v0  ;;  %v1452_v10 = vand.u32 2147483648, %v1440_v0  ;;  %v1450_v46 = vand.u32 2147483647, %v1440_v0  ;;  %vm1446_vm6 = vweird.f32 %v1440_v0 }
 0x463   :  { %3668 = vrcp.f32 %v1459_v17  ;;  %v3665_v32 = vpop.eup %3664  ;;  %v1471_v15 = vand.u32 2147483648, %v1459_v17  ;;  %v1469_v22 = vand.u32 2147483647, %v1459_v17  ;;  %vm1465_vm8 = vweird.f32 %v1459_v17 }
 0x464   :  { %v1481_v5 = vmul.f32 %v3665_v32, %v1479_v25  ;;  %3670 = vtanh.f32 %v1435_v43  ;;  %v1453_v27 = vor.u32 1.1754944e-38, %v1452_v10  ;;  %vm1451_vm9 = vcmp.eq.f32.partialorder %v1450_v46, 8.507059e+37  ;;  %v5151_v46 = vld [vmem:[#allocation15_spill] sm:$0xff] }
 0x465   :  { %v1472_v2 = vor.u32 1.1754944e-38, %v1471_v15  ;;  %vm1470_vm11 = vcmp.eq.f32.partialorder %v1469_v22, 8.507059e+37  ;;  %vm1486_vm12 = vweird.f32 %v3665_v32 }
 0x466   :  { %v1482_v51 = vsub.f32 1.0, %v1481_v5  ;;  %v1491_v5 = vand.u32 2147483648, %v1479_v25  ;;  %vm1487_vm14 = vmor %vm1485_vm13, %vm1486_vm12 }
 0x468   :  { %v3667_v47 = vpop.eup %3666  ;;  %v1483_v7 = vmul.f32 %v3665_v32, %v1482_v51 }
 0x469   :  { %v3669_v13 = vpop.eup %3668  ;;  %v1442_v28 = vmul.f32 %v3667_v47, %v1440_v0  ;;  %vm1447_vm4 = vweird.f32 %v3667_v47 }
 0x46a   :  { %v1461_v61 = vmul.f32 %v3669_v13, %v1459_v17  ;;  %vm1466_vm5 = vweird.f32 %v3669_v13  ;;  %vm1448_vm7 = vmor %vm1446_vm6, %vm1447_vm4  ;;  %v3671_v55 = vpop.eup %3670  ;;  %v1484_v0 = vadd.f32 %v3665_v32, %v1483_v7  ;;  %v1489_v17 = vand.u32 2147483647, %v1479_v25 }
 0x46b   :  { %v1443_v40 = vsub.f32 1.0, %v1442_v28  ;;  %vm1467_vm10 = vmor %vm1465_vm8, %vm1466_vm5 }
 0x46c   :  { %v1462_v50 = vsub.f32 1.0, %v1461_v61  ;;  %vm1490_vm15 = vcmp.eq.f32.partialorder %v1489_v17, 8.507059e+37 }
 0x46d   :  { %v1444_v60 = vmul.f32 %v3667_v47, %v1443_v40  ;;  %v1492_v40 = vor.u32 1.1754944e-38, %v1491_v5 }
 0x46e   :  { %v1463_v11 = vmul.f32 %v3669_v13, %v1462_v50 }
 0x46f   :  { %v1445_v45 = vadd.f32 %v3667_v47, %v1444_v60 }
 0x470   :  { %v1464_v53 = vadd.f32 %v3669_v13, %v1463_v11 }
 0x471   :  { %v1449_v24 = vsel %vm1448_vm7, %v3667_v47, %v1445_v45  ;;  %v1488_v47 = vsel %vm1487_vm14, %v3665_v32, %v1484_v0  ;;  %v5152_v45 = vld [vmem:[#allocation14_spill] sm:$0xff] }
 0x472   :  { %v1454_v18 = vsel %vm1451_vm9, %v1453_v27, %v1449_v24  ;;  %v1468_v31 = vsel %vm1467_vm10, %v3669_v13, %v1464_v53  ;;  %v1493_v13 = vsel %vm1490_vm15, %v1492_v40, %v1488_v47  ;;  %v5153_v53 = vld [vmem:[#allocation9_spill] sm:$0xff] }
 0x473   :  { %v1473_v56 = vsel %vm1470_vm11, %v1472_v2, %v1468_v31  ;;  %v1499_v43 = vmul.f32 %v3671_v55, %v1454_v18 }
 0x474   :  { %v1498_v28 = vmul.f32 %v1496_v39, %v1473_v56 }
 0x476   :  { %v4746_v61 = vadd.f32 %v1499_v43, %v1498_v28 }
 0x478   :  { %3672 = vtanh.f32 %v4746_v61 }
 0x47e   :  { %v3673_v20 = vpop.eup %3672 }
 0x47f   :  { %v1502_v10 = vmul.f32 %v3673_v20, %v1493_v13  ;;  %v5154_v20 = vld [vmem:[#allocation8_spill] sm:$0xff] }
 0x481   :  { %1503 = vst [vmem:[#allocation2] sm:$0xf0] %v1502_v10  ;;  %v1504_v50 = vpack.c.bf16 %v1502_v10, %v1502_v10 }
 0x483   :  { %v1506_v60 = vrot.slane %v1504_v50, 2 }
 0x485   :  { %1516 = vmatmul.bf16.vlgmr.msra.gmra.mxu2 %v1506_v60  ;;  %1529 = vmatmul.bf16.vlgmr.msra.gmra.mxu3 %v1506_v60 }
 0x486   :  { %1542 = vmatmul.bf16.vlgmr.msrb.gmra.mxu0 %v1506_v60  ;;  %1555 = vmatmul.bf16.vlgmr.msrb.gmra.mxu1 %v1506_v60 }
 0x487   :  { %1771 = vmatpush.bf16.msra.mxu2 %v4152_v30  ;;  %1784 = vmatpush.bf16.msra.mxu3 %v4157_v33 }
 0x488   :  { %1797 = vmatpush.bf16.msrb.mxu0 %v4189_v48  ;;  %1810 = vmatpush.bf16.msrb.mxu1 %v4364_v58 }
 0x48b   :  { %1772 = vmatpush.bf16.msra.mxu2 %v4180_v42  ;;  %1785 = vmatpush.bf16.msra.mxu3 %v4191_v49 }
 0x48c   :  { %1798 = vmatpush.bf16.msrb.mxu0 %v4229_v1  ;;  %1811 = vmatpush.bf16.msrb.mxu1 %v4387_v4 }
 0x48f   :  { %1773 = vmatpush.bf16.msra.mxu2 %v4213_v57  ;;  %1786 = vmatpush.bf16.msra.mxu3 %v4231_v3 }
 0x490   :  { %1799 = vmatpush.bf16.msrb.mxu0 %v4257_v12  ;;  %1812 = vmatpush.bf16.msrb.mxu1 %v4402_v9 }
 0x493   :  { %1774 = vmatpush.bf16.msra.mxu2 %v4241_v6  ;;  %1787 = vmatpush.bf16.msra.mxu3 %v4262_v14 }
 0x494   :  { %1800 = vmatpush.bf16.msrb.mxu0 %v4296_v26  ;;  %1813 = vmatpush.bf16.msrb.mxu1 %v4412_v38 }
 0x497   :  { %1775 = vmatpush.bf16.msra.mxu2 %v4280_v21  ;;  %1788 = vmatpush.bf16.msra.mxu3 %v4317_v35 }
 0x498   :  { %1801 = vmatpush.bf16.msrb.mxu0 %v4334_v44  ;;  %1814 = vmatpush.bf16.msrb.mxu1 %v4421_v16 }
 0x49b   :  { %1776 = vmatpush.bf16.msra.mxu2 %v4319_v36  ;;  %1789 = vmatpush.bf16.msra.mxu3 %v4354_v52 }
 0x49c   :  { %1802 = vmatpush.bf16.msrb.mxu0 %v4367_v59  ;;  %1815 = vmatpush.bf16.msrb.mxu1 %v4430_v19 }
 0x49f   :  { %1777 = vmatpush.bf16.msra.mxu2 %v4356_v54  ;;  %1790 = vmatpush.bf16.msra.mxu3 %v4377_v62 }
 0x4a0   :  { %1803 = vmatpush.bf16.msrb.mxu0 %v4396_v8  ;;  %1816 = vmatpush.bf16.msrb.mxu1 %v4440_v23 }
 0x4a3   :  { %1778 = vmatpush.bf16.msra.mxu2 %v4452_v29  ;;  %1791 = vmatpush.bf16.msra.mxu3 %v4463_v34 }
 0x4a4   :  { %1804 = vmatpush.bf16.msrb.mxu0 %v4465_v37  ;;  %1817 = vmatpush.bf16.msrb.mxu1 %v4474_v41 }
 0x503   :  { %v1543_v25 = vpop.f32.mrf.mxu0  ;;  %v1556_v32 = vpop.f32.mrf.mxu1 }
 0x504   :  { %v1563_v15 = vadd.f32 %v1556_v32, %v5151_v46  ;;  %v1562_v13 = vadd.f32 %v1543_v25, %v5154_v20 }
 0x506   :  { %v3255_v11 = vmul.f32 -1.442695, %v1563_v15 }
 0x508   :  { %3674 = vpow2.f32 %v3255_v11  ;;  %v1517_v22 = vpop.f32.mrf.mxu2  ;;  %v1530_v51 = vpop.f32.mrf.mxu3 }
 0x509   :  { %v1560_v27 = vadd.f32 %v1517_v22, %v5152_v45  ;;  %v1561_v24 = vadd.f32 %v1530_v51, %v5153_v53 }
 0x50b   :  { %v3253_v2 = vmul.f32 -1.442695, %v1560_v27  ;;  %v3254_v55 = vmul.f32 -1.442695, %v1561_v24  ;;  %v1545_v39 = vpop.f32.mrf.mxu0  ;;  %v1558_v18 = vpop.f32.mrf.mxu1 }
 0x50d   :  { %3676 = vpow2.f32 %v3253_v2 }
 0x50e   :  { %v3675_v31 = vpop.eup %3674  ;;  %3678 = vpow2.f32 %v3254_v55 }
 0x50f   :  { %v1606_v43 = vadd.f32 1.0, %v3675_v31 }
 0x510   :  { %v1519_v56 = vpop.f32.mrf.mxu2  ;;  %v1532_v7 = vpop.f32.mrf.mxu3 }
 0x511   :  { %3680 = vrcp.f32 %v1606_v43  ;;  %vm1612_vm9 = vweird.f32 %v1606_v43 }
 0x513   :  { %v3677_v28 = vpop.eup %3676 }
 0x514   :  { %v3679_v0 = vpop.eup %3678  ;;  %v1567_v5 = vadd.f32 1.0, %v3677_v28 }
 0x515   :  { %v1586_v17 = vadd.f32 1.0, %v3679_v0  ;;  %v1623_v0 = vrot.slane %v4746_v61, 4 }
 0x516   :  { %3682 = vrcp.f32 %v1567_v5  ;;  %v1579_v11 = vand.u32 2147483648, %v1567_v5  ;;  %v1577_v27 = vand.u32 2147483647, %v1567_v5  ;;  %vm1573_vm2 = vweird.f32 %v1567_v5 }
 0x517   :  { %3684 = vrcp.f32 %v1586_v17  ;;  %v3681_v47 = vpop.eup %3680  ;;  %v1598_v24 = vand.u32 2147483648, %v1586_v17  ;;  %v1596_v55 = vand.u32 2147483647, %v1586_v17  ;;  %vm1592_vm4 = vweird.f32 %v1586_v17 }
 0x518   :  { %v1608_v32 = vmul.f32 %v3681_v47, %v1606_v43  ;;  %3686 = vtanh.f32 %v1562_v13  ;;  %v1580_v25 = vor.u32 1.1754944e-38, %v1579_v11  ;;  %vm1578_vm5 = vcmp.eq.f32.partialorder %v1577_v27, 8.507059e+37 }
 0x519   :  { %v1599_v7 = vor.u32 1.1754944e-38, %v1598_v24  ;;  %vm1597_vm7 = vcmp.eq.f32.partialorder %v1596_v55, 8.507059e+37  ;;  %vm1613_vm8 = vweird.f32 %v3681_v47  ;;  %v1618_v11 = vand.u32 2147483648, %v1606_v43 }
 0x51a   :  { %v1609_v39 = vsub.f32 1.0, %v1608_v32  ;;  %vm1614_vm10 = vmor %vm1612_vm9, %vm1613_vm8 }
 0x51b   :  { %v1619_v27 = vor.u32 1.1754944e-38, %v1618_v11 }
 0x51c   :  { %v3683_v40 = vpop.eup %3682 }
 0x51d   :  { %v3685_v10 = vpop.eup %3684  ;;  %v1569_v50 = vmul.f32 %v3683_v40, %v1567_v5  ;;  %vm1574_vm0 = vweird.f32 %v3683_v40 }
 0x51e   :  { %v1588_v60 = vmul.f32 %v3685_v10, %v1586_v17  ;;  %vm1593_vm1 = vweird.f32 %v3685_v10  ;;  %vm1575_vm3 = vmor %vm1573_vm2, %vm1574_vm0  ;;  %v3687_v28 = vpop.eup %3686  ;;  %v1616_v17 = vand.u32 2147483647, %v1606_v43 }
 0x51f   :  { %v1570_v15 = vsub.f32 1.0, %v1569_v50  ;;  %vm1594_vm6 = vmor %vm1592_vm4, %vm1593_vm1 }
 0x520   :  { %v1589_v22 = vsub.f32 1.0, %v1588_v60  ;;  %v1610_v60 = vmul.f32 %v3681_v47, %v1609_v39  ;;  %vm1617_vm11 = vcmp.eq.f32.partialorder %v1616_v17, 8.507059e+37 }
 0x521   :  { %v1571_v51 = vmul.f32 %v3683_v40, %v1570_v15 }
 0x522   :  { %v1590_v2 = vmul.f32 %v3685_v10, %v1589_v22  ;;  %v1611_v5 = vadd.f32 %v3681_v47, %v1610_v60 }
 0x523   :  { %v1572_v18 = vadd.f32 %v3683_v40, %v1571_v51 }
 0x524   :  { %v1591_v31 = vadd.f32 %v3685_v10, %v1590_v2 }
 0x525   :  { %v1576_v56 = vsel %vm1575_vm3, %v3683_v40, %v1572_v18  ;;  %v1615_v40 = vsel %vm1614_vm10, %v3681_v47, %v1611_v5 }
 0x526   :  { %v1581_v13 = vsel %vm1578_vm5, %v1580_v25, %v1576_v56  ;;  %v1595_v50 = vsel %vm1594_vm6, %v3685_v10, %v1591_v31  ;;  %v1620_v10 = vsel %vm1617_vm11, %v1619_v27, %v1615_v40 }
 0x527   :  { %v1626_v15 = vmul.f32 %v3687_v28, %v1581_v13  ;;  %v1600_v22 = vsel %vm1597_vm7, %v1599_v7, %v1595_v50 }
 0x528   :  { %v1625_v32 = vmul.f32 %v1623_v0, %v1600_v22 }
 0x52a   :  { %v4786_v51 = vadd.f32 %v1626_v15, %v1625_v32 }
 0x52c   :  { %3688 = vtanh.f32 %v4786_v51  ;;  %v1759_v0 = vrot.slane %v4786_v51, 4 }
 0x532   :  { %v3689_v61 = vpop.eup %3688 }
 0x533   :  { %v1629_v24 = vmul.f32 %v3689_v61, %v1620_v10 }
 0x535   :  { %1630 = vst [vmem:[#allocation2 + $0x18] sm:$0xf] %v1629_v24  ;;  %v1631_v2 = vpack.c.bf16 %v1629_v24, %v1629_v24 }
 0x537   :  { %1640 = vmatmul.bf16.vlgmr.msrb.gmra.mxu2 %v1631_v2  ;;  %1653 = vmatmul.bf16.vlgmr.msrb.gmra.mxu3 %v1631_v2 }
 0x538   :  { %1666 = vmatmul.bf16.vlgmr.msra.gmra.mxu0 %v1631_v2  ;;  %1679 = vmatmul.bf16.vlgmr.msra.gmra.mxu1 %v1631_v2 }
 0x539   :  { %1895 = vmatpush.bf16.msrb.mxu2 %v4152_v30  ;;  %1908 = vmatpush.bf16.msrb.mxu3 %v4157_v33 }
 0x53a   :  { %1921 = vmatpush.bf16.msra.mxu0 %v4189_v48  ;;  %1934 = vmatpush.bf16.msra.mxu1 %v4364_v58 }
 0x53d   :  { %1896 = vmatpush.bf16.msrb.mxu2 %v4180_v42  ;;  %1909 = vmatpush.bf16.msrb.mxu3 %v4191_v49 }
 0x53e   :  { %1922 = vmatpush.bf16.msra.mxu0 %v4229_v1  ;;  %1935 = vmatpush.bf16.msra.mxu1 %v4387_v4 }
 0x541   :  { %1897 = vmatpush.bf16.msrb.mxu2 %v4213_v57  ;;  %1910 = vmatpush.bf16.msrb.mxu3 %v4231_v3 }
 0x542   :  { %1923 = vmatpush.bf16.msra.mxu0 %v4257_v12  ;;  %1936 = vmatpush.bf16.msra.mxu1 %v4402_v9 }
 0x545   :  { %1898 = vmatpush.bf16.msrb.mxu2 %v4241_v6  ;;  %1911 = vmatpush.bf16.msrb.mxu3 %v4262_v14 }
 0x546   :  { %1924 = vmatpush.bf16.msra.mxu0 %v4296_v26  ;;  %1937 = vmatpush.bf16.msra.mxu1 %v4412_v38 }
 0x549   :  { %1899 = vmatpush.bf16.msrb.mxu2 %v4280_v21  ;;  %1912 = vmatpush.bf16.msrb.mxu3 %v4317_v35 }
 0x54a   :  { %1925 = vmatpush.bf16.msra.mxu0 %v4334_v44  ;;  %1938 = vmatpush.bf16.msra.mxu1 %v4421_v16 }
 0x54d   :  { %1900 = vmatpush.bf16.msrb.mxu2 %v4319_v36  ;;  %1913 = vmatpush.bf16.msrb.mxu3 %v4354_v52 }
 0x54e   :  { %1926 = vmatpush.bf16.msra.mxu0 %v4367_v59  ;;  %1939 = vmatpush.bf16.msra.mxu1 %v4430_v19 }
 0x551   :  { %1901 = vmatpush.bf16.msrb.mxu2 %v4356_v54  ;;  %1914 = vmatpush.bf16.msrb.mxu3 %v4377_v62 }
 0x552   :  { %1927 = vmatpush.bf16.msra.mxu0 %v4396_v8  ;;  %1940 = vmatpush.bf16.msra.mxu1 %v4440_v23 }
 0x555   :  { %1902 = vmatpush.bf16.msrb.mxu2 %v4452_v29  ;;  %1915 = vmatpush.bf16.msrb.mxu3 %v4463_v34 }
 0x556   :  { %1928 = vmatpush.bf16.msra.mxu0 %v4465_v37  ;;  %1941 = vmatpush.bf16.msra.mxu1 %v4474_v41 }
 0x5b5   :  { %v1667_v30 = vpop.f32.mrf.mxu0  ;;  %v1680_v33 = vpop.f32.mrf.mxu1 }
 0x5b6   :  { %v1691_v42 = vrot.slane %v1680_v33, 4  ;;  %v1690_v9 = vrot.slane %v1667_v30, 4  ;;  %v5155_v33 = vld [vmem:[#allocation11_spill] sm:$0xff] }
 0x5b8   :  { %v1699_v48 = vadd.f32 %v1691_v42, %v5151_v46  ;;  %v1698_v19 = vadd.f32 %v1690_v9, %v5154_v20  ;;  %v5156_v42 = vld [vmem:[#allocation17_spill] sm:$0xff] }
 0x5ba   :  { %v3258_v49 = vmul.f32 -1.442695, %v1699_v48  ;;  %v1641_v57 = vpop.f32.mrf.mxu2  ;;  %v1654_v1 = vpop.f32.mrf.mxu3  ;;  %v4831_v48 = vadd.f32 %v5156_v42, %v5155_v33 }
 0x5bb   :  { %v1688_v3 = vrot.slane %v1641_v57, 4  ;;  %v1689_v6 = vrot.slane %v1654_v1, 4 }
 0x5bc   :  { %3690 = vpow2.f32 %v3258_v49 }
 0x5bd   :  { %v1696_v12 = vadd.f32 %v1688_v3, %v5152_v45  ;;  %v1697_v14 = vadd.f32 %v1689_v6, %v5153_v53  ;;  %v1669_v21 = vpop.f32.mrf.mxu0  ;;  %v1682_v26 = vpop.f32.mrf.mxu1  ;;  %v3567_v6 = vld [vmem:[%s5105_s3 + $0x1b8] sm:$0xff] }
 0x5be   :  { %v5158_v21 = vld [vmem:[#allocation7_spill] sm:$0xff] }
 0x5bf   :  { %v3256_v35 = vmul.f32 -1.442695, %v1696_v12  ;;  %v3257_v36 = vmul.f32 -1.442695, %v1697_v14  ;;  %v5157_v12 = vld [vmem:[#allocation18_spill] sm:$0xff]  ;;  %v5159_v26 = vld [vmem:[#allocation19_spill] sm:$0xff] }
 0x5c0   :  { %v4839_v14 = vadd.f32 %v5157_v12, %v5145_v63 }
 0x5c1   :  { %3692 = vpow2.f32 %v3256_v35  ;;  %v4843_v35 = vadd.f32 %v5159_v26, %v5158_v21 }
 0x5c2   :  { %v3691_v44 = vpop.eup %3690  ;;  %3694 = vpow2.f32 %v3257_v36  ;;  %v1643_v52 = vpop.f32.mrf.mxu2 }
 0x5c3   :  { %v1656_v54 = vpop.f32.mrf.mxu3  ;;  %v1742_v58 = vadd.f32 1.0, %v3691_v44  ;;  %v3566_v52 = vld [vmem:[%s5105_s3 + $0x1b0] sm:$0xff] }
 0x5c5   :  { %3696 = vrcp.f32 %v1742_v58  ;;  %v1754_v17 = vand.u32 2147483648, %v1742_v58  ;;  %vm1748_vm5 = vweird.f32 %v1742_v58  ;;  %v1752_v40 = vand.u32 2147483647, %v1742_v58 }
 0x5c7   :  { %v3693_v59 = vpop.eup %3692  ;;  %v1755_v61 = vor.u32 1.1754944e-38, %v1754_v17  ;;  %vm1753_vm7 = vcmp.eq.f32.partialorder %v1752_v40, 8.507059e+37 }
 0x5c8   :  { %v3695_v62 = vpop.eup %3694  ;;  %v1703_v4 = vadd.f32 1.0, %v3693_v59 }
 0x5c9   :  { %v1722_v8 = vadd.f32 1.0, %v3695_v62 }
 0x5ca   :  { %3698 = vrcp.f32 %v1703_v4  ;;  %v1715_v46 = vand.u32 2147483648, %v1703_v4  ;;  %v1713_v43 = vand.u32 2147483647, %v1703_v4  ;;  %vm1709_vm14 = vweird.f32 %v1703_v4 }
 0x5cb   :  { %3700 = vrcp.f32 %v1722_v8  ;;  %v3697_v38 = vpop.eup %3696  ;;  %v1734_v47 = vand.u32 2147483648, %v1722_v8  ;;  %v1732_v39 = vand.u32 2147483647, %v1722_v8  ;;  %vm1728_vm0 = vweird.f32 %v1722_v8 }
 0x5cc   :  { %v1744_v37 = vmul.f32 %v3697_v38, %v1742_v58  ;;  %3702 = vtanh.f32 %v1698_v19  ;;  %v1716_v20 = vor.u32 1.1754944e-38, %v1715_v46  ;;  %vm1714_vm1 = vcmp.eq.f32.partialorder %v1713_v43, 8.507059e+37  ;;  %v3564_v19 = vld [vmem:[%s5105_s3 + $0x1a0] sm:$0xff]  ;;  %v3563_v46 = vld [vmem:[%s5105_s3 + $0x198] sm:$0xff]  ;;  %v5161_v43 = vld [vmem:[#allocation16_spill] sm:$0xff] }
 0x5cd   :  { %v1735_v7 = vor.u32 1.1754944e-38, %v1734_v47  ;;  %vm1733_vm3 = vcmp.eq.f32.partialorder %v1732_v39, 8.507059e+37  ;;  %vm1749_vm4 = vweird.f32 %v3697_v38 }
 0x5ce   :  { %v1745_v18 = vsub.f32 1.0, %v1744_v37  ;;  %vm1750_vm6 = vmor %vm1748_vm5, %vm1749_vm4 }
 0x5d0   :  { %v3699_v16 = vpop.eup %3698  ;;  %v1746_v15 = vmul.f32 %v3697_v38, %v1745_v18 }
 0x5d1   :  { %v3701_v23 = vpop.eup %3700  ;;  %v1705_v29 = vmul.f32 %v3699_v16, %v1703_v4  ;;  %vm1710_vm12 = vweird.f32 %v3699_v16 }
 0x5d2   :  { %v1724_v34 = vmul.f32 %v3701_v23, %v1722_v8  ;;  %vm1729_vm13 = vweird.f32 %v3701_v23  ;;  %vm1711_vm15 = vmor %vm1709_vm14, %vm1710_vm12  ;;  %v3703_v28 = vpop.eup %3702  ;;  %v1747_v11 = vadd.f32 %v3697_v38, %v1746_v15  ;;  %v3565_v8 = vld [vmem:[%s5105_s3 + $0x1a8] sm:$0xff] }
 0x5d3   :  { %v1706_v41 = vsub.f32 1.0, %v1705_v29  ;;  %vm1730_vm2 = vmor %vm1728_vm0, %vm1729_vm13 }
 0x5d4   :  { %v1725_v45 = vsub.f32 1.0, %v1724_v34  ;;  %v1751_v27 = vsel %vm1750_vm6, %v3697_v38, %v1747_v11 }
 0x5d5   :  { %v1707_v53 = vmul.f32 %v3699_v16, %v1706_v41  ;;  %v1756_v10 = vsel %vm1753_vm7, %v1755_v61, %v1751_v27 }
 0x5d6   :  { %v1726_v55 = vmul.f32 %v3701_v23, %v1725_v45  ;;  %v3562_v45 = vld [vmem:[%s5105_s3 + $0x190] sm:$0xff] }
 0x5d7   :  { %v1708_v25 = vadd.f32 %v3699_v16, %v1707_v53  ;;  %v5160_v53 = vld [vmem:[#allocation6_spill] sm:$0xff] }
 0x5d8   :  { %v1727_v31 = vadd.f32 %v3701_v23, %v1726_v55  ;;  %v4867_v47 = vadd.f32 %v5161_v43, %v5160_v53 }
 0x5d9   :  { %v1712_v56 = vsel %vm1711_vm15, %v3699_v16, %v1708_v25 }
 0x5da   :  { %v1717_v13 = vsel %vm1714_vm1, %v1716_v20, %v1712_v56  ;;  %v1731_v50 = vsel %vm1730_vm2, %v3701_v23, %v1727_v31  ;;  %v3561_v31 = vld [vmem:[%s5105_s3 + $0x188] sm:$0xff] }
 0x5db   :  { %v1736_v60 = vsel %vm1733_vm3, %v1735_v7, %v1731_v50  ;;  %v1762_v22 = vmul.f32 %v3703_v28, %v1717_v13 }
 0x5dc   :  { %v1761_v32 = vmul.f32 %v1759_v0, %v1736_v60 }
 0x5de   :  { %v4826_v5 = vadd.f32 %v1762_v22, %v1761_v32  ;;  %v3560_v22 = vld [vmem:[%s5105_s3 + $0x180] sm:$0xff] }
 0x5e0   :  { %3704 = vtanh.f32 %v4826_v5 }
 0x5e6   :  { %v3705_v51 = vpop.eup %3704 }
 0x5e7   :  { %v1765_v24 = vmul.f32 %v3705_v51, %v1756_v10 }
 0x5e9   :  { %1766 = vst [vmem:[#allocation2 + $0x18] sm:$0xf0] %v1765_v24  ;;  %v1767_v2 = vpack.c.bf16 %v1765_v24, %v1765_v24 }
 0x5eb   :  { %v1769_v30 = vrot.slane %v1767_v2, 2  ;;  %v1886_v2 = vrot.slane %v4826_v5, 4 }
 0x5ed   :  { %1779 = vmatmul.bf16.vlgmr.msra.gmra.mxu2 %v1769_v30  ;;  %1792 = vmatmul.bf16.vlgmr.msra.gmra.mxu3 %v1769_v30 }
 0x5ee   :  { %1805 = vmatmul.bf16.vlgmr.msrb.gmra.mxu0 %v1769_v30  ;;  %1818 = vmatmul.bf16.vlgmr.msrb.gmra.mxu1 %v1769_v30 }
 0x5ef   :  { %2101 = vmatpush.bf16.msra.mxu2 %v3567_v6 }
 0x5f3   :  { %2102 = vmatpush.bf16.msra.mxu2 %v3566_v52 }
 0x5f7   :  { %2103 = vmatpush.bf16.msra.mxu2 %v3565_v8  ;;  %v3573_v8 = vld [vmem:[%s5105_s3 + $0x1e8] sm:$0xff] }
 0x5fb   :  { %2104 = vmatpush.bf16.msra.mxu2 %v3564_v19  ;;  %v3569_v19 = vld [vmem:[%s5105_s3 + $0x1c8] sm:$0xff] }
 0x5ff   :  { %2105 = vmatpush.bf16.msra.mxu2 %v3563_v46 }
 0x603   :  { %2106 = vmatpush.bf16.msra.mxu2 %v3562_v45 }
 0x607   :  { %2107 = vmatpush.bf16.msra.mxu2 %v3561_v31 }
 0x60b   :  { %2108 = vmatpush.bf16.msra.mxu2 %v3560_v22  ;;  %v4917_v22 = vld [vmem:[%s5108_s5 + $0x6] ss:$0 sm:$0xff] }
 0x66b   :  { %v1806_v49 = vpop.f32.mrf.mxu0  ;;  %v1819_v57 = vpop.f32.mrf.mxu1 }
 0x66c   :  { %v1826_v1 = vadd.f32 %v1819_v57, %v4831_v48  ;;  %v1825_v18 = vadd.f32 %v1806_v49, %v4867_v47 }
 0x66e   :  { %v3261_v3 = vmul.f32 -1.442695, %v1826_v1 }
 0x670   :  { %3706 = vpow2.f32 %v3261_v3  ;;  %v1780_v36 = vpop.f32.mrf.mxu2  ;;  %v1793_v44 = vpop.f32.mrf.mxu3 }
 0x671   :  { %v1823_v54 = vadd.f32 %v1780_v36, %v4839_v14  ;;  %v1824_v58 = vadd.f32 %v1793_v44, %v4843_v35 }
 0x673   :  { %v3259_v59 = vmul.f32 -1.442695, %v1823_v54  ;;  %v3260_v62 = vmul.f32 -1.442695, %v1824_v58  ;;  %v1808_v63 = vpop.f32.mrf.mxu0  ;;  %v1821_v4 = vpop.f32.mrf.mxu1  ;;  %v2031_v58 = vld [vmem:[#allocation2] sm:$0xff] }
 0x674   :  { %v3575_v63 = vld [vmem:[%s5105_s3 + $0x1f8] sm:$0xff]  ;;  %v3574_v4 = vld [vmem:[%s5105_s3 + $0x1f0] sm:$0xff] }
 0x675   :  { %3708 = vpow2.f32 %v3259_v59  ;;  %v2030_v59 = vld [vmem:[#allocation2 + $0x10] sm:$0xff]  ;;  %2195 = vmatpush.bf16.msra.mxu3 %v3575_v63 }
 0x676   :  { %v3707_v9 = vpop.eup %3706  ;;  %3710 = vpow2.f32 %v3260_v62  ;;  %v2050_v62 = vpack.c.bf16 %v2031_v58, %v2030_v59 }
 0x677   :  { %v4856_v23 = vadd.f32 1.0, %v3707_v9  ;;  %v3572_v9 = vld [vmem:[%s5105_s3 + $0x1e0] sm:$0xff] }
 0x678   :  { %v1782_v38 = vpop.f32.mrf.mxu2  ;;  %v1795_v16 = vpop.f32.mrf.mxu3 }
 0x679   :  { %3712 = vrcp.f32 %v4856_v23  ;;  %v1881_v12 = vand.u32 2147483648, %v4856_v23  ;;  %vm1875_vm1 = vweird.f32 %v4856_v23  ;;  %v1879_v21 = vand.u32 2147483647, %v4856_v23  ;;  %2196 = vmatpush.bf16.msra.mxu3 %v3574_v4  ;;  %v3571_v38 = vld [vmem:[%s5105_s3 + $0x1d8] sm:$0xff]  ;;  %v3570_v16 = vld [vmem:[%s5105_s3 + $0x1d0] sm:$0xff] }
 0x67b   :  { %v3709_v29 = vpop.eup %3708  ;;  %v1882_v26 = vor.u32 1.1754944e-38, %v1881_v12  ;;  %vm1880_vm3 = vcmp.eq.f32.partialorder %v1879_v21, 8.507059e+37  ;;  %v3582_v21 = vld [vmem:[%s5105_s3 + $0x230] sm:$0xff] }
 0x67c   :  { %v3711_v34 = vpop.eup %3710  ;;  %v1830_v37 = vadd.f32 1.0, %v3709_v29 }
 0x67d   :  { %v1849_v41 = vadd.f32 1.0, %v3711_v34  ;;  %2197 = vmatpush.bf16.msra.mxu3 %v3573_v8  ;;  %v3581_v8 = vld [vmem:[%s5105_s3 + $0x228] sm:$0xff] }
 0x67e   :  { %3714 = vrcp.f32 %v1830_v37  ;;  %v1842_v0 = vand.u32 2147483648, %v1830_v37  ;;  %v1840_v60 = vand.u32 2147483647, %v1830_v37  ;;  %vm1836_vm10 = vweird.f32 %v1830_v37 }
 0x67f   :  { %3716 = vrcp.f32 %v1849_v41  ;;  %v3713_v55 = vpop.eup %3712  ;;  %v1861_v15 = vand.u32 2147483648, %v1849_v41  ;;  %v1859_v11 = vand.u32 2147483647, %v1849_v41  ;;  %vm1855_vm12 = vweird.f32 %v1849_v41 }
 0x680   :  { %v1871_v7 = vmul.f32 %v3713_v55, %v4856_v23  ;;  %3718 = vtanh.f32 %v1825_v18  ;;  %v1843_v27 = vor.u32 1.1754944e-38, %v1842_v0  ;;  %vm1841_vm13 = vcmp.eq.f32.partialorder %v1840_v60, 8.507059e+37 }
 0x681   :  { %v1862_v10 = vor.u32 1.1754944e-38, %v1861_v15  ;;  %vm1860_vm15 = vcmp.eq.f32.partialorder %v1859_v11, 8.507059e+37  ;;  %vm1876_vm0 = vweird.f32 %v3713_v55  ;;  %2198 = vmatpush.bf16.msra.mxu3 %v3572_v9 }
 0x682   :  { %v1872_v17 = vsub.f32 1.0, %v1871_v7  ;;  %vm1877_vm2 = vmor %vm1875_vm1, %vm1876_vm0 }
 0x684   :  { %v3715_v39 = vpop.eup %3714  ;;  %v1873_v42 = vmul.f32 %v3713_v55, %v1872_v17 }
 0x685   :  { %v3717_v25 = vpop.eup %3716  ;;  %v1832_v20 = vmul.f32 %v3715_v39, %v1830_v37  ;;  %vm1837_vm8 = vweird.f32 %v3715_v39  ;;  %2199 = vmatpush.bf16.msra.mxu3 %v3571_v38 }
 0x686   :  { %v1851_v56 = vmul.f32 %v3717_v25, %v1849_v41  ;;  %vm1856_vm9 = vweird.f32 %v3717_v25  ;;  %vm1838_vm11 = vmor %vm1836_vm10, %vm1837_vm8  ;;  %v3719_v24 = vpop.eup %3718  ;;  %v1874_v6 = vadd.f32 %v3713_v55, %v1873_v42  ;;  %v3568_v41 = vld [vmem:[%s5105_s3 + $0x1c0] sm:$0xff]  ;;  %v3583_v42 = vld [vmem:[%s5105_s3 + $0x238] sm:$0xff] }
 0x687   :  { %v1833_v28 = vsub.f32 1.0, %v1832_v20  ;;  %vm1857_vm14 = vmor %vm1855_vm12, %vm1856_vm9  ;;  %2280 = vmatpush.bf16.msrb.mxu0 %v3583_v42 }
 0x688   :  { %v1852_v13 = vsub.f32 1.0, %v1851_v56  ;;  %v1878_v5 = vsel %vm1877_vm2, %v3713_v55, %v1874_v6 }
 0x689   :  { %v1834_v50 = vmul.f32 %v3715_v39, %v1833_v28  ;;  %v1883_v44 = vsel %vm1880_vm3, %v1882_v26, %v1878_v5  ;;  %2200 = vmatpush.bf16.msra.mxu3 %v3570_v16 }
 0x68a   :  { %v1853_v32 = vmul.f32 %v3717_v25, %v1852_v13 }
 0x68b   :  { %v1835_v40 = vadd.f32 %v3715_v39, %v1834_v50  ;;  %2281 = vmatpush.bf16.msrb.mxu0 %v3582_v21  ;;  %v3599_v21 = vld [vmem:[%s5105_s3 + $0x2b8] sm:$0xff] }
 0x68c   :  { %v1854_v61 = vadd.f32 %v3717_v25, %v1853_v32 }
 0x68d   :  { %v1839_v51 = vsel %vm1838_vm11, %v3715_v39, %v1835_v40  ;;  %2201 = vmatpush.bf16.msra.mxu3 %v3569_v19 }
 0x68e   :  { %v1844_v30 = vsel %vm1841_vm13, %v1843_v27, %v1839_v51  ;;  %v1858_v33 = vsel %vm1857_vm14, %v3717_v25, %v1854_v61 }
 0x68f   :  { %v1889_v49 = vmul.f32 %v3719_v24, %v1844_v30  ;;  %v1863_v57 = vsel %vm1860_vm15, %v1862_v10, %v1858_v33  ;;  %2282 = vmatpush.bf16.msrb.mxu0 %v3581_v8 }
 0x690   :  { %v1888_v1 = vmul.f32 %v1886_v2, %v1863_v57 }
 0x691   :  { %2202 = vmatpush.bf16.msra.mxu3 %v3568_v41  ;;  %v3580_v41 = vld [vmem:[%s5105_s3 + $0x220] sm:$0xff] }
 0x692   :  { %v4878_v3 = vadd.f32 %v1889_v49, %v1888_v1 }
 0x693   :  { %2283 = vmatpush.bf16.msrb.mxu0 %v3580_v41 }
 0x694   :  { %3720 = vtanh.f32 %v4878_v3  ;;  %v2022_v38 = vrot.slane %v4878_v3, 4 }
 0x69a   :  { %v3721_v36 = vpop.eup %3720 }
 0x69b   :  { %v1892_v52 = vmul.f32 %v3721_v36, %v1883_v44 }
 0x69d   :  { %1893 = vst [vmem:[#allocation2 + $0x8] sm:$0xf] %v1892_v52  ;;  %v1894_v54 = vpack.c.bf16 %v1892_v52, %v1892_v52 }
 0x69f   :  { %1903 = vmatmul.bf16.vlgmr.msrb.gmra.mxu2 %v1894_v54  ;;  %1916 = vmatmul.bf16.vlgmr.msrb.gmra.mxu3 %v1894_v54 }
 0x6a0   :  { %1929 = vmatmul.bf16.vlgmr.msra.gmra.mxu0 %v1894_v54  ;;  %1942 = vmatmul.bf16.vlgmr.msra.gmra.mxu1 %v1894_v54 }
 0x6a1   :  { %2654 = vmatpush.bf16.msrb.mxu2 %v3599_v21 }
 0x6af   :  { %2109 = vmatmul.bf16.vlgmr.msra.gmra.mxu2 %v2050_v62 }
 0x71d   :  { %v1930_v23 = vpop.f32.mrf.mxu0  ;;  %v1943_v29 = vpop.f32.mrf.mxu1 }
 0x71e   :  { %v1954_v34 = vrot.slane %v1943_v29, 4 }
 0x720   :  { %v1962_v37 = vadd.f32 %v1954_v34, %v4831_v48 }
 0x722   :  { %v3264_v46 = vmul.f32 -1.442695, %v1962_v37  ;;  %v1904_v45 = vpop.f32.mrf.mxu2  ;;  %v1917_v53 = vpop.f32.mrf.mxu3 }
 0x723   :  { %v1951_v43 = vrot.slane %v1904_v45, 4  ;;  %v1952_v55 = vrot.slane %v1917_v53, 4 }
 0x724   :  { %3722 = vpow2.f32 %v3264_v46 }
 0x725   :  { %v1959_v39 = vadd.f32 %v1951_v43, %v4839_v14  ;;  %v1960_v18 = vadd.f32 %v1952_v55, %v4843_v35  ;;  %v1932_v25 = vpop.f32.mrf.mxu0  ;;  %v1945_v20 = vpop.f32.mrf.mxu1  ;;  %v1953_v35 = vrot.slane %v1930_v23, 4  ;;  %v3579_v43 = vld [vmem:[%s5105_s3 + $0x218] sm:$0xff] }
 0x726   :  { %2284 = vmatpush.bf16.msrb.mxu0 %v3579_v43 }
 0x727   :  { %v3262_v31 = vmul.f32 -1.442695, %v1959_v39  ;;  %v3263_v56 = vmul.f32 -1.442695, %v1960_v18  ;;  %v1961_v40 = vadd.f32 %v1953_v35, %v4867_v47  ;;  %v4973_v35 = vld [vmem:[%s5108_s5 + $0x7] ss:$0 sm:$0xff] }
 0x729   :  { %3724 = vpow2.f32 %v3262_v31  ;;  %v2032_v31 = vld [vmem:[#allocation2 + $0x18] sm:$0xff] }
 0x72a   :  { %v3723_v48 = vpop.eup %3722  ;;  %3726 = vpow2.f32 %v3263_v56  ;;  %v1906_v7 = vpop.f32.mrf.mxu2 }
 0x72b   :  { %v1919_v28 = vpop.f32.mrf.mxu3  ;;  %v4911_v0 = vadd.f32 1.0, %v3723_v48  ;;  %v3578_v7 = vld [vmem:[%s5105_s3 + $0x210] sm:$0xff] }
 0x72c   :  { %2285 = vmatpush.bf16.msrb.mxu0 %v3578_v7  ;;  %v3577_v28 = vld [vmem:[%s5105_s3 + $0x208] sm:$0xff] }
 0x72d   :  { %3728 = vrcp.f32 %v4911_v0  ;;  %v2017_v3 = vand.u32 2147483648, %v4911_v0  ;;  %vm2011_vm13 = vweird.f32 %v4911_v0  ;;  %v2015_v53 = vand.u32 2147483647, %v4911_v0 }
 0x72f   :  { %v3725_v13 = vpop.eup %3724  ;;  %v2018_v39 = vor.u32 1.1754944e-38, %v2017_v3  ;;  %vm2016_vm15 = vcmp.eq.f32.partialorder %v2015_v53, 8.507059e+37  ;;  %v3596_v3 = vld [vmem:[%s5105_s3 + $0x2a0] sm:$0xff] }
 0x730   :  { %v3727_v50 = vpop.eup %3726  ;;  %v1966_v60 = vadd.f32 1.0, %v3725_v13  ;;  %2286 = vmatpush.bf16.msrb.mxu0 %v3577_v28  ;;  %v3591_v13 = vld [vmem:[%s5105_s3 + $0x278] sm:$0xff] }
 0x731   :  { %v1985_v15 = vadd.f32 1.0, %v3727_v50  ;;  %2707 = vmatpush.bf16.msrb.mxu3 %v3591_v13  ;;  %2590 = vmatpush.bf16.msrb.mxu1 %v3591_v13  ;;  %v3590_v50 = vld [vmem:[%s5105_s3 + $0x270] sm:$0xff] }
 0x732   :  { %3730 = vrcp.f32 %v1966_v60  ;;  %v2110_v14 = vpop.f32.mrf.mxu2  ;;  %v1976_v49 = vand.u32 2147483647, %v1966_v60  ;;  %v1978_v57 = vand.u32 2147483648, %v1966_v60  ;;  %vm1972_vm5 = vweird.f32 %v1966_v60  ;;  %v3594_v13 = vld [vmem:[%s5105_s3 + $0x290] sm:$0xff] }
 0x733   :  { %3732 = vrcp.f32 %v1985_v15  ;;  %v4919_v32 = vpop.eup %3728  ;;  %v2111_v11 = vadd.f32 %v2110_v14, %v4917_v22  ;;  %v1997_v6 = vand.u32 2147483648, %v1985_v15  ;;  %v1995_v26 = vand.u32 2147483647, %v1985_v15  ;;  %v3588_v14 = vld [vmem:[%s5105_s3 + $0x260] sm:$0xff] }
 0x734   :  { %v2007_v24 = vmul.f32 %v4919_v32, %v4911_v0  ;;  %3734 = vtanh.f32 %v1961_v40  ;;  %v1979_v58 = vor.u32 1.1754944e-38, %v1978_v57  ;;  %vm1991_vm8 = vweird.f32 %v1985_v15  ;;  %v3576_v0 = vld [vmem:[%s5105_s3 + $0x200] sm:$0xff]  ;;  %v3587_v40 = vld [vmem:[%s5105_s3 + $0x258] sm:$0xff] }
 0x735   :  { %v2120_v30 = vmul.f32 0.2, %v2111_v11  ;;  %vm1977_vm9 = vcmp.eq.f32.partialorder %v1976_v49, 8.507059e+37  ;;  %v1998_v63 = vor.u32 1.1754944e-38, %v1997_v6  ;;  %vm1996_vm11 = vcmp.eq.f32.partialorder %v1995_v26, 8.507059e+37  ;;  %2287 = vmatpush.bf16.msrb.mxu0 %v3576_v0  ;;  %2708 = vmatpush.bf16.msrb.mxu3 %v3590_v50  ;;  %v2705_v6 = vld [vmem:[%s5111_s2] sm:$0xff] }
 0x736   :  { %v2008_v36 = vsub.f32 1.0, %v2007_v24  ;;  %vm2012_vm12 = vweird.f32 %v4919_v32  ;;  %2591 = vmatpush.bf16.msrb.mxu1 %v3590_v50 }
 0x737   :  { %v2124_v52 = vmax.f32 %v2111_v11, %v2120_v30  ;;  %vm2013_vm14 = vmor %vm2011_vm13, %vm2012_vm12 }
 0x738   :  { %v3731_v17 = vpop.eup %3730  ;;  %v2009_v23 = vmul.f32 %v4919_v32, %v2008_v36 }
 0x739   :  { %v3733_v27 = vpop.eup %3732  ;;  %v1968_v61 = vmul.f32 %v3731_v17, %v1966_v60  ;;  %vm1973_vm4 = vweird.f32 %v3731_v17  ;;  %2723 = vmatpush.bf16.msra.mxu0 %v3599_v21 }
 0x73a   :  { %v1987_v51 = vmul.f32 %v3733_v27, %v1985_v15  ;;  %v2112_v10 = vpop.f32.mrf.mxu2  ;;  %vm1992_vm6 = vweird.f32 %v3733_v27  ;;  %vm1974_vm7 = vmor %vm1972_vm5, %vm1973_vm4  ;;  %v3735_v9 = vpop.eup %3734  ;;  %v2010_v45 = vadd.f32 %v4919_v32, %v2009_v23  ;;  %v3589_v15 = vld [vmem:[%s5105_s3 + $0x268] sm:$0xff] }
 0x73b   :  { %v1969_v2 = vsub.f32 1.0, %v1968_v61  ;;  %v2113_v33 = vadd.f32 %v2112_v10, %v4917_v22  ;;  %vm1993_vm10 = vmor %vm1991_vm8, %vm1992_vm6  ;;  %2709 = vmatpush.bf16.msrb.mxu3 %v3589_v15  ;;  %2592 = vmatpush.bf16.msrb.mxu1 %v3589_v15  ;;  %v3586_v61 = vld [vmem:[%s5105_s3 + $0x250] sm:$0xff]  ;;  %v3584_v10 = vld [vmem:[%s5105_s3 + $0x240] sm:$0xff] }
 0x73c   :  { %v1988_v1 = vsub.f32 1.0, %v1987_v51  ;;  %v2014_v55 = vsel %vm2013_vm14, %v4919_v32, %v2010_v45  ;;  %v3585_v51 = vld [vmem:[%s5105_s3 + $0x248] sm:$0xff] }
 0x73d   :  { %v1970_v47 = vmul.f32 %v3731_v17, %v1969_v2  ;;  %v2121_v12 = vmul.f32 0.2, %v2113_v33  ;;  %v2019_v25 = vsel %vm2016_vm15, %v2018_v39, %v2014_v55 }
 0x73e   :  { %v1989_v5 = vmul.f32 %v3733_v27, %v1988_v1 }
 0x73f   :  { %v1971_v44 = vadd.f32 %v3731_v17, %v1970_v47  ;;  %v2125_v54 = vmax.f32 %v2113_v33, %v2121_v12  ;;  %2710 = vmatpush.bf16.msrb.mxu3 %v3588_v14  ;;  %2593 = vmatpush.bf16.msrb.mxu1 %v3588_v14  ;;  %v2706_v12 = vpack.c.bf16 %v2705_v6, %v2705_v6 }
 0x740   :  { %v1990_v59 = vadd.f32 %v3733_v27, %v1989_v5  ;;  %v3762_v5 = vmov 4.0  }
 0x741   :  { %v1975_v62 = vsel %vm1974_vm7, %v3731_v17, %v1971_v44  ;;  %v2144_v4 = vpack.c.bf16 %v2125_v54, %v2124_v52  ;;  %v5162_v44 = vld [vmem:[#allocation3_spill] sm:$0xff]  ;;  %v2352_v54 = vlaneseq }
 0x742   :  { %v1980_v16 = vsel %vm1977_vm9, %v1979_v58, %v1975_v62  ;;  %v1994_v19 = vsel %vm1993_vm10, %v3733_v27, %v1990_v59  ;;  %v3598_v62 = vld [vmem:[%s5105_s3 + $0x2b0] sm:$0xff] }
 0x743   :  { %v2025_v29 = vmul.f32 %v3735_v9, %v1980_v16  ;;  %v1999_v34 = vsel %vm1996_vm11, %v1998_v63, %v1994_v19  ;;  %2203 = vmatmul.bf16.vlgmr.msra.gmra.mxu3 %v2144_v4  ;;  %2594 = vmatpush.bf16.msrb.mxu1 %v3587_v40  ;;  %v5012_v9 = vshrl.u32 %v2352_v54, 7  ;;  %v3597_v19 = vld [vmem:[%s5105_s3 + $0x2a8] sm:$0xff] }
 0x744   :  { %v2024_v37 = vmul.f32 %v2022_v38, %v1999_v34  ;;  %2711 = vmatpush.bf16.msrb.mxu3 %v3587_v40  ;;  %2724 = vmatpush.bf16.msra.mxu0 %v3598_v62 }
 0x745   :  { %2655 = vmatpush.bf16.msrb.mxu2 %v3598_v62  ;;  %v2354_v34 = vadd.s32 8, %v5012_v9  ;;  %v2355_v45 = vadd.s32 16, %v5012_v9  ;;  %v2357_v39 = vcvt.s32.f32 %v5012_v9  ;;  %vm2777_vm7 = vcmp.eq.s32.totalorder %v5012_v9, 0 }
 0x746   :  { %v2026_v46 = vadd.f32 %v2025_v29, %v2024_v37  ;;  %vm2779_vm8 = vcmp.eq.s32.totalorder %v5012_v9, 1 }
 0x747   :  { %2595 = vmatpush.bf16.msrb.mxu1 %v3586_v61  ;;  %v2358_v43 = vcvt.s32.f32 %v2354_v34 }
 0x748   :  { %3736 = vtanh.f32 %v2026_v46  ;;  %2712 = vmatpush.bf16.msrb.mxu3 %v3586_v61  ;;  %2725 = vmatpush.bf16.msra.mxu0 %v3597_v19 }
 0x749   :  { %3738 = vrcp.f32 %v3762_v5  ;;  %2656 = vmatpush.bf16.msrb.mxu2 %v3597_v19  ;;  %v5061_v19 = vld [vmem:[%s5108_s5 + $0x20] ss:$0 sm:$0xff] }
 0x74b   :  { %2596 = vmatpush.bf16.msrb.mxu1 %v3585_v51 }
 0x74c   :  { %2713 = vmatpush.bf16.msrb.mxu3 %v3585_v51  ;;  %2726 = vmatpush.bf16.msra.mxu0 %v3596_v3 }
 0x74d   :  { %2657 = vmatpush.bf16.msrb.mxu2 %v3596_v3 }
 0x74e   :  { %v3737_v18 = vpop.eup %3736 }
 0x74f   :  { %v2028_v20 = vmul.f32 %v3737_v18, %v2019_v25  ;;  %2597 = vmatpush.bf16.msrb.mxu1 %v3584_v10  ;;  %v2359_v18 = vcvt.s32.f32 %v2355_v45  ;;  %v2356_v25 = vadd.s32 24, %v5012_v9 }
 0x750   :  { %2714 = vmatpush.bf16.msrb.mxu3 %v3584_v10  ;;  %v3592_v10 = vld [vmem:[%s5105_s3 + $0x280] sm:$0xff] }
 0x751   :  { %2029 = vst [vmem:[#allocation2 + $0x8] sm:$0xf0] %v2028_v20  ;;  %v3595_v20 = vld [vmem:[%s5105_s3 + $0x298] sm:$0xff]  ;;  %v2360_v0 = vcvt.s32.f32 %v2356_v25 }
 0x752   :  { %2727 = vmatpush.bf16.msra.mxu0 %v3595_v20  ;;  %2658 = vmatpush.bf16.msrb.mxu2 %v3595_v20  ;;  %v3765_v20 = vmov 15.0  }
 0x756   :  { %2728 = vmatpush.bf16.msra.mxu0 %v3594_v13  ;;  %2659 = vmatpush.bf16.msrb.mxu2 %v3594_v13 }
 0x758   :  { %v2033_v56 = vld [vmem:[#allocation2 + $0x8] sm:$0xff] }
 0x759   :  { %v2051_v48 = vpack.c.bf16 %v2033_v56, %v2032_v31 }
 0x75b   :  { %2114 = vmatmul.bf16.gmra.mxu2 %v2051_v48 }
 0x7c6   :  { %v2204_v60 = vpop.f32.mrf.mxu3 }
 0x7c7   :  { %v4976_v11 = vadd.f32 %v2204_v60, %v4973_v35 }
 0x7ce   :  { %v2206_v32 = vpop.f32.mrf.mxu3 }
 0x7cf   :  { %v4979_v17 = vadd.f32 %v2206_v32, %v4973_v35  ;;  %v3593_v32 = vld [vmem:[%s5105_s3 + $0x288] sm:$0xff] }
 0x7d0   :  { %2729 = vmatpush.bf16.msra.mxu0 %v3593_v32  ;;  %2660 = vmatpush.bf16.msrb.mxu2 %v3593_v32 }
 0x7d1   :  { %v2230_v27 = vpack.c.bf16 %v4979_v17, %v4976_v11 }
 0x7d3   :  { %2288 = vmatmul.bf16.vlgmr.msrb.gmra.mxu0 %v2230_v27 }
 0x7d4   :  { %2730 = vmatpush.bf16.msra.mxu0 %v3592_v10  ;;  %2661 = vmatpush.bf16.msrb.mxu2 %v3592_v10 }
 0x7de   :  { %v2115_v24 = vpop.f32.mrf.mxu2 }
 0x7df   :  { %v2116_v2 = vadd.f32 %v2115_v24, %v4917_v22 }
 0x7e1   :  { %v2122_v33 = vmul.f32 0.2, %v2116_v2 }
 0x7e3   :  { %v2126_v57 = vmax.f32 %v2116_v2, %v2122_v33 }
 0x7e6   :  { %v2117_v30 = vpop.f32.mrf.mxu2 }
 0x7e7   :  { %v2118_v42 = vadd.f32 %v2117_v30, %v4917_v22  ;;  %v3739_v22 = vpop.eup %3738 }
 0x7e8   :  { %v2362_v26 = vmul.f32 4.0, %v3739_v22  ;;  %vm2366_vm0 = vweird.f32 %v3739_v22 }
 0x7e9   :  { %v2123_v49 = vmul.f32 0.2, %v2118_v42 }
 0x7ea   :  { %v2363_v63 = vsub.f32 1.0, %v2362_v26 }
 0x7eb   :  { %v2127_v1 = vmax.f32 %v2118_v42, %v2123_v49  ;;  %v3763_v42 = vmov 16.0  }
 0x7ec   :  { %v2364_v23 = vmul.f32 %v3739_v22, %v2363_v63  ;;  %3740 = vrcp.f32 %v3763_v42 }
 0x7ed   :  { %v2145_v47 = vpack.c.bf16 %v2127_v1, %v2126_v57  ;;  %v3764_v1 = vmov 0.0   ;;  %3742 = vrcp.f32 %v3765_v20 }
 0x7ee   :  { %v2365_v53 = vadd.f32 %v3739_v22, %v2364_v23 }
 0x7ef   :  { %2208 = vmatmul.bf16.gmra.mxu3 %v2145_v47 }
 0x7f0   :  { %v2367_v56 = vsel %vm2366_vm0, %v3739_v22, %v2365_v53 }
 0x7f1   :  { %v2369_v48 = vmul.f32 %v2367_v56, %v2358_v43  ;;  %v2368_v7 = vmul.f32 %v2367_v56, %v2357_v39  ;;  %v2370_v28 = vmul.f32 %v2367_v56, %v2359_v18  ;;  %v2371_v14 = vmul.f32 %v2367_v56, %v2360_v0 }
 0x7f2   :  { %v3741_v5 = vpop.eup %3740 }
 0x7f3   :  { %v2373_v50 = vfloor.f32 %v2369_v48  ;;  %v2372_v60 = vfloor.f32 %v2368_v7  ;;  %v2374_v15 = vfloor.f32 %v2370_v28  ;;  %v2375_v51 = vfloor.f32 %v2371_v14 }
 0x7f4   :  { %vm2414_vm5 = vweird.f32 %v3741_v5 }
 0x7f5   :  { %v2377_v40 = vmul.f32 4.0, %v2373_v50  ;;  %v2376_v27 = vmul.f32 4.0, %v2372_v60  ;;  %v2378_v61 = vmul.f32 4.0, %v2374_v15  ;;  %v2379_v33 = vmul.f32 4.0, %v2375_v51  ;;  %v3743_v50 = vpop.eup %3742 }
 0x7f6   :  { %vm2443_vm6 = vweird.f32 %v3743_v50 }
 0x7f7   :  { %v2381_v24 = vsub.f32 %v2358_v43, %v2377_v40  ;;  %v2380_v2 = vsub.f32 %v2357_v39, %v2376_v27  ;;  %v2382_v30 = vsub.f32 %v2359_v18, %v2378_v61  ;;  %v2383_v57 = vsub.f32 %v2360_v0, %v2379_v33 }
 0x7f8   :  { %v2439_v61 = vmul.f32 15.0, %v3743_v50 }
 0x7f9   :  { %vm2385_vm1 = vcmp.lt.f32.partialorder %v2381_v24, 2.0  ;;  %vm2384_vm2 = vcmp.lt.f32.partialorder %v2380_v2, 2.0  ;;  %vm2386_vm3 = vcmp.lt.f32.partialorder %v2382_v30, 2.0  ;;  %vm2387_vm4 = vcmp.lt.f32.partialorder %v2383_v57, 2.0 }
 0x7fa   :  { %v3378_v47 = vsel %vm2385_vm1, 1.0, %v3764_v1  ;;  %v3379_v21 = vsel %vm2386_vm3, 1.0, %v3764_v1  ;;  %v2440_v30 = vsub.f32 1.0, %v2439_v61  ;;  %vm2494_vm1 = vcmask 1040384  }
 0x7fb   :  { %v2397_v22 = vmul.f32 %v3378_v47, %v4979_v17  ;;  %vm2670_vm3 = vcmask 1043456  }
 0x7fc   :  { %v2441_v42 = vmul.f32 %v3743_v50, %v2440_v30 }
 0x7ff   :  { %2715 = vmatmul.bf16.vlgmr.msrb.gmra.mxu3 %v2706_v12  ;;  %v3377_v12 = vsel %vm2384_vm2, 1.0, %v3764_v1  ;;  %vm2743_vm2 = vcmask 7168  }
 0x800   :  { %v2396_v26 = vmul.f32 %v3377_v12, %v4976_v11 }
 0x850   :  { %v2289_v36 = vpop.f32.mrf.mxu0 }
 0x851   :  { %v2300_v52 = vadd.f32 %v2289_v36, %v5162_v44  ;;  %v2306_v59 = vrot.slane %v2289_v36, 4 }
 0x853   :  { %v3361_v58 = vclamps-f32 %v2300_v52, 1.0  ;;  %v3380_v52 = vsel %vm2387_vm4, 1.0, %v3764_v1  ;;  %vm2674_vm4 = vcmp.lt.s32.totalorder %v5012_v9, 2 }
 0x855   :  { %3362 = vst [vmem:[%s5107_s6 + $0x4] sm:$0xf] %v3361_v58  ;;  %v2308_v4 = vadd.f32 %v3361_v58, %v2306_v59  ;;  %v2540_v8 = vsub.f32 %v3361_v58, %v5162_v44  ;;  %v2410_v58 = vmul.f32 16.0, %v3741_v5  ;;  %v2400_v59 = vadd.f32 %v2397_v22, %v2396_v26 }
 0x857   :  { %v2541_v38 = vpack.c.bf16 %v2540_v8, %v2540_v8  ;;  %v3363_v16 = vclamps-f32 %v2308_v4, 1.0 }
 0x858   :  { %v2291_v29 = vpop.f32.mrf.mxu0 }
 0x859   :  { %3364 = vst [vmem:[%s5107_s6 + $0x8] sm:$0xf] %v3363_v16  ;;  %v2313_v37 = vadd.f32 %v3363_v16, %v2291_v29  ;;  %2598 = vmatmul.bf16.vlgmr.msrb.gmra.mxu1 %v2541_v38  ;;  %v2319_v46 = vrot.slane %v2291_v29, 4  ;;  %v2411_v38 = vsub.f32 1.0, %v2410_v58 }
 0x85b   :  { %v3365_v41 = vclamps-f32 %v2313_v37, 1.0  ;;  %v2412_v29 = vmul.f32 %v3741_v5, %v2411_v38 }
 0x85d   :  { %3366 = vst [vmem:[%s5107_s6 + $0xc] sm:$0xf] %v3365_v41  ;;  %v5028_v55 = vadd.f32 %v3365_v41, %v2319_v46 }
 0x85f   :  { %v3367_v31 = vclamps-f32 %v5028_v55, 1.0 }
 0x861   :  { %3368 = vst [vmem:[%s5107_s6 + $0x10] sm:$0xf] %v3367_v31 }
 0x872   :  { %v2209_v49 = vpop.f32.mrf.mxu3 }
 0x873   :  { %v2210_v6 = vadd.f32 %v2209_v49, %v4973_v35 }
 0x875   :  { %v2398_v36 = vmul.f32 %v3379_v21, %v2210_v6 }
 0x877   :  { %v2401_v63 = vadd.f32 %v2400_v59, %v2398_v36 }
 0x87a   :  { %v2211_v44 = vpop.f32.mrf.mxu3 }
 0x87b   :  { %v2212_v62 = vadd.f32 %v2211_v44, %v4973_v35  ;;  %v2413_v35 = vadd.f32 %v3741_v5, %v2412_v29 }
 0x87d   :  { %v2399_v4 = vmul.f32 %v3380_v52, %v2212_v62  ;;  %v2231_v8 = vpack.c.bf16 %v2212_v62, %v2210_v6  ;;  %v2415_v39 = vsel %vm2414_vm5, %v3741_v5, %v2413_v35 }
 0x87f   :  { %v2402_v16 = vadd.f32 %v2401_v63, %v2399_v4  ;;  %2293 = vmatmul.bf16.gmra.mxu0 %v2231_v8 }
 0x881   :  { %v2403_v23 = vrot.slane %v2402_v16, 4 }
 0x882   :  { %v2716_v34 = vpop.f32.mrf.mxu3 }
 0x883   :  { %v2404_v37 = vadd.f32 %v2403_v23, %v2402_v16  ;;  %v2717_v41 = vadd.f32 %v2716_v34, %v5061_v19 }
 0x885   :  { %v2405_v46 = vrot.slane %v2404_v37, 2  ;;  %v2720_v45 = vmul.f32 0.2, %v2717_v41 }
 0x887   :  { %v2406_v3 = vadd.f32 %v2405_v46, %v2404_v37  ;;  %v2721_v43 = vmax.f32 %v2717_v41, %v2720_v45 }
 0x889   :  { %v2407_v53 = vrot.slane %v2406_v3, 1  ;;  %v2722_v48 = vpack.c.bf16 %v2721_v43, %v2721_v43 }
 0x88a   :  { %v2718_v18 = vpop.f32.mrf.mxu3 }
 0x88b   :  { %v2408_v25 = vadd.f32 %v2407_v53, %v2406_v3 }
 0x88d   :  { %v2416_v56 = vmul.f32 %v2415_v39, %v2408_v25 }
 0x88f   :  { %v2417_v7 = vsub.f32 %v4976_v11, %v2416_v56  ;;  %v2418_v28 = vsub.f32 %v4979_v17, %v2416_v56  ;;  %v2419_v0 = vsub.f32 %v2210_v6, %v2416_v56  ;;  %v2420_v13 = vsub.f32 %v2212_v62, %v2416_v56  ;;  %2731 = vmatmul.bf16.vlgmr.msra.gmra.mxu0 %v2722_v48  ;;  %v2446_v17 = vld [vmem:[%s5108_s5 + $0x23] ss:$0 sm:$0xff] }
 0x890   :  { %v2474_v57 = vmul.f32 1.442695, %v2446_v17  ;;  %v2442_v6 = vadd.f32 %v3743_v50, %v2441_v42  ;;  %v2778_v44 = vsel %vm2777_vm7, %v2416_v56, 0.0  ;;  %v2472_v4 = vmul.f32 %v2416_v56, %v2416_v56 }
 0x891   :  { %v2421_v60 = vmul.f32 %v3377_v12, %v2417_v7  ;;  %v2422_v15 = vmul.f32 %v3378_v47, %v2418_v28  ;;  %v2423_v14 = vmul.f32 %v3379_v21, %v2419_v0  ;;  %v2424_v32 = vmul.f32 %v3380_v52, %v2420_v13 }
 0x892   :  { %3744 = vpow2.f32 %v2474_v57  ;;  %v2444_v5 = vsel %vm2443_vm6, %v3743_v50, %v2442_v6  ;;  %v2450_v23 = vmul.f32 0.5, %v2446_v17 }
 0x893   :  { %v2425_v40 = vmul.f32 %v2421_v60, %v2421_v60  ;;  %v2426_v27 = vmul.f32 %v2422_v15, %v2422_v15  ;;  %v2427_v51 = vmul.f32 %v2423_v14, %v2423_v14  ;;  %v2428_v24 = vmul.f32 %v2424_v32, %v2424_v32 }
 0x894   :  { %v2451_v34 = vmul.f32 1.442695, %v2450_v23 }
 0x895   :  { %v2429_v10 = vadd.f32 %v2426_v27, %v2425_v40 }
 0x897   :  { %v2430_v2 = vadd.f32 %v2429_v10, %v2427_v51 }
 0x898   :  { %v3745_v36 = vpop.eup %3744 }
 0x899   :  { %v2431_v33 = vadd.f32 %v2430_v2, %v2428_v24  ;;  %v2476_v63 = vmul.f32 2.0, %v3745_v36  ;;  %v2539_v36 = vld [vmem:[%s5108_s5 + $0x22] ss:$0 sm:$0xff] }
 0x89b   :  { %v2432_v11 = vrot.slane %v2431_v33, 4  ;;  %vm2482_vm12 = vweird.f32 %v2476_v63  ;;  %v2488_v48 = vand.u32 2147483648, %v2476_v63  ;;  %v2486_v0 = vand.u32 2147483647, %v2476_v63 }
 0x89d   :  { %v2433_v49 = vadd.f32 %v2432_v11, %v2431_v33  ;;  %v2489_v50 = vor.u32 1.1754944e-38, %v2488_v48  ;;  %vm2487_vm0 = vcmp.eq.f32.partialorder %v2486_v0, 8.507059e+37 }
 0x89f   :  { %v2434_v47 = vrot.slane %v2433_v49, 2 }
 0x8a1   :  { %v2435_v12 = vadd.f32 %v2434_v47, %v2433_v49 }
 0x8a3   :  { %v2436_v21 = vrot.slane %v2435_v12, 1 }
 0x8a5   :  { %v2437_v22 = vadd.f32 %v2436_v21, %v2435_v12 }
 0x8a7   :  { %v2445_v26 = vmul.f32 %v2444_v5, %v2437_v22 }
 0x8a9   :  { %v2447_v52 = vmul.f32 0.5, %v2445_v26  ;;  %v2470_v58 = vmul.f32 1.442695, %v2445_v26  ;;  %v5071_v59 = vsel %vm2779_vm8, %v2445_v26, %v2778_v44 }
 0x8ab   :  { %v2448_v62 = vmul.f32 1.442695, %v2447_v52  ;;  %3746 = vpow2.f32 %v2470_v58 }
 0x8ad   :  { %3748 = vpow2.f32 %v2448_v62 }
 0x8ae   :  { %3750 = vrcp.f32 %v2476_v63 }
 0x8b1   :  { %v3747_v8 = vpop.eup %3746 }
 0x8b2   :  { %v2473_v38 = vadd.f32 %v3747_v8, %v2472_v4 }
 0x8b3   :  { %v3749_v16 = vpop.eup %3748 }
 0x8b4   :  { %3752 = vrcp.f32 %v3749_v16  ;;  %v3751_v29 = vpop.eup %3750  ;;  %v2464_v3 = vand.u32 2147483648, %v3749_v16  ;;  %v2462_v43 = vand.u32 2147483647, %v3749_v16  ;;  %vm2458_vm10 = vweird.f32 %v3749_v16 }
 0x8b5   :  { %v2478_v37 = vmul.f32 %v3751_v29, %v2476_v63  ;;  %3754 = vpow2.f32 %v2451_v34  ;;  %vm2483_vm13 = vweird.f32 %v3751_v29 }
 0x8b6   :  { %v2465_v20 = vor.u32 1.1754944e-38, %v2464_v3  ;;  %vm2463_vm14 = vcmp.eq.f32.partialorder %v2462_v43, 8.507059e+37  ;;  %vm2484_vm15 = vmor %vm2482_vm12, %vm2483_vm13 }
 0x8b7   :  { %v2479_v45 = vsub.f32 1.0, %v2478_v37 }
 0x8b9   :  { %v2480_v39 = vmul.f32 %v3751_v29, %v2479_v45 }
 0x8ba   :  { %v3753_v41 = vpop.eup %3752 }
 0x8bb   :  { %v2454_v46 = vmul.f32 %v3753_v41, %v3749_v16  ;;  %vm2459_vm9 = vweird.f32 %v3753_v41  ;;  %v3755_v25 = vpop.eup %3754  ;;  %v2481_v28 = vadd.f32 %v3751_v29, %v2480_v39 }
 0x8bc   :  { %vm2460_vm11 = vmor %vm2458_vm10, %vm2459_vm9 }
 0x8bd   :  { %v2455_v35 = vsub.f32 1.0, %v2454_v46  ;;  %v2485_v60 = vsel %vm2484_vm15, %v3751_v29, %v2481_v28 }
 0x8be   :  { %v2490_v15 = vsel %vm2487_vm0, %v2489_v50, %v2485_v60  ;;  %v3446_v50 = vsel %vm2674_vm4, 1.0, %v3764_v1 }
 0x8bf   :  { %v2456_v53 = vmul.f32 %v3753_v41, %v2455_v35  ;;  %v2491_v40 = vmul.f32 %v2490_v15, %v2473_v38 }
 0x8c1   :  { %v2457_v18 = vadd.f32 %v3753_v41, %v2456_v53 }
 0x8c3   :  { %v2461_v56 = vsel %vm2460_vm11, %v3753_v41, %v2457_v18  ;;  %vm2781_vm11 = vcmp.eq.s32.totalorder %v5012_v9, 2 }
 0x8c4   :  { %v2466_v7 = vsel %vm2463_vm14, %v2465_v20, %v2461_v56 }
 0x8c5   :  { %v2467_v13 = vmul.f32 %v3755_v25, %v2466_v7 }
 0x8c7   :  { %3756 = vlog2.f32 %v2467_v13 }
 0x8cd   :  { %v3757_v14 = vpop.eup %3756 }
 0x8ce   :  { %v2469_v32 = vmul.f32 0.6931472, %v3757_v14 }
 0x8d0   :  { %v2492_v27 = vadd.f32 %v2491_v40, %v2469_v32  ;;  %v2695_v40 = vsub.f32 1.0, %v3446_v50 }
 0x8d2   :  { %v3381_v62 = vadd.f32 -0.5, %v2492_v27  ;;  %v3766_v27 = vmov 2.0  }
 0x8d3   :  { %3758 = vrcp.f32 %v3766_v27 }
 0x8d4   :  { %v2495_v63 = vsel %vm2494_vm1, %v3381_v62, 0.0 }
 0x8d6   :  { %v2599_v61 = vpop.f32.mrf.mxu1 }
 0x8d7   :  { %v2600_v51 = vadd.f32 %v2599_v61, %v5061_v19 }
 0x8d9   :  { %v2603_v10 = vmul.f32 0.2, %v2600_v51 }
 0x8db   :  { %v2604_v24 = vmax.f32 %v2600_v51, %v2603_v10 }
 0x8dd   :  { %v2605_v2 = vpack.c.bf16 %v2604_v24, %v2604_v24  ;;  %v3759_v24 = vpop.eup %3758 }
 0x8de   :  { %v2601_v30 = vpop.f32.mrf.mxu1  ;;  %vm2692_vm5 = vweird.f32 %v3759_v24 }
 0x8df   :  { %2662 = vmatmul.bf16.vlgmr.msrb.gmra.mxu2 %v2605_v2 }
 0x8fc   :  { %v2294_v33 = vpop.f32.mrf.mxu0 }
 0x8fd   :  { %v2326_v11 = vadd.f32 %v3367_v31, %v2294_v33  ;;  %v2332_v42 = vrot.slane %v2294_v33, 4  ;;  %v2538_v31 = vld [vmem:[%s5108_s5 + $0x21] ss:$0 sm:$0xff]  ;;  %v2688_v33 = vmul.f32 2.0, %v3759_v24 }
 0x8ff   :  { %v3369_v17 = vclamps-f32 %v2326_v11, 1.0 }
 0x901   :  { %3370 = vst [vmem:[%s5107_s6 + $0x14] sm:$0xf] %v3369_v17  ;;  %v2334_v49 = vadd.f32 %v3369_v17, %v2332_v42  ;;  %v3767_v17 = vmov 8.0   ;;  %v2689_v42 = vsub.f32 1.0, %v2688_v33 }
 0x902   :  { %3760 = vrcp.f32 %v3767_v17 }
 0x903   :  { %v3371_v57 = vclamps-f32 %v2334_v49, 1.0 }
 0x904   :  { %v2296_v47 = vpop.f32.mrf.mxu0 }
 0x905   :  { %3372 = vst [vmem:[%s5107_s6 + $0x18] sm:$0xf] %v3371_v57  ;;  %v2339_v19 = vadd.f32 %v3371_v57, %v2296_v47  ;;  %v2345_v12 = vrot.slane %v2296_v47, 4 }
 0x907   :  { %v3373_v6 = vclamps-f32 %v2339_v19, 1.0  ;;  %v2690_v19 = vmul.f32 %v3759_v24, %v2689_v42 }
 0x908   :  { %v3761_v57 = vpop.eup %3760 }
 0x909   :  { %3374 = vst [vmem:[%s5107_s6 + $0x1c] sm:$0xf] %v3373_v6  ;;  %v2347_v55 = vadd.f32 %v3373_v6, %v2345_v12  ;;  %v2756_v12 = vmul.f32 8.0, %v3761_v57  ;;  %vm2760_vm8 = vweird.f32 %v3761_v57 }
 0x90b   :  { %v3375_v21 = vclamps-f32 %v2347_v55, 1.0 }
 0x90c   :  { %v2732_v5 = vpop.f32.mrf.mxu0 }
 0x90d   :  { %3376 = vst [vmem:[%s5107_s6 + $0x20] sm:$0xf] %v3375_v21  ;;  %v2733_v22 = vadd.f32 %v2732_v5, %v2538_v31  ;;  %v2757_v5 = vsub.f32 1.0, %v2756_v12 }
 0x90f   :  { %v2736_v26 = vmul.f32 0.2, %v2733_v22 }
 0x911   :  { %v2737_v44 = vmax.f32 %v2733_v22, %v2736_v26 }
 0x913   :  { %v2738_v52 = vmul.f32 %v2737_v44, %v2539_v36  ;;  %v2764_v44 = vand.u32 127, %v2352_v54 }
 0x914   :  { %v2734_v58 = vpop.f32.mrf.mxu0 }
 0x915   :  { %2739 = vadd.xlane.f32.xlu0 %v2738_v52  ;;  %v2758_v52 = vmul.f32 %v3761_v57, %v2757_v5  ;;  %vm2768_vm6 = vcmp.eq.s32.totalorder %v2764_v44, 1  ;;  %vm2765_vm7 = vcmp.eq.s32.totalorder %v2764_v44, 0  ;;  %vm2771_vm9 = vcmp.eq.s32.totalorder %v2764_v44, 2 }
 0x916   :  { %vm2774_vm10 = vcmp.eq.s32.totalorder %v2764_v44, 3 }
 0x91d   :  { %2496 = vadd.xlane.f32.xlu0 %v2495_v63 }
 0x962   :  { %v2663_v4 = vpop.f32.mrf.mxu2 }
 0x963   :  { %v2664_v38 = vadd.f32 %v2663_v4, %v2538_v31  ;;  %v2691_v31 = vadd.f32 %v3759_v24, %v2690_v19  ;;  %v2759_v4 = vadd.f32 %v3761_v57, %v2758_v52 }
 0x965   :  { %v2667_v23 = vmul.f32 0.2, %v2664_v38  ;;  %v2693_v26 = vsel %vm2692_vm5, %v3759_v24, %v2691_v31 }
 0x967   :  { %v2668_v37 = vmax.f32 %v2664_v38, %v2667_v23  ;;  %v2761_v23 = vsel %vm2760_vm8, %v3761_v57, %v2759_v4 }
 0x969   :  { %v2669_v35 = vmul.f32 %v2668_v37, %v2539_v36 }
 0x96a   :  { %v2665_v8 = vpop.f32.mrf.mxu2 }
 0x96b   :  { %v2671_v43 = vsel %vm2670_vm3, %v2669_v35, 0.0 }
 0x988   :  { %v2740_v16 = vpop.xlane.xlu0 %2739 }
 0x989   :  { %v3447_v29 = vadd.f32 -1.0, %v2740_v16 }
 0x98b   :  { %v2742_v34 = vmul.f32 %v3447_v29, %v3447_v29 }
 0x98d   :  { %v2744_v41 = vsel %vm2743_vm2, %v2742_v34, 0.0 }
 0x98e   :  { %2745 = vadd.xlane.f32.xlu1 %v2744_v41 }
 0x990   :  { %v2497_v46 = vpop.xlane.xlu0 %2496 }
 0x991   :  { %v2498_v45 = vrot.slane %v2497_v46, 4 }
 0x993   :  { %v2499_v3 = vadd.f32 %v2498_v45, %v2497_v46 }
 0x995   :  { %v2500_v53 = vrot.slane %v2499_v3, 2 }
 0x996   :  { %2672 = vadd.xlane.f32.xlu1 %v2671_v43 }
 0x997   :  { %v2501_v39 = vadd.f32 %v2500_v53, %v2499_v3 }
 0x999   :  { %v2502_v18 = vrot.slane %v2501_v39, 1 }
 0x99b   :  { %v2503_v25 = vadd.f32 %v2502_v18, %v2501_v39 }
 0x99d   :  { %3600 = vpush %v2503_v25 }
 0x9ce   :  { %s3601_s5 = spop %3600 }
 0x9cf   :  { %v2766_v63 = vstv %s3601_s5 }
 0x9d0   :  { %v2767_v38 = vsel %vm2765_vm7, %v2766_v63, 0.0 }
 0xa01   :  { %v2746_v20 = vpop.xlane.xlu1 %2745 }
 0xa02   :  { %v2747_v56 = vrot.slane %v2746_v20, 4 }
 0xa04   :  { %v2748_v48 = vadd.f32 %v2747_v56, %v2746_v20 }
 0xa06   :  { %v2749_v7 = vrot.slane %v2748_v48, 2 }
 0xa08   :  { %v2750_v28 = vadd.f32 %v2749_v7, %v2748_v48 }
 0xa09   :  { %v2673_v60 = vpop.xlane.xlu1 %2672 }
 0xa0a   :  { %v2751_v0 = vrot.slane %v2750_v28, 1  ;;  %v2677_v15 = vsub.f32 %v2673_v60, %v3446_v50 }
 0xa0c   :  { %v2752_v13 = vadd.f32 %v2751_v0, %v2750_v28  ;;  %v2678_v14 = vmul.f32 %v2677_v15, %v2677_v15 }
 0xa0e   :  { %3602 = vpush %v2752_v13  ;;  %v2679_v32 = vmul.f32 %v3446_v50, %v2678_v14  ;;  %v2696_v51 = vmul.f32 %v2695_v40, %v2678_v14 }
 0xa10   :  { %v2680_v61 = vsel %vm2670_vm3, %v2679_v32, 0.0  ;;  %v2697_v2 = vsel %vm2670_vm3, %v2696_v51, 0.0 }
 0xa11   :  { %v2681_v10 = vrot.slane %v2680_v61, 4  ;;  %v2698_v11 = vrot.slane %v2697_v2, 4 }
 0xa13   :  { %v2682_v30 = vadd.f32 %v2681_v10, %v2680_v61  ;;  %v2699_v49 = vadd.f32 %v2698_v11, %v2697_v2 }
 0xa15   :  { %v2683_v1 = vrot.slane %v2682_v30, 2  ;;  %v2700_v6 = vrot.slane %v2699_v49, 2 }
 0xa17   :  { %v2684_v47 = vadd.f32 %v2683_v1, %v2682_v30  ;;  %v2701_v21 = vadd.f32 %v2700_v6, %v2699_v49 }
 0xa19   :  { %v2685_v55 = vrot.slane %v2684_v47, 1  ;;  %v2702_v36 = vrot.slane %v2701_v21, 1 }
 0xa1b   :  { %v2686_v22 = vadd.f32 %v2685_v55, %v2684_v47  ;;  %v2703_v62 = vadd.f32 %v2702_v36, %v2701_v21 }
 0xa1d   :  { %v2694_v58 = vmul.f32 %v2693_v26, %v2686_v22  ;;  %v2704_v16 = vmul.f32 %v2703_v62, %v2693_v26 }
 0xa1f   :  { %v2769_v8 = vsel %vm2768_vm6, %v2694_v58, 0.0  ;;  %v2772_v54 = vsel %vm2771_vm9, %v2704_v16, 0.0 }
 0xa20   :  { %v2770_v29 = vadd.f32 %v2769_v8, %v2767_v38 }
 0xa22   :  { %v2773_v41 = vadd.f32 %v2772_v54, %v2770_v29 }
 0xa3f   :  { %s3603_s6 = spop %3602 }
 0xa40   :  { %v2754_v34 = vstv %s3603_s6 }
 0xa41   :  { %v2762_v37 = vmul.f32 %v2761_v23, %v2754_v34 }
 0xa43   :  { %v2775_v46 = vsel %vm2774_vm10, %v2762_v37, 0.0 }
 0xa44   :  { %v2776_v45 = vadd.f32 %v2775_v46, %v2773_v41 }
 0xa46   :  { %v2782_v35 = vsel %vm2781_vm11, %v2776_v45, %v5071_v59 }
 0xa47   :  { %2783 = vst [vmem:[%s5112_s7] sm:$0xff] %v2782_v35 }

</bundles_post_ra>
